<compile_context>
chip_gen: v5e
topology: v5e:2x2
jax: 0.10.0
libtpu: 0.0.40
codegen_flags: <defaults>
</compile_context>

<pallas_src>
import functools

import jax
import jax.numpy as jnp
from jax.experimental import pallas as pl
from jax.experimental.pallas import tpu as pltpu

# ----------------------------- config (small, synthetic) -----------------------------
BATCH = 2
CHANNELS = 3
IMG = 16
PATCH = 8
NUM_PATCHES = (IMG // PATCH) ** 2          # 4
VIT_SEQ = 1 + NUM_PATCHES                  # 5 = CLS + patches (valid rows)
VIT_T = 8                                  # padded ViT sequence (sublane multiple)
HIDDEN = 32                                # shared ViT / GPT2 hidden
HEADS = 4
HEAD_DIM = HIDDEN // HEADS
MLP = 4 * HIDDEN
VIT_LAYERS = 2
GPT2_LAYERS = 2
SEQ = 8                                    # caption length
VOCAB = 64
MAX_POS = 16
PATCH_DIM = CHANNELS * PATCH * PATCH       # 192


# ----------------------------- kernel helpers -----------------------------
def _gelu_tanh(x):
    # TODO(synk): HF ViT uses exact erf-GELU; tanh-approx GELU ("gelu_new") is used for
    # both ViT and GPT2 here (numerically very close, keeps lowering simple).
    c = jnp.sqrt(2.0 / jnp.pi).astype(x.dtype)
    return 0.5 * x * (1.0 + jnp.tanh(c * (x + 0.044715 * x * x * x)))


def _const_map(nd):
    # weights: same (full) block every grid step -> stays resident in VMEM
    return lambda b: (0,) * nd


# ----------------------------- fully-fused forward kernel -----------------------------
def _captioner_kernel(names, seq_len, patches_ref, *refs):
    prm = dict(zip(names, refs[: len(names)]))
    out_ref = refs[len(names)]

    def dense(x, w, b=None, act=None):
        # bf16 MXU operands, f32 accumulation; everything else stays f32.
        y = jnp.dot(x.astype(jnp.bfloat16), w.astype(jnp.bfloat16),
                    preferred_element_type=jnp.float32)
        if b is not None:
            y = y + b
        if act == "gelu":
            y = _gelu_tanh(y)
        return y

    def layernorm(x, g, b, eps):
        mu = jnp.mean(x, axis=-1, keepdims=True)
        xc = x - mu
        var = jnp.mean(xc * xc, axis=-1, keepdims=True)
        return xc * jax.lax.rsqrt(var + eps) * g + b

    def mha(x_ln, w_qkv, b_qkv, w_o, b_o, causal, kv_valid):
        t = x_ln.shape[0]
        qkv = dense(x_ln, w_qkv, b_qkv)                        # (t, 3*HIDDEN), one matmul
        col = jax.lax.broadcasted_iota(jnp.int32, (t, t), 1)
        mask = col < kv_valid                                  # mask padded keys
        if causal:
            row = jax.lax.broadcasted_iota(jnp.int32, (t, t), 0)
            mask = jnp.logical_and(mask, col <= row)
        scale = 1.0 / float(HEAD_DIM) ** 0.5
        acc = jnp.zeros((t, HIDDEN), jnp.float32)
        for h in range(HEADS):                                 # static unroll over heads
            lo = h * HEAD_DIM
            q = qkv[:, lo:lo + HEAD_DIM]
            k = qkv[:, HIDDEN + lo:HIDDEN + lo + HEAD_DIM]
            v = qkv[:, 2 * HIDDEN + lo:2 * HIDDEN + lo + HEAD_DIM]
            s = jnp.einsum("qd,kd->qk", q, k, preferred_element_type=jnp.float32) * scale
            s = jnp.where(mask, s, -1e30)
            s = s - jnp.max(s, axis=-1, keepdims=True)
            p = jnp.exp(s)
            p = p * pl.reciprocal(jnp.sum(p, axis=-1, keepdims=True), approx=True)
            o = jnp.einsum("qk,kd->qd", p, v, preferred_element_type=jnp.float32)
            # merge_heads + output projection fused: concat_h(o_h) @ W_o == sum_h o_h @ W_o[rows_h]
            acc = acc + jnp.dot(o.astype(jnp.bfloat16),
                                w_o[lo:lo + HEAD_DIM, :].astype(jnp.bfloat16),
                                preferred_element_type=jnp.float32)
        return acc + b_o

    def block(x, prefix, eps, causal, kv_valid):
        g = lambda n: prm[prefix + n][...]
        h = layernorm(x, g("ln1_g"), g("ln1_b"), eps)
        x = x + mha(h, g("w_qkv"), g("b_qkv"), g("w_o"), g("b_o"), causal, kv_valid)
        h = layernorm(x, g("ln2_g"), g("ln2_b"), eps)
        m = dense(h, g("w_fc"), g("b_fc"), act="gelu")
        return x + dense(m, g("w_proj"), g("b_proj"))

    # ---------------- ViT encoder ----------------
    patches = patches_ref[0]                                   # (VIT_T, PATCH_DIM); rows 0,5..7 = 0
    # patch embedding; CLS / pos / patch-bias pre-folded into vit_base (batch independent)
    x = dense(patches, prm["vit_patch_w"][...]) + prm["vit_base"][...]
    for i in range(VIT_LAYERS):
        x = block(x, f"vit{i}_", 1e-12, causal=False, kv_valid=VIT_SEQ)
    x = layernorm(x, prm["vit_lnf_g"][...], prm["vit_lnf_b"][...], 1e-12)

    # features = vit(images).last_hidden_state[:, 0, :]  repeated over caption length
    feat = x[0:1, :]                                           # CLS row
    hdd = jnp.broadcast_to(feat, (seq_len, HIDDEN)) + prm["gpt_wpe"][...]

    # ---------------- GPT2 decoder (inputs_embeds path; labels only affect loss) ----------------
    for i in range(GPT2_LAYERS):
        hdd = block(hdd, f"gpt{i}_", 1e-5, causal=True, kv_valid=seq_len)
    hdd = layernorm(hdd, prm["gpt_lnf_g"][...], prm["gpt_lnf_b"][...], 1e-5)

    # LM head (bias-less)
    out_ref[0] = dense(hdd, prm["gpt_lm_head_w"][...])


# ----------------------------- wrapper (plain JAX glue + single pallas_call) -----------------------------
def captioning_forward(params, images, captions):
    """images: (B, C, H, W) float32 (NCHW), captions: (B, T) int32 -> logits (B, T, VOCAB)."""
    b, c, h, w = images.shape
    t_cap = captions.shape[1]           # captions only set the length; labels don't change logits
    hp, wp = h // PATCH, w // PATCH
    pdim = c * PATCH * PATCH

    # patch extraction (Conv2d k=s=patch == per-patch matmul), padded to VIT_T rows
    patches = images.reshape(b, c, hp, PATCH, wp, PATCH)
    patches = patches.transpose(0, 2, 4, 1, 3, 5).reshape(b, hp * wp, pdim)
    patches_pad = jnp.zeros((b, VIT_T, pdim), jnp.float32).at[:, 1:1 + hp * wp].set(patches)

    vit, gpt = params["vit"], params["gpt2"]

    # batch-independent additive term for the padded ViT sequence:
    # row 0 = CLS + pos[0]; rows 1..N = patch_bias + pos[i]; padded rows = 0
    base = jnp.zeros((VIT_T, HIDDEN), jnp.float32)
    base = base.at[0].set(vit["cls"].reshape(HIDDEN) + vit["pos"][0, 0])
    base = base.at[1:1 + NUM_PATCHES].set(vit["patch_b"][None, :]
                                          + vit["pos"][0, 1:1 + NUM_PATCHES])

    kp = {"vit_patch_w": vit["patch_w"], "vit_base": base}

    def add_block(prefix, blk):
        kp[prefix + "ln1_g"] = blk["ln1_g"].reshape(1, HIDDEN)
        kp[prefix + "ln1_b"] = blk["ln1_b"].reshape(1, HIDDEN)
        kp[prefix + "w_qkv"] = blk["w_qkv"]
        kp[prefix + "b_qkv"] = blk["b_qkv"].reshape(1, 3 * HIDDEN)
        kp[prefix + "w_o"] = blk["w_o"]
        kp[prefix + "b_o"] = blk["b_o"].reshape(1, HIDDEN)
        kp[prefix + "ln2_g"] = blk["ln2_g"].reshape(1, HIDDEN)
        kp[prefix + "ln2_b"] = blk["ln2_b"].reshape(1, HIDDEN)
        kp[prefix + "w_fc"] = blk["w_fc"]
        kp[prefix + "b_fc"] = blk["b_fc"].reshape(1, MLP)
        kp[prefix + "w_proj"] = blk["w_proj"]
        kp[prefix + "b_proj"] = blk["b_proj"].reshape(1, HIDDEN)

    for i, blk in enumerate(vit["blocks"]):
        add_block(f"vit{i}_", blk)
    kp["vit_lnf_g"] = vit["lnf_g"].reshape(1, HIDDEN)
    kp["vit_lnf_b"] = vit["lnf_b"].reshape(1, HIDDEN)
    kp["gpt_wpe"] = gpt["wpe"][:t_cap]
    for i, blk in enumerate(gpt["blocks"]):
        add_block(f"gpt{i}_", blk)
    kp["gpt_lnf_g"] = gpt["lnf_g"].reshape(1, HIDDEN)
    kp["gpt_lnf_b"] = gpt["lnf_b"].reshape(1, HIDDEN)
    kp["gpt_lm_head_w"] = gpt["lm_head_w"]
    # TODO(synk): at real GPT2/ViT-B sizes (VOCAB=50257, HIDDEN=768) tile the lm_head over
    # vocab with a grid axis (N tile multiple of 128) and re-size tiles for v7x's 64 MiB VMEM.

    names = tuple(kp.keys())
    values = [kp[n] for n in names]

    in_specs = [pl.BlockSpec((1, VIT_T, pdim), lambda i: (i, 0, 0))]
    in_specs += [pl.BlockSpec(v.shape, _const_map(v.ndim)) for v in values]
    out_specs = pl.BlockSpec((1, t_cap, VOCAB), lambda i: (i, 0, 0))

    cost = pl.CostEstimate(flops=2_200_000, transcendentals=12_000, bytes_accessed=400_000)

    return pl.pallas_call(
        functools.partial(_captioner_kernel, names, t_cap),
        out_shape=jax.ShapeDtypeStruct((b, t_cap, VOCAB), jnp.float32),
        grid=(b,),
        in_specs=in_specs,
        out_specs=out_specs,
        compiler_params=pltpu.CompilerParams(
            dimension_semantics=("parallel",),          # v7x: shard batch over both TCs
            vmem_limit_bytes=32 * 1024 * 1024),
        cost_estimate=cost,
    )(patches_pad, *values)


# ----------------------------- deterministic parameter init -----------------------------
def _linear(key, din, dout, scale=0.02):
    kw, kb = jax.random.split(key)
    return (jax.random.normal(kw, (din, dout), jnp.float32) * scale,
            jax.random.normal(kb, (dout,), jnp.float32) * scale)


def _ln(dim):
    return jnp.ones((dim,), jnp.float32), jnp.zeros((dim,), jnp.float32)


def init_block(key):
    ks = jax.random.split(key, 4)
    w_qkv, b_qkv = _linear(ks[0], HIDDEN, 3 * HIDDEN)   # fused Q/K/V (single matmul per block)
    w_o, b_o = _linear(ks[1], HIDDEN, HIDDEN)
    w_fc, b_fc = _linear(ks[2], HIDDEN, MLP)
    w_proj, b_proj = _linear(ks[3], MLP, HIDDEN)
    g1, e1 = _ln(HIDDEN)
    g2, e2 = _ln(HIDDEN)
    return dict(ln1_g=g1, ln1_b=e1, w_qkv=w_qkv, b_qkv=b_qkv, w_o=w_o, b_o=b_o,
                ln2_g=g2, ln2_b=e2, w_fc=w_fc, b_fc=b_fc, w_proj=w_proj, b_proj=b_proj)


def init_params(key):
    k_vit, k_gpt = jax.random.split(key)
    kv = jax.random.split(k_vit, VIT_LAYERS + 3)
    patch_w, patch_b = _linear(kv[0], PATCH_DIM, HIDDEN)
    cls = jax.random.normal(kv[1], (1, 1, HIDDEN), jnp.float32) * 0.02
    pos = jax.random.normal(kv[2], (1, VIT_SEQ, HIDDEN), jnp.float32) * 0.02
    vit_blocks = [init_block(kv[3 + i]) for i in range(VIT_LAYERS)]
    vg, vb = _ln(HIDDEN)
    vit = dict(patch_w=patch_w, patch_b=patch_b, cls=cls, pos=pos,
               blocks=vit_blocks, lnf_g=vg, lnf_b=vb)

    kg = jax.random.split(k_gpt, GPT2_LAYERS + 2)
    wpe = jax.random.normal(kg[0], (MAX_POS, HIDDEN), jnp.float32) * 0.02
    gpt_blocks = [init_block(kg[1 + i]) for i in range(GPT2_LAYERS)]
    lm_head_w = jax.random.normal(kg[GPT2_LAYERS + 1], (HIDDEN, VOCAB), jnp.float32) * 0.02
    gg, gb = _ln(HIDDEN)
    gpt2 = dict(wpe=wpe, blocks=gpt_blocks, lnf_g=gg, lnf_b=gb, lm_head_w=lm_head_w)
    return dict(vit=vit, gpt2=gpt2)


# ----------------------------- main -----------------------------
if __name__ == "__main__":
    key = jax.random.PRNGKey(0)
    k_params, k_img, k_cap = jax.random.split(key, 3)
    params = init_params(k_params)
    images = jax.random.normal(k_img, (BATCH, CHANNELS, IMG, IMG), jnp.float32)   # NCHW
    captions = jax.random.randint(k_cap, (BATCH, SEQ), 0, VOCAB, dtype=jnp.int32)

    forward = jax.jit(captioning_forward)
    logits = jax.block_until_ready(forward(params, images, captions))
    assert logits.shape == (BATCH, SEQ, VOCAB)
    assert bool(jnp.all(jnp.isfinite(logits)))
    print("KERNEL_OK")
</pallas_src>

<mosaic_0001>
module attributes {stable_mosaic.version = 11 : i64} {
  func.func @_captioner_kernel(%arg0: i32, %arg1: memref<1x8x192xf32, #tpu.memory_space<vmem>>, %arg2: memref<192x32xf32, #tpu.memory_space<vmem>>, %arg3: memref<8x32xf32, #tpu.memory_space<vmem>>, %arg4: memref<1x32xf32, #tpu.memory_space<vmem>>, %arg5: memref<1x32xf32, #tpu.memory_space<vmem>>, %arg6: memref<32x96xf32, #tpu.memory_space<vmem>>, %arg7: memref<1x96xf32, #tpu.memory_space<vmem>>, %arg8: memref<32x32xf32, #tpu.memory_space<vmem>>, %arg9: memref<1x32xf32, #tpu.memory_space<vmem>>, %arg10: memref<1x32xf32, #tpu.memory_space<vmem>>, %arg11: memref<1x32xf32, #tpu.memory_space<vmem>>, %arg12: memref<32x128xf32, #tpu.memory_space<vmem>>, %arg13: memref<1x128xf32, #tpu.memory_space<vmem>>, %arg14: memref<128x32xf32, #tpu.memory_space<vmem>>, %arg15: memref<1x32xf32, #tpu.memory_space<vmem>>, %arg16: memref<1x32xf32, #tpu.memory_space<vmem>>, %arg17: memref<1x32xf32, #tpu.memory_space<vmem>>, %arg18: memref<32x96xf32, #tpu.memory_space<vmem>>, %arg19: memref<1x96xf32, #tpu.memory_space<vmem>>, %arg20: memref<32x32xf32, #tpu.memory_space<vmem>>, %arg21: memref<1x32xf32, #tpu.memory_space<vmem>>, %arg22: memref<1x32xf32, #tpu.memory_space<vmem>>, %arg23: memref<1x32xf32, #tpu.memory_space<vmem>>, %arg24: memref<32x128xf32, #tpu.memory_space<vmem>>, %arg25: memref<1x128xf32, #tpu.memory_space<vmem>>, %arg26: memref<128x32xf32, #tpu.memory_space<vmem>>, %arg27: memref<1x32xf32, #tpu.memory_space<vmem>>, %arg28: memref<1x32xf32, #tpu.memory_space<vmem>>, %arg29: memref<1x32xf32, #tpu.memory_space<vmem>>, %arg30: memref<8x32xf32, #tpu.memory_space<vmem>>, %arg31: memref<1x32xf32, #tpu.memory_space<vmem>>, %arg32: memref<1x32xf32, #tpu.memory_space<vmem>>, %arg33: memref<32x96xf32, #tpu.memory_space<vmem>>, %arg34: memref<1x96xf32, #tpu.memory_space<vmem>>, %arg35: memref<32x32xf32, #tpu.memory_space<vmem>>, %arg36: memref<1x32xf32, #tpu.memory_space<vmem>>, %arg37: memref<1x32xf32, #tpu.memory_space<vmem>>, %arg38: memref<1x32xf32, #tpu.memory_space<vmem>>, %arg39: memref<32x128xf32, #tpu.memory_space<vmem>>, %arg40: memref<1x128xf32, #tpu.memory_space<vmem>>, %arg41: memref<128x32xf32, #tpu.memory_space<vmem>>, %arg42: memref<1x32xf32, #tpu.memory_space<vmem>>, %arg43: memref<1x32xf32, #tpu.memory_space<vmem>>, %arg44: memref<1x32xf32, #tpu.memory_space<vmem>>, %arg45: memref<32x96xf32, #tpu.memory_space<vmem>>, %arg46: memref<1x96xf32, #tpu.memory_space<vmem>>, %arg47: memref<32x32xf32, #tpu.memory_space<vmem>>, %arg48: memref<1x32xf32, #tpu.memory_space<vmem>>, %arg49: memref<1x32xf32, #tpu.memory_space<vmem>>, %arg50: memref<1x32xf32, #tpu.memory_space<vmem>>, %arg51: memref<32x128xf32, #tpu.memory_space<vmem>>, %arg52: memref<1x128xf32, #tpu.memory_space<vmem>>, %arg53: memref<128x32xf32, #tpu.memory_space<vmem>>, %arg54: memref<1x32xf32, #tpu.memory_space<vmem>>, %arg55: memref<1x32xf32, #tpu.memory_space<vmem>>, %arg56: memref<1x32xf32, #tpu.memory_space<vmem>>, %arg57: memref<32x64xf32, #tpu.memory_space<vmem>>, %arg58: memref<1x8x64xf32, #tpu.memory_space<vmem>>) attributes {dimension_semantics = [#tpu.dimension_semantics<parallel>], iteration_bounds = array<i64: 2>, scalar_prefetch = 0 : i64, scratch_operands = 0 : i64, tpu.core_type = #tpu.core_type<tc>, window_params = [{transform_indices = @transform_0, window_bounds = array<i64: 1, 8, 192>}, {pipeline_mode = #tpu.pipeline_mode<synchronous>, transform_indices = @transform_1, window_bounds = array<i64: 192, 32>}, {pipeline_mode = #tpu.pipeline_mode<synchronous>, transform_indices = @transform_2, window_bounds = array<i64: 8, 32>}, {pipeline_mode = #tpu.pipeline_mode<synchronous>, transform_indices = @transform_3, window_bounds = array<i64: 1, 32>}, {pipeline_mode = #tpu.pipeline_mode<synchronous>, transform_indices = @transform_4, window_bounds = array<i64: 1, 32>}, {pipeline_mode = #tpu.pipeline_mode<synchronous>, transform_indices = @transform_5, window_bounds = array<i64: 32, 96>}, {pipeline_mode = #tpu.pipeline_mode<synchronous>, transform_indices = @transform_6, window_bounds = array<i64: 1, 96>}, {pipeline_mode = #tpu.pipeline_mode<synchronous>, transform_indices = @transform_7, window_bounds = array<i64: 32, 32>}, {pipeline_mode = #tpu.pipeline_mode<synchronous>, transform_indices = @transform_8, window_bounds = array<i64: 1, 32>}, {pipeline_mode = #tpu.pipeline_mode<synchronous>, transform_indices = @transform_9, window_bounds = array<i64: 1, 32>}, {pipeline_mode = #tpu.pipeline_mode<synchronous>, transform_indices = @transform_10, window_bounds = array<i64: 1, 32>}, {pipeline_mode = #tpu.pipeline_mode<synchronous>, transform_indices = @transform_11, window_bounds = array<i64: 32, 128>}, {pipeline_mode = #tpu.pipeline_mode<synchronous>, transform_indices = @transform_12, window_bounds = array<i64: 1, 128>}, {pipeline_mode = #tpu.pipeline_mode<synchronous>, transform_indices = @transform_13, window_bounds = array<i64: 128, 32>}, {pipeline_mode = #tpu.pipeline_mode<synchronous>, transform_indices = @transform_14, window_bounds = array<i64: 1, 32>}, {pipeline_mode = #tpu.pipeline_mode<synchronous>, transform_indices = @transform_15, window_bounds = array<i64: 1, 32>}, {pipeline_mode = #tpu.pipeline_mode<synchronous>, transform_indices = @transform_16, window_bounds = array<i64: 1, 32>}, {pipeline_mode = #tpu.pipeline_mode<synchronous>, transform_indices = @transform_17, window_bounds = array<i64: 32, 96>}, {pipeline_mode = #tpu.pipeline_mode<synchronous>, transform_indices = @transform_18, window_bounds = array<i64: 1, 96>}, {pipeline_mode = #tpu.pipeline_mode<synchronous>, transform_indices = @transform_19, window_bounds = array<i64: 32, 32>}, {pipeline_mode = #tpu.pipeline_mode<synchronous>, transform_indices = @transform_20, window_bounds = array<i64: 1, 32>}, {pipeline_mode = #tpu.pipeline_mode<synchronous>, transform_indices = @transform_21, window_bounds = array<i64: 1, 32>}, {pipeline_mode = #tpu.pipeline_mode<synchronous>, transform_indices = @transform_22, window_bounds = array<i64: 1, 32>}, {pipeline_mode = #tpu.pipeline_mode<synchronous>, transform_indices = @transform_23, window_bounds = array<i64: 32, 128>}, {pipeline_mode = #tpu.pipeline_mode<synchronous>, transform_indices = @transform_24, window_bounds = array<i64: 1, 128>}, {pipeline_mode = #tpu.pipeline_mode<synchronous>, transform_indices = @transform_25, window_bounds = array<i64: 128, 32>}, {pipeline_mode = #tpu.pipeline_mode<synchronous>, transform_indices = @transform_26, window_bounds = array<i64: 1, 32>}, {pipeline_mode = #tpu.pipeline_mode<synchronous>, transform_indices = @transform_27, window_bounds = array<i64: 1, 32>}, {pipeline_mode = #tpu.pipeline_mode<synchronous>, transform_indices = @transform_28, window_bounds = array<i64: 1, 32>}, {pipeline_mode = #tpu.pipeline_mode<synchronous>, transform_indices = @transform_29, window_bounds = array<i64: 8, 32>}, {pipeline_mode = #tpu.pipeline_mode<synchronous>, transform_indices = @transform_30, window_bounds = array<i64: 1, 32>}, {pipeline_mode = #tpu.pipeline_mode<synchronous>, transform_indices = @transform_31, window_bounds = array<i64: 1, 32>}, {pipeline_mode = #tpu.pipeline_mode<synchronous>, transform_indices = @transform_32, window_bounds = array<i64: 32, 96>}, {pipeline_mode = #tpu.pipeline_mode<synchronous>, transform_indices = @transform_33, window_bounds = array<i64: 1, 96>}, {pipeline_mode = #tpu.pipeline_mode<synchronous>, transform_indices = @transform_34, window_bounds = array<i64: 32, 32>}, {pipeline_mode = #tpu.pipeline_mode<synchronous>, transform_indices = @transform_35, window_bounds = array<i64: 1, 32>}, {pipeline_mode = #tpu.pipeline_mode<synchronous>, transform_indices = @transform_36, window_bounds = array<i64: 1, 32>}, {pipeline_mode = #tpu.pipeline_mode<synchronous>, transform_indices = @transform_37, window_bounds = array<i64: 1, 32>}, {pipeline_mode = #tpu.pipeline_mode<synchronous>, transform_indices = @transform_38, window_bounds = array<i64: 32, 128>}, {pipeline_mode = #tpu.pipeline_mode<synchronous>, transform_indices = @transform_39, window_bounds = array<i64: 1, 128>}, {pipeline_mode = #tpu.pipeline_mode<synchronous>, transform_indices = @transform_40, window_bounds = array<i64: 128, 32>}, {pipeline_mode = #tpu.pipeline_mode<synchronous>, transform_indices = @transform_41, window_bounds = array<i64: 1, 32>}, {pipeline_mode = #tpu.pipeline_mode<synchronous>, transform_indices = @transform_42, window_bounds = array<i64: 1, 32>}, {pipeline_mode = #tpu.pipeline_mode<synchronous>, transform_indices = @transform_43, window_bounds = array<i64: 1, 32>}, {pipeline_mode = #tpu.pipeline_mode<synchronous>, transform_indices = @transform_44, window_bounds = array<i64: 32, 96>}, {pipeline_mode = #tpu.pipeline_mode<synchronous>, transform_indices = @transform_45, window_bounds = array<i64: 1, 96>}, {pipeline_mode = #tpu.pipeline_mode<synchronous>, transform_indices = @transform_46, window_bounds = array<i64: 32, 32>}, {pipeline_mode = #tpu.pipeline_mode<synchronous>, transform_indices = @transform_47, window_bounds = array<i64: 1, 32>}, {pipeline_mode = #tpu.pipeline_mode<synchronous>, transform_indices = @transform_48, window_bounds = array<i64: 1, 32>}, {pipeline_mode = #tpu.pipeline_mode<synchronous>, transform_indices = @transform_49, window_bounds = array<i64: 1, 32>}, {pipeline_mode = #tpu.pipeline_mode<synchronous>, transform_indices = @transform_50, window_bounds = array<i64: 32, 128>}, {pipeline_mode = #tpu.pipeline_mode<synchronous>, transform_indices = @transform_51, window_bounds = array<i64: 1, 128>}, {pipeline_mode = #tpu.pipeline_mode<synchronous>, transform_indices = @transform_52, window_bounds = array<i64: 128, 32>}, {pipeline_mode = #tpu.pipeline_mode<synchronous>, transform_indices = @transform_53, window_bounds = array<i64: 1, 32>}, {pipeline_mode = #tpu.pipeline_mode<synchronous>, transform_indices = @transform_54, window_bounds = array<i64: 1, 32>}, {pipeline_mode = #tpu.pipeline_mode<synchronous>, transform_indices = @transform_55, window_bounds = array<i64: 1, 32>}, {pipeline_mode = #tpu.pipeline_mode<synchronous>, transform_indices = @transform_56, window_bounds = array<i64: 32, 64>}, {transform_indices = @transform_57, window_bounds = array<i64: 1, 8, 64>}]} {
    %c0 = arith.constant 0 : index
    %c0_0 = arith.constant 0 : index
    %c0_1 = arith.constant 0 : index
    %0 = vector.load %arg1[%c0, %c0_0, %c0_1] : memref<1x8x192xf32, #tpu.memory_space<vmem>>, vector<1x8x192xf32>
    %1 = vector.shape_cast %0 : vector<1x8x192xf32> to vector<8x192xf32>
    %c0_2 = arith.constant 0 : index
    %c0_3 = arith.constant 0 : index
    %2 = vector.load %arg2[%c0_2, %c0_3] : memref<192x32xf32, #tpu.memory_space<vmem>>, vector<192x32xf32>
    %3 = arith.truncf %1 : vector<8x192xf32> to vector<8x192xbf16>
    %4 = arith.truncf %2 : vector<192x32xf32> to vector<192x32xbf16>
    %cst = arith.constant dense<0.000000e+00> : vector<8x32xf32>
    %5 = tpu.matmul %3, %4, %cst {dimension_numbers = #tpu.dot_dimension_numbers<[1], [0], [0], [1], [0, 0, 1, 1], [], []>} : vector<8x192xbf16>, vector<192x32xbf16>, vector<8x32xf32> -> vector<8x32xf32>
    %c0_4 = arith.constant 0 : index
    %c0_5 = arith.constant 0 : index
    %6 = vector.load %arg3[%c0_4, %c0_5] : memref<8x32xf32, #tpu.memory_space<vmem>>, vector<8x32xf32>
    %7 = arith.addf %5, %6 : vector<8x32xf32>
    %c0_6 = arith.constant 0 : index
    %c0_7 = arith.constant 0 : index
    %8 = vector.load %arg4[%c0_6, %c0_7] : memref<1x32xf32, #tpu.memory_space<vmem>>, vector<1x32xf32>
    %c0_8 = arith.constant 0 : index
    %c0_9 = arith.constant 0 : index
    %9 = vector.load %arg5[%c0_8, %c0_9] : memref<1x32xf32, #tpu.memory_space<vmem>>, vector<1x32xf32>
    %cst_10 = arith.constant dense<0.000000e+00> : vector<8xf32>
    %10 = vector.multi_reduction <add>, %7, %cst_10 [1] : vector<8x32xf32> to vector<8xf32>
    %11 = vector.shape_cast %10 : vector<8xf32> to vector<8x1xf32>
    %cst_11 = arith.constant 3.200000e+01 : f32
    %12 = vector.broadcast %cst_11 : f32 to vector<8x1xf32>
    %13 = arith.divf %11, %12 : vector<8x1xf32>
    %14 = vector.broadcast %13 : vector<8x1xf32> to vector<8x32xf32>
    %15 = arith.subf %7, %14 : vector<8x32xf32>
    %16 = arith.mulf %15, %15 : vector<8x32xf32>
    %cst_12 = arith.constant dense<0.000000e+00> : vector<8xf32>
    %17 = vector.multi_reduction <add>, %16, %cst_12 [1] : vector<8x32xf32> to vector<8xf32>
    %18 = vector.shape_cast %17 : vector<8xf32> to vector<8x1xf32>
    %cst_13 = arith.constant 3.200000e+01 : f32
    %19 = vector.broadcast %cst_13 : f32 to vector<8x1xf32>
    %20 = arith.divf %18, %19 : vector<8x1xf32>
    %cst_14 = arith.constant 9.99999996E-13 : f32
    %21 = vector.broadcast %cst_14 : f32 to vector<8x1xf32>
    %22 = arith.addf %20, %21 : vector<8x1xf32>
    %23 = math.rsqrt %22 : vector<8x1xf32>
    %24 = vector.broadcast %23 : vector<8x1xf32> to vector<8x32xf32>
    %25 = arith.mulf %15, %24 : vector<8x32xf32>
    %26 = vector.broadcast %8 : vector<1x32xf32> to vector<8x32xf32>
    %27 = arith.mulf %25, %26 : vector<8x32xf32>
    %28 = vector.broadcast %9 : vector<1x32xf32> to vector<8x32xf32>
    %29 = arith.addf %27, %28 : vector<8x32xf32>
    %c0_15 = arith.constant 0 : index
    %c0_16 = arith.constant 0 : index
    %30 = vector.load %arg6[%c0_15, %c0_16] : memref<32x96xf32, #tpu.memory_space<vmem>>, vector<32x96xf32>
    %c0_17 = arith.constant 0 : index
    %c0_18 = arith.constant 0 : index
    %31 = vector.load %arg7[%c0_17, %c0_18] : memref<1x96xf32, #tpu.memory_space<vmem>>, vector<1x96xf32>
    %c0_19 = arith.constant 0 : index
    %c0_20 = arith.constant 0 : index
    %32 = vector.load %arg8[%c0_19, %c0_20] : memref<32x32xf32, #tpu.memory_space<vmem>>, vector<32x32xf32>
    %c0_21 = arith.constant 0 : index
    %c0_22 = arith.constant 0 : index
    %33 = vector.load %arg9[%c0_21, %c0_22] : memref<1x32xf32, #tpu.memory_space<vmem>>, vector<1x32xf32>
    %34 = arith.truncf %29 : vector<8x32xf32> to vector<8x32xbf16>
    %35 = arith.truncf %30 : vector<32x96xf32> to vector<32x96xbf16>
    %cst_23 = arith.constant dense<0.000000e+00> : vector<8x96xf32>
    %36 = tpu.matmul %34, %35, %cst_23 {dimension_numbers = #tpu.dot_dimension_numbers<[1], [0], [0], [1], [0, 0, 1, 1], [], []>} : vector<8x32xbf16>, vector<32x96xbf16>, vector<8x96xf32> -> vector<8x96xf32>
    %37 = vector.broadcast %31 : vector<1x96xf32> to vector<8x96xf32>
    %38 = arith.addf %36, %37 : vector<8x96xf32>
    %39 = tpu.iota {dimensions = array<i32: 1>} : vector<8x8xi32>
    %c5_i32 = arith.constant 5 : i32
    %40 = vector.broadcast %c5_i32 : i32 to vector<8x8xi32>
    %41 = arith.cmpi slt, %39, %40 : vector<8x8xi32>
    %cst_24 = arith.constant 0.000000e+00 : f32
    %42 = vector.broadcast %cst_24 : f32 to vector<8x32xf32>
    %43 = vector.extract_strided_slice %38 {offsets = [0, 0], sizes = [8, 8], strides = [1, 1]} : vector<8x96xf32> to vector<8x8xf32>
    %44 = vector.extract_strided_slice %38 {offsets = [0, 32], sizes = [8, 8], strides = [1, 1]} : vector<8x96xf32> to vector<8x8xf32>
    %45 = vector.extract_strided_slice %38 {offsets = [0, 64], sizes = [8, 8], strides = [1, 1]} : vector<8x96xf32> to vector<8x8xf32>
    "tpu.trace_start"() <{level = 10 : i32, message = "qd,kd->qk"}> : () -> ()
    %cst_25 = arith.constant dense<0.000000e+00> : vector<8x8xf32>
    %46 = tpu.matmul %43, %44, %cst_25 {dimension_numbers = #tpu.dot_dimension_numbers<[1], [1], [0], [0], [0, 0, 1, 0], [], []>} : vector<8x8xf32>, vector<8x8xf32>, vector<8x8xf32> -> vector<8x8xf32>
    "tpu.trace_stop"() : () -> ()
    %cst_26 = arith.constant 0.353553385 : f32
    %47 = vector.broadcast %cst_26 : f32 to vector<8x8xf32>
    %48 = arith.mulf %46, %47 : vector<8x8xf32>
    %cst_27 = arith.constant -1.000000e+30 : f32
    %49 = vector.broadcast %cst_27 : f32 to vector<8x8xf32>
    %50 = arith.select %41, %48, %49 : vector<8x8xi1>, vector<8x8xf32>
    %cst_28 = arith.constant dense<0xFF800000> : vector<8xf32>
    %51 = vector.multi_reduction <maximumf>, %50, %cst_28 [1] : vector<8x8xf32> to vector<8xf32>
    %52 = vector.shape_cast %51 : vector<8xf32> to vector<8x1xf32>
    %53 = vector.broadcast %52 : vector<8x1xf32> to vector<8x8xf32>
    %54 = arith.subf %50, %53 : vector<8x8xf32>
    %55 = math.exp %54 : vector<8x8xf32>
    %cst_29 = arith.constant dense<0.000000e+00> : vector<8xf32>
    %56 = vector.multi_reduction <add>, %55, %cst_29 [1] : vector<8x8xf32> to vector<8xf32>
    %57 = vector.shape_cast %56 : vector<8xf32> to vector<8x1xf32>
    %58 = tpu.reciprocal %57 {approx = true} : vector<8x1xf32> -> vector<8x1xf32>
    %59 = vector.broadcast %58 : vector<8x1xf32> to vector<8x8xf32>
    %60 = arith.mulf %55, %59 : vector<8x8xf32>
    "tpu.trace_start"() <{level = 10 : i32, message = "qk,kd->qd"}> : () -> ()
    %cst_30 = arith.constant dense<0.000000e+00> : vector<8x8xf32>
    %61 = tpu.matmul %60, %45, %cst_30 {dimension_numbers = #tpu.dot_dimension_numbers<[1], [0], [0], [1], [0, 0, 1, 1], [], []>} : vector<8x8xf32>, vector<8x8xf32>, vector<8x8xf32> -> vector<8x8xf32>
    "tpu.trace_stop"() : () -> ()
    %62 = arith.truncf %61 : vector<8x8xf32> to vector<8x8xbf16>
    %63 = vector.extract_strided_slice %32 {offsets = [0, 0], sizes = [8, 32], strides = [1, 1]} : vector<32x32xf32> to vector<8x32xf32>
    %64 = arith.truncf %63 : vector<8x32xf32> to vector<8x32xbf16>
    %cst_31 = arith.constant dense<0.000000e+00> : vector<8x32xf32>
    %65 = tpu.matmul %62, %64, %cst_31 {dimension_numbers = #tpu.dot_dimension_numbers<[1], [0], [0], [1], [0, 0, 1, 1], [], []>} : vector<8x8xbf16>, vector<8x32xbf16>, vector<8x32xf32> -> vector<8x32xf32>
    %66 = arith.addf %42, %65 : vector<8x32xf32>
    %67 = vector.extract_strided_slice %38 {offsets = [0, 8], sizes = [8, 8], strides = [1, 1]} : vector<8x96xf32> to vector<8x8xf32>
    %68 = vector.extract_strided_slice %38 {offsets = [0, 40], sizes = [8, 8], strides = [1, 1]} : vector<8x96xf32> to vector<8x8xf32>
    %69 = vector.extract_strided_slice %38 {offsets = [0, 72], sizes = [8, 8], strides = [1, 1]} : vector<8x96xf32> to vector<8x8xf32>
    "tpu.trace_start"() <{level = 10 : i32, message = "qd,kd->qk"}> : () -> ()
    %cst_32 = arith.constant dense<0.000000e+00> : vector<8x8xf32>
    %70 = tpu.matmul %67, %68, %cst_32 {dimension_numbers = #tpu.dot_dimension_numbers<[1], [1], [0], [0], [0, 0, 1, 0], [], []>} : vector<8x8xf32>, vector<8x8xf32>, vector<8x8xf32> -> vector<8x8xf32>
    "tpu.trace_stop"() : () -> ()
    %cst_33 = arith.constant 0.353553385 : f32
    %71 = vector.broadcast %cst_33 : f32 to vector<8x8xf32>
    %72 = arith.mulf %70, %71 : vector<8x8xf32>
    %cst_34 = arith.constant -1.000000e+30 : f32
    %73 = vector.broadcast %cst_34 : f32 to vector<8x8xf32>
    %74 = arith.select %41, %72, %73 : vector<8x8xi1>, vector<8x8xf32>
    %cst_35 = arith.constant dense<0xFF800000> : vector<8xf32>
    %75 = vector.multi_reduction <maximumf>, %74, %cst_35 [1] : vector<8x8xf32> to vector<8xf32>
    %76 = vector.shape_cast %75 : vector<8xf32> to vector<8x1xf32>
    %77 = vector.broadcast %76 : vector<8x1xf32> to vector<8x8xf32>
    %78 = arith.subf %74, %77 : vector<8x8xf32>
    %79 = math.exp %78 : vector<8x8xf32>
    %cst_36 = arith.constant dense<0.000000e+00> : vector<8xf32>
    %80 = vector.multi_reduction <add>, %79, %cst_36 [1] : vector<8x8xf32> to vector<8xf32>
    %81 = vector.shape_cast %80 : vector<8xf32> to vector<8x1xf32>
    %82 = tpu.reciprocal %81 {approx = true} : vector<8x1xf32> -> vector<8x1xf32>
    %83 = vector.broadcast %82 : vector<8x1xf32> to vector<8x8xf32>
    %84 = arith.mulf %79, %83 : vector<8x8xf32>
    "tpu.trace_start"() <{level = 10 : i32, message = "qk,kd->qd"}> : () -> ()
    %cst_37 = arith.constant dense<0.000000e+00> : vector<8x8xf32>
    %85 = tpu.matmul %84, %69, %cst_37 {dimension_numbers = #tpu.dot_dimension_numbers<[1], [0], [0], [1], [0, 0, 1, 1], [], []>} : vector<8x8xf32>, vector<8x8xf32>, vector<8x8xf32> -> vector<8x8xf32>
    "tpu.trace_stop"() : () -> ()
    %86 = arith.truncf %85 : vector<8x8xf32> to vector<8x8xbf16>
    %87 = vector.extract_strided_slice %32 {offsets = [8, 0], sizes = [8, 32], strides = [1, 1]} : vector<32x32xf32> to vector<8x32xf32>
    %88 = arith.truncf %87 : vector<8x32xf32> to vector<8x32xbf16>
    %cst_38 = arith.constant dense<0.000000e+00> : vector<8x32xf32>
    %89 = tpu.matmul %86, %88, %cst_38 {dimension_numbers = #tpu.dot_dimension_numbers<[1], [0], [0], [1], [0, 0, 1, 1], [], []>} : vector<8x8xbf16>, vector<8x32xbf16>, vector<8x32xf32> -> vector<8x32xf32>
    %90 = arith.addf %66, %89 : vector<8x32xf32>
    %91 = vector.extract_strided_slice %38 {offsets = [0, 16], sizes = [8, 8], strides = [1, 1]} : vector<8x96xf32> to vector<8x8xf32>
    %92 = vector.extract_strided_slice %38 {offsets = [0, 48], sizes = [8, 8], strides = [1, 1]} : vector<8x96xf32> to vector<8x8xf32>
    %93 = vector.extract_strided_slice %38 {offsets = [0, 80], sizes = [8, 8], strides = [1, 1]} : vector<8x96xf32> to vector<8x8xf32>
    "tpu.trace_start"() <{level = 10 : i32, message = "qd,kd->qk"}> : () -> ()
    %cst_39 = arith.constant dense<0.000000e+00> : vector<8x8xf32>
    %94 = tpu.matmul %91, %92, %cst_39 {dimension_numbers = #tpu.dot_dimension_numbers<[1], [1], [0], [0], [0, 0, 1, 0], [], []>} : vector<8x8xf32>, vector<8x8xf32>, vector<8x8xf32> -> vector<8x8xf32>
    "tpu.trace_stop"() : () -> ()
    %cst_40 = arith.constant 0.353553385 : f32
    %95 = vector.broadcast %cst_40 : f32 to vector<8x8xf32>
    %96 = arith.mulf %94, %95 : vector<8x8xf32>
    %cst_41 = arith.constant -1.000000e+30 : f32
    %97 = vector.broadcast %cst_41 : f32 to vector<8x8xf32>
    %98 = arith.select %41, %96, %97 : vector<8x8xi1>, vector<8x8xf32>
    %cst_42 = arith.constant dense<0xFF800000> : vector<8xf32>
    %99 = vector.multi_reduction <maximumf>, %98, %cst_42 [1] : vector<8x8xf32> to vector<8xf32>
    %100 = vector.shape_cast %99 : vector<8xf32> to vector<8x1xf32>
    %101 = vector.broadcast %100 : vector<8x1xf32> to vector<8x8xf32>
    %102 = arith.subf %98, %101 : vector<8x8xf32>
    %103 = math.exp %102 : vector<8x8xf32>
    %cst_43 = arith.constant dense<0.000000e+00> : vector<8xf32>
    %104 = vector.multi_reduction <add>, %103, %cst_43 [1] : vector<8x8xf32> to vector<8xf32>
    %105 = vector.shape_cast %104 : vector<8xf32> to vector<8x1xf32>
    %106 = tpu.reciprocal %105 {approx = true} : vector<8x1xf32> -> vector<8x1xf32>
    %107 = vector.broadcast %106 : vector<8x1xf32> to vector<8x8xf32>
    %108 = arith.mulf %103, %107 : vector<8x8xf32>
    "tpu.trace_start"() <{level = 10 : i32, message = "qk,kd->qd"}> : () -> ()
    %cst_44 = arith.constant dense<0.000000e+00> : vector<8x8xf32>
    %109 = tpu.matmul %108, %93, %cst_44 {dimension_numbers = #tpu.dot_dimension_numbers<[1], [0], [0], [1], [0, 0, 1, 1], [], []>} : vector<8x8xf32>, vector<8x8xf32>, vector<8x8xf32> -> vector<8x8xf32>
    "tpu.trace_stop"() : () -> ()
    %110 = arith.truncf %109 : vector<8x8xf32> to vector<8x8xbf16>
    %111 = vector.extract_strided_slice %32 {offsets = [16, 0], sizes = [8, 32], strides = [1, 1]} : vector<32x32xf32> to vector<8x32xf32>
    %112 = arith.truncf %111 : vector<8x32xf32> to vector<8x32xbf16>
    %cst_45 = arith.constant dense<0.000000e+00> : vector<8x32xf32>
    %113 = tpu.matmul %110, %112, %cst_45 {dimension_numbers = #tpu.dot_dimension_numbers<[1], [0], [0], [1], [0, 0, 1, 1], [], []>} : vector<8x8xbf16>, vector<8x32xbf16>, vector<8x32xf32> -> vector<8x32xf32>
    %114 = arith.addf %90, %113 : vector<8x32xf32>
    %115 = vector.extract_strided_slice %38 {offsets = [0, 24], sizes = [8, 8], strides = [1, 1]} : vector<8x96xf32> to vector<8x8xf32>
    %116 = vector.extract_strided_slice %38 {offsets = [0, 56], sizes = [8, 8], strides = [1, 1]} : vector<8x96xf32> to vector<8x8xf32>
    %117 = vector.extract_strided_slice %38 {offsets = [0, 88], sizes = [8, 8], strides = [1, 1]} : vector<8x96xf32> to vector<8x8xf32>
    "tpu.trace_start"() <{level = 10 : i32, message = "qd,kd->qk"}> : () -> ()
    %cst_46 = arith.constant dense<0.000000e+00> : vector<8x8xf32>
    %118 = tpu.matmul %115, %116, %cst_46 {dimension_numbers = #tpu.dot_dimension_numbers<[1], [1], [0], [0], [0, 0, 1, 0], [], []>} : vector<8x8xf32>, vector<8x8xf32>, vector<8x8xf32> -> vector<8x8xf32>
    "tpu.trace_stop"() : () -> ()
    %cst_47 = arith.constant 0.353553385 : f32
    %119 = vector.broadcast %cst_47 : f32 to vector<8x8xf32>
    %120 = arith.mulf %118, %119 : vector<8x8xf32>
    %cst_48 = arith.constant -1.000000e+30 : f32
    %121 = vector.broadcast %cst_48 : f32 to vector<8x8xf32>
    %122 = arith.select %41, %120, %121 : vector<8x8xi1>, vector<8x8xf32>
    %cst_49 = arith.constant dense<0xFF800000> : vector<8xf32>
    %123 = vector.multi_reduction <maximumf>, %122, %cst_49 [1] : vector<8x8xf32> to vector<8xf32>
    %124 = vector.shape_cast %123 : vector<8xf32> to vector<8x1xf32>
    %125 = vector.broadcast %124 : vector<8x1xf32> to vector<8x8xf32>
    %126 = arith.subf %122, %125 : vector<8x8xf32>
    %127 = math.exp %126 : vector<8x8xf32>
    %cst_50 = arith.constant dense<0.000000e+00> : vector<8xf32>
    %128 = vector.multi_reduction <add>, %127, %cst_50 [1] : vector<8x8xf32> to vector<8xf32>
    %129 = vector.shape_cast %128 : vector<8xf32> to vector<8x1xf32>
    %130 = tpu.reciprocal %129 {approx = true} : vector<8x1xf32> -> vector<8x1xf32>
    %131 = vector.broadcast %130 : vector<8x1xf32> to vector<8x8xf32>
    %132 = arith.mulf %127, %131 : vector<8x8xf32>
    "tpu.trace_start"() <{level = 10 : i32, message = "qk,kd->qd"}> : () -> ()
    %cst_51 = arith.constant dense<0.000000e+00> : vector<8x8xf32>
    %133 = tpu.matmul %132, %117, %cst_51 {dimension_numbers = #tpu.dot_dimension_numbers<[1], [0], [0], [1], [0, 0, 1, 1], [], []>} : vector<8x8xf32>, vector<8x8xf32>, vector<8x8xf32> -> vector<8x8xf32>
    "tpu.trace_stop"() : () -> ()
    %134 = arith.truncf %133 : vector<8x8xf32> to vector<8x8xbf16>
    %135 = vector.extract_strided_slice %32 {offsets = [24, 0], sizes = [8, 32], strides = [1, 1]} : vector<32x32xf32> to vector<8x32xf32>
    %136 = arith.truncf %135 : vector<8x32xf32> to vector<8x32xbf16>
    %cst_52 = arith.constant dense<0.000000e+00> : vector<8x32xf32>
    %137 = tpu.matmul %134, %136, %cst_52 {dimension_numbers = #tpu.dot_dimension_numbers<[1], [0], [0], [1], [0, 0, 1, 1], [], []>} : vector<8x8xbf16>, vector<8x32xbf16>, vector<8x32xf32> -> vector<8x32xf32>
    %138 = arith.addf %114, %137 : vector<8x32xf32>
    %139 = vector.broadcast %33 : vector<1x32xf32> to vector<8x32xf32>
    %140 = arith.addf %138, %139 : vector<8x32xf32>
    %141 = arith.addf %7, %140 : vector<8x32xf32>
    %c0_53 = arith.constant 0 : index
    %c0_54 = arith.constant 0 : index
    %142 = vector.load %arg10[%c0_53, %c0_54] : memref<1x32xf32, #tpu.memory_space<vmem>>, vector<1x32xf32>
    %c0_55 = arith.constant 0 : index
    %c0_56 = arith.constant 0 : index
    %143 = vector.load %arg11[%c0_55, %c0_56] : memref<1x32xf32, #tpu.memory_space<vmem>>, vector<1x32xf32>
    %cst_57 = arith.constant dense<0.000000e+00> : vector<8xf32>
    %144 = vector.multi_reduction <add>, %141, %cst_57 [1] : vector<8x32xf32> to vector<8xf32>
    %145 = vector.shape_cast %144 : vector<8xf32> to vector<8x1xf32>
    %cst_58 = arith.constant 3.200000e+01 : f32
    %146 = vector.broadcast %cst_58 : f32 to vector<8x1xf32>
    %147 = arith.divf %145, %146 : vector<8x1xf32>
    %148 = vector.broadcast %147 : vector<8x1xf32> to vector<8x32xf32>
    %149 = arith.subf %141, %148 : vector<8x32xf32>
    %150 = arith.mulf %149, %149 : vector<8x32xf32>
    %cst_59 = arith.constant dense<0.000000e+00> : vector<8xf32>
    %151 = vector.multi_reduction <add>, %150, %cst_59 [1] : vector<8x32xf32> to vector<8xf32>
    %152 = vector.shape_cast %151 : vector<8xf32> to vector<8x1xf32>
    %cst_60 = arith.constant 3.200000e+01 : f32
    %153 = vector.broadcast %cst_60 : f32 to vector<8x1xf32>
    %154 = arith.divf %152, %153 : vector<8x1xf32>
    %cst_61 = arith.constant 9.99999996E-13 : f32
    %155 = vector.broadcast %cst_61 : f32 to vector<8x1xf32>
    %156 = arith.addf %154, %155 : vector<8x1xf32>
    %157 = math.rsqrt %156 : vector<8x1xf32>
    %158 = vector.broadcast %157 : vector<8x1xf32> to vector<8x32xf32>
    %159 = arith.mulf %149, %158 : vector<8x32xf32>
    %160 = vector.broadcast %142 : vector<1x32xf32> to vector<8x32xf32>
    %161 = arith.mulf %159, %160 : vector<8x32xf32>
    %162 = vector.broadcast %143 : vector<1x32xf32> to vector<8x32xf32>
    %163 = arith.addf %161, %162 : vector<8x32xf32>
    %c0_62 = arith.constant 0 : index
    %c0_63 = arith.constant 0 : index
    %164 = vector.load %arg12[%c0_62, %c0_63] : memref<32x128xf32, #tpu.memory_space<vmem>>, vector<32x128xf32>
    %c0_64 = arith.constant 0 : index
    %c0_65 = arith.constant 0 : index
    %165 = vector.load %arg13[%c0_64, %c0_65] : memref<1x128xf32, #tpu.memory_space<vmem>>, vector<1x128xf32>
    %166 = arith.truncf %163 : vector<8x32xf32> to vector<8x32xbf16>
    %167 = arith.truncf %164 : vector<32x128xf32> to vector<32x128xbf16>
    %cst_66 = arith.constant dense<0.000000e+00> : vector<8x128xf32>
    %168 = tpu.matmul %166, %167, %cst_66 {dimension_numbers = #tpu.dot_dimension_numbers<[1], [0], [0], [1], [0, 0, 1, 1], [], []>} : vector<8x32xbf16>, vector<32x128xbf16>, vector<8x128xf32> -> vector<8x128xf32>
    %169 = vector.broadcast %165 : vector<1x128xf32> to vector<8x128xf32>
    %170 = arith.addf %168, %169 : vector<8x128xf32>
    %cst_67 = arith.constant 0.636619746 : f32
    %171 = math.sqrt %cst_67 : f32
    %cst_68 = arith.constant 5.000000e-01 : f32
    %172 = vector.broadcast %cst_68 : f32 to vector<8x128xf32>
    %173 = arith.mulf %172, %170 : vector<8x128xf32>
    %cst_69 = arith.constant 4.471500e-02 : f32
    %174 = vector.broadcast %cst_69 : f32 to vector<8x128xf32>
    %175 = arith.mulf %174, %170 : vector<8x128xf32>
    %176 = arith.mulf %175, %170 : vector<8x128xf32>
    %177 = arith.mulf %176, %170 : vector<8x128xf32>
    %178 = arith.addf %170, %177 : vector<8x128xf32>
    %179 = vector.broadcast %171 : f32 to vector<8x128xf32>
    %180 = arith.mulf %179, %178 : vector<8x128xf32>
    %181 = math.tanh %180 : vector<8x128xf32>
    %cst_70 = arith.constant 1.000000e+00 : f32
    %182 = vector.broadcast %cst_70 : f32 to vector<8x128xf32>
    %183 = arith.addf %182, %181 : vector<8x128xf32>
    %184 = arith.mulf %173, %183 : vector<8x128xf32>
    %c0_71 = arith.constant 0 : index
    %c0_72 = arith.constant 0 : index
    %185 = vector.load %arg14[%c0_71, %c0_72] : memref<128x32xf32, #tpu.memory_space<vmem>>, vector<128x32xf32>
    %c0_73 = arith.constant 0 : index
    %c0_74 = arith.constant 0 : index
    %186 = vector.load %arg15[%c0_73, %c0_74] : memref<1x32xf32, #tpu.memory_space<vmem>>, vector<1x32xf32>
    %187 = arith.truncf %184 : vector<8x128xf32> to vector<8x128xbf16>
    %188 = arith.truncf %185 : vector<128x32xf32> to vector<128x32xbf16>
    %cst_75 = arith.constant dense<0.000000e+00> : vector<8x32xf32>
    %189 = tpu.matmul %187, %188, %cst_75 {dimension_numbers = #tpu.dot_dimension_numbers<[1], [0], [0], [1], [0, 0, 1, 1], [], []>} : vector<8x128xbf16>, vector<128x32xbf16>, vector<8x32xf32> -> vector<8x32xf32>
    %190 = vector.broadcast %186 : vector<1x32xf32> to vector<8x32xf32>
    %191 = arith.addf %189, %190 : vector<8x32xf32>
    %192 = arith.addf %141, %191 : vector<8x32xf32>
    %c0_76 = arith.constant 0 : index
    %c0_77 = arith.constant 0 : index
    %193 = vector.load %arg16[%c0_76, %c0_77] : memref<1x32xf32, #tpu.memory_space<vmem>>, vector<1x32xf32>
    %c0_78 = arith.constant 0 : index
    %c0_79 = arith.constant 0 : index
    %194 = vector.load %arg17[%c0_78, %c0_79] : memref<1x32xf32, #tpu.memory_space<vmem>>, vector<1x32xf32>
    %cst_80 = arith.constant dense<0.000000e+00> : vector<8xf32>
    %195 = vector.multi_reduction <add>, %192, %cst_80 [1] : vector<8x32xf32> to vector<8xf32>
    %196 = vector.shape_cast %195 : vector<8xf32> to vector<8x1xf32>
    %cst_81 = arith.constant 3.200000e+01 : f32
    %197 = vector.broadcast %cst_81 : f32 to vector<8x1xf32>
    %198 = arith.divf %196, %197 : vector<8x1xf32>
    %199 = vector.broadcast %198 : vector<8x1xf32> to vector<8x32xf32>
    %200 = arith.subf %192, %199 : vector<8x32xf32>
    %201 = arith.mulf %200, %200 : vector<8x32xf32>
    %cst_82 = arith.constant dense<0.000000e+00> : vector<8xf32>
    %202 = vector.multi_reduction <add>, %201, %cst_82 [1] : vector<8x32xf32> to vector<8xf32>
    %203 = vector.shape_cast %202 : vector<8xf32> to vector<8x1xf32>
    %cst_83 = arith.constant 3.200000e+01 : f32
    %204 = vector.broadcast %cst_83 : f32 to vector<8x1xf32>
    %205 = arith.divf %203, %204 : vector<8x1xf32>
    %cst_84 = arith.constant 9.99999996E-13 : f32
    %206 = vector.broadcast %cst_84 : f32 to vector<8x1xf32>
    %207 = arith.addf %205, %206 : vector<8x1xf32>
    %208 = math.rsqrt %207 : vector<8x1xf32>
    %209 = vector.broadcast %208 : vector<8x1xf32> to vector<8x32xf32>
    %210 = arith.mulf %200, %209 : vector<8x32xf32>
    %211 = vector.broadcast %193 : vector<1x32xf32> to vector<8x32xf32>
    %212 = arith.mulf %210, %211 : vector<8x32xf32>
    %213 = vector.broadcast %194 : vector<1x32xf32> to vector<8x32xf32>
    %214 = arith.addf %212, %213 : vector<8x32xf32>
    %c0_85 = arith.constant 0 : index
    %c0_86 = arith.constant 0 : index
    %215 = vector.load %arg18[%c0_85, %c0_86] : memref<32x96xf32, #tpu.memory_space<vmem>>, vector<32x96xf32>
    %c0_87 = arith.constant 0 : index
    %c0_88 = arith.constant 0 : index
    %216 = vector.load %arg19[%c0_87, %c0_88] : memref<1x96xf32, #tpu.memory_space<vmem>>, vector<1x96xf32>
    %c0_89 = arith.constant 0 : index
    %c0_90 = arith.constant 0 : index
    %217 = vector.load %arg20[%c0_89, %c0_90] : memref<32x32xf32, #tpu.memory_space<vmem>>, vector<32x32xf32>
    %c0_91 = arith.constant 0 : index
    %c0_92 = arith.constant 0 : index
    %218 = vector.load %arg21[%c0_91, %c0_92] : memref<1x32xf32, #tpu.memory_space<vmem>>, vector<1x32xf32>
    %219 = arith.truncf %214 : vector<8x32xf32> to vector<8x32xbf16>
    %220 = arith.truncf %215 : vector<32x96xf32> to vector<32x96xbf16>
    %cst_93 = arith.constant dense<0.000000e+00> : vector<8x96xf32>
    %221 = tpu.matmul %219, %220, %cst_93 {dimension_numbers = #tpu.dot_dimension_numbers<[1], [0], [0], [1], [0, 0, 1, 1], [], []>} : vector<8x32xbf16>, vector<32x96xbf16>, vector<8x96xf32> -> vector<8x96xf32>
    %222 = vector.broadcast %216 : vector<1x96xf32> to vector<8x96xf32>
    %223 = arith.addf %221, %222 : vector<8x96xf32>
    %224 = tpu.iota {dimensions = array<i32: 1>} : vector<8x8xi32>
    %c5_i32_94 = arith.constant 5 : i32
    %225 = vector.broadcast %c5_i32_94 : i32 to vector<8x8xi32>
    %226 = arith.cmpi slt, %224, %225 : vector<8x8xi32>
    %cst_95 = arith.constant 0.000000e+00 : f32
    %227 = vector.broadcast %cst_95 : f32 to vector<8x32xf32>
    %228 = vector.extract_strided_slice %223 {offsets = [0, 0], sizes = [8, 8], strides = [1, 1]} : vector<8x96xf32> to vector<8x8xf32>
    %229 = vector.extract_strided_slice %223 {offsets = [0, 32], sizes = [8, 8], strides = [1, 1]} : vector<8x96xf32> to vector<8x8xf32>
    %230 = vector.extract_strided_slice %223 {offsets = [0, 64], sizes = [8, 8], strides = [1, 1]} : vector<8x96xf32> to vector<8x8xf32>
    "tpu.trace_start"() <{level = 10 : i32, message = "qd,kd->qk"}> : () -> ()
    %cst_96 = arith.constant dense<0.000000e+00> : vector<8x8xf32>
    %231 = tpu.matmul %228, %229, %cst_96 {dimension_numbers = #tpu.dot_dimension_numbers<[1], [1], [0], [0], [0, 0, 1, 0], [], []>} : vector<8x8xf32>, vector<8x8xf32>, vector<8x8xf32> -> vector<8x8xf32>
    "tpu.trace_stop"() : () -> ()
    %cst_97 = arith.constant 0.353553385 : f32
    %232 = vector.broadcast %cst_97 : f32 to vector<8x8xf32>
    %233 = arith.mulf %231, %232 : vector<8x8xf32>
    %cst_98 = arith.constant -1.000000e+30 : f32
    %234 = vector.broadcast %cst_98 : f32 to vector<8x8xf32>
    %235 = arith.select %226, %233, %234 : vector<8x8xi1>, vector<8x8xf32>
    %cst_99 = arith.constant dense<0xFF800000> : vector<8xf32>
    %236 = vector.multi_reduction <maximumf>, %235, %cst_99 [1] : vector<8x8xf32> to vector<8xf32>
    %237 = vector.shape_cast %236 : vector<8xf32> to vector<8x1xf32>
    %238 = vector.broadcast %237 : vector<8x1xf32> to vector<8x8xf32>
    %239 = arith.subf %235, %238 : vector<8x8xf32>
    %240 = math.exp %239 : vector<8x8xf32>
    %cst_100 = arith.constant dense<0.000000e+00> : vector<8xf32>
    %241 = vector.multi_reduction <add>, %240, %cst_100 [1] : vector<8x8xf32> to vector<8xf32>
    %242 = vector.shape_cast %241 : vector<8xf32> to vector<8x1xf32>
    %243 = tpu.reciprocal %242 {approx = true} : vector<8x1xf32> -> vector<8x1xf32>
    %244 = vector.broadcast %243 : vector<8x1xf32> to vector<8x8xf32>
    %245 = arith.mulf %240, %244 : vector<8x8xf32>
    "tpu.trace_start"() <{level = 10 : i32, message = "qk,kd->qd"}> : () -> ()
    %cst_101 = arith.constant dense<0.000000e+00> : vector<8x8xf32>
    %246 = tpu.matmul %245, %230, %cst_101 {dimension_numbers = #tpu.dot_dimension_numbers<[1], [0], [0], [1], [0, 0, 1, 1], [], []>} : vector<8x8xf32>, vector<8x8xf32>, vector<8x8xf32> -> vector<8x8xf32>
    "tpu.trace_stop"() : () -> ()
    %247 = arith.truncf %246 : vector<8x8xf32> to vector<8x8xbf16>
    %248 = vector.extract_strided_slice %217 {offsets = [0, 0], sizes = [8, 32], strides = [1, 1]} : vector<32x32xf32> to vector<8x32xf32>
    %249 = arith.truncf %248 : vector<8x32xf32> to vector<8x32xbf16>
    %cst_102 = arith.constant dense<0.000000e+00> : vector<8x32xf32>
    %250 = tpu.matmul %247, %249, %cst_102 {dimension_numbers = #tpu.dot_dimension_numbers<[1], [0], [0], [1], [0, 0, 1, 1], [], []>} : vector<8x8xbf16>, vector<8x32xbf16>, vector<8x32xf32> -> vector<8x32xf32>
    %251 = arith.addf %227, %250 : vector<8x32xf32>
    %252 = vector.extract_strided_slice %223 {offsets = [0, 8], sizes = [8, 8], strides = [1, 1]} : vector<8x96xf32> to vector<8x8xf32>
    %253 = vector.extract_strided_slice %223 {offsets = [0, 40], sizes = [8, 8], strides = [1, 1]} : vector<8x96xf32> to vector<8x8xf32>
    %254 = vector.extract_strided_slice %223 {offsets = [0, 72], sizes = [8, 8], strides = [1, 1]} : vector<8x96xf32> to vector<8x8xf32>
    "tpu.trace_start"() <{level = 10 : i32, message = "qd,kd->qk"}> : () -> ()
    %cst_103 = arith.constant dense<0.000000e+00> : vector<8x8xf32>
    %255 = tpu.matmul %252, %253, %cst_103 {dimension_numbers = #tpu.dot_dimension_numbers<[1], [1], [0], [0], [0, 0, 1, 0], [], []>} : vector<8x8xf32>, vector<8x8xf32>, vector<8x8xf32> -> vector<8x8xf32>
    "tpu.trace_stop"() : () -> ()
    %cst_104 = arith.constant 0.353553385 : f32
    %256 = vector.broadcast %cst_104 : f32 to vector<8x8xf32>
    %257 = arith.mulf %255, %256 : vector<8x8xf32>
    %cst_105 = arith.constant -1.000000e+30 : f32
    %258 = vector.broadcast %cst_105 : f32 to vector<8x8xf32>
    %259 = arith.select %226, %257, %258 : vector<8x8xi1>, vector<8x8xf32>
    %cst_106 = arith.constant dense<0xFF800000> : vector<8xf32>
    %260 = vector.multi_reduction <maximumf>, %259, %cst_106 [1] : vector<8x8xf32> to vector<8xf32>
    %261 = vector.shape_cast %260 : vector<8xf32> to vector<8x1xf32>
    %262 = vector.broadcast %261 : vector<8x1xf32> to vector<8x8xf32>
    %263 = arith.subf %259, %262 : vector<8x8xf32>
    %264 = math.exp %263 : vector<8x8xf32>
    %cst_107 = arith.constant dense<0.000000e+00> : vector<8xf32>
    %265 = vector.multi_reduction <add>, %264, %cst_107 [1] : vector<8x8xf32> to vector<8xf32>
    %266 = vector.shape_cast %265 : vector<8xf32> to vector<8x1xf32>
    %267 = tpu.reciprocal %266 {approx = true} : vector<8x1xf32> -> vector<8x1xf32>
    %268 = vector.broadcast %267 : vector<8x1xf32> to vector<8x8xf32>
    %269 = arith.mulf %264, %268 : vector<8x8xf32>
    "tpu.trace_start"() <{level = 10 : i32, message = "qk,kd->qd"}> : () -> ()
    %cst_108 = arith.constant dense<0.000000e+00> : vector<8x8xf32>
    %270 = tpu.matmul %269, %254, %cst_108 {dimension_numbers = #tpu.dot_dimension_numbers<[1], [0], [0], [1], [0, 0, 1, 1], [], []>} : vector<8x8xf32>, vector<8x8xf32>, vector<8x8xf32> -> vector<8x8xf32>
    "tpu.trace_stop"() : () -> ()
    %271 = arith.truncf %270 : vector<8x8xf32> to vector<8x8xbf16>
    %272 = vector.extract_strided_slice %217 {offsets = [8, 0], sizes = [8, 32], strides = [1, 1]} : vector<32x32xf32> to vector<8x32xf32>
    %273 = arith.truncf %272 : vector<8x32xf32> to vector<8x32xbf16>
    %cst_109 = arith.constant dense<0.000000e+00> : vector<8x32xf32>
    %274 = tpu.matmul %271, %273, %cst_109 {dimension_numbers = #tpu.dot_dimension_numbers<[1], [0], [0], [1], [0, 0, 1, 1], [], []>} : vector<8x8xbf16>, vector<8x32xbf16>, vector<8x32xf32> -> vector<8x32xf32>
    %275 = arith.addf %251, %274 : vector<8x32xf32>
    %276 = vector.extract_strided_slice %223 {offsets = [0, 16], sizes = [8, 8], strides = [1, 1]} : vector<8x96xf32> to vector<8x8xf32>
    %277 = vector.extract_strided_slice %223 {offsets = [0, 48], sizes = [8, 8], strides = [1, 1]} : vector<8x96xf32> to vector<8x8xf32>
    %278 = vector.extract_strided_slice %223 {offsets = [0, 80], sizes = [8, 8], strides = [1, 1]} : vector<8x96xf32> to vector<8x8xf32>
    "tpu.trace_start"() <{level = 10 : i32, message = "qd,kd->qk"}> : () -> ()
    %cst_110 = arith.constant dense<0.000000e+00> : vector<8x8xf32>
    %279 = tpu.matmul %276, %277, %cst_110 {dimension_numbers = #tpu.dot_dimension_numbers<[1], [1], [0], [0], [0, 0, 1, 0], [], []>} : vector<8x8xf32>, vector<8x8xf32>, vector<8x8xf32> -> vector<8x8xf32>
    "tpu.trace_stop"() : () -> ()
    %cst_111 = arith.constant 0.353553385 : f32
    %280 = vector.broadcast %cst_111 : f32 to vector<8x8xf32>
    %281 = arith.mulf %279, %280 : vector<8x8xf32>
    %cst_112 = arith.constant -1.000000e+30 : f32
    %282 = vector.broadcast %cst_112 : f32 to vector<8x8xf32>
    %283 = arith.select %226, %281, %282 : vector<8x8xi1>, vector<8x8xf32>
    %cst_113 = arith.constant dense<0xFF800000> : vector<8xf32>
    %284 = vector.multi_reduction <maximumf>, %283, %cst_113 [1] : vector<8x8xf32> to vector<8xf32>
    %285 = vector.shape_cast %284 : vector<8xf32> to vector<8x1xf32>
    %286 = vector.broadcast %285 : vector<8x1xf32> to vector<8x8xf32>
    %287 = arith.subf %283, %286 : vector<8x8xf32>
    %288 = math.exp %287 : vector<8x8xf32>
    %cst_114 = arith.constant dense<0.000000e+00> : vector<8xf32>
    %289 = vector.multi_reduction <add>, %288, %cst_114 [1] : vector<8x8xf32> to vector<8xf32>
    %290 = vector.shape_cast %289 : vector<8xf32> to vector<8x1xf32>
    %291 = tpu.reciprocal %290 {approx = true} : vector<8x1xf32> -> vector<8x1xf32>
    %292 = vector.broadcast %291 : vector<8x1xf32> to vector<8x8xf32>
    %293 = arith.mulf %288, %292 : vector<8x8xf32>
    "tpu.trace_start"() <{level = 10 : i32, message = "qk,kd->qd"}> : () -> ()
    %cst_115 = arith.constant dense<0.000000e+00> : vector<8x8xf32>
    %294 = tpu.matmul %293, %278, %cst_115 {dimension_numbers = #tpu.dot_dimension_numbers<[1], [0], [0], [1], [0, 0, 1, 1], [], []>} : vector<8x8xf32>, vector<8x8xf32>, vector<8x8xf32> -> vector<8x8xf32>
    "tpu.trace_stop"() : () -> ()
    %295 = arith.truncf %294 : vector<8x8xf32> to vector<8x8xbf16>
    %296 = vector.extract_strided_slice %217 {offsets = [16, 0], sizes = [8, 32], strides = [1, 1]} : vector<32x32xf32> to vector<8x32xf32>
    %297 = arith.truncf %296 : vector<8x32xf32> to vector<8x32xbf16>
    %cst_116 = arith.constant dense<0.000000e+00> : vector<8x32xf32>
    %298 = tpu.matmul %295, %297, %cst_116 {dimension_numbers = #tpu.dot_dimension_numbers<[1], [0], [0], [1], [0, 0, 1, 1], [], []>} : vector<8x8xbf16>, vector<8x32xbf16>, vector<8x32xf32> -> vector<8x32xf32>
    %299 = arith.addf %275, %298 : vector<8x32xf32>
    %300 = vector.extract_strided_slice %223 {offsets = [0, 24], sizes = [8, 8], strides = [1, 1]} : vector<8x96xf32> to vector<8x8xf32>
    %301 = vector.extract_strided_slice %223 {offsets = [0, 56], sizes = [8, 8], strides = [1, 1]} : vector<8x96xf32> to vector<8x8xf32>
    %302 = vector.extract_strided_slice %223 {offsets = [0, 88], sizes = [8, 8], strides = [1, 1]} : vector<8x96xf32> to vector<8x8xf32>
    "tpu.trace_start"() <{level = 10 : i32, message = "qd,kd->qk"}> : () -> ()
    %cst_117 = arith.constant dense<0.000000e+00> : vector<8x8xf32>
    %303 = tpu.matmul %300, %301, %cst_117 {dimension_numbers = #tpu.dot_dimension_numbers<[1], [1], [0], [0], [0, 0, 1, 0], [], []>} : vector<8x8xf32>, vector<8x8xf32>, vector<8x8xf32> -> vector<8x8xf32>
    "tpu.trace_stop"() : () -> ()
    %cst_118 = arith.constant 0.353553385 : f32
    %304 = vector.broadcast %cst_118 : f32 to vector<8x8xf32>
    %305 = arith.mulf %303, %304 : vector<8x8xf32>
    %cst_119 = arith.constant -1.000000e+30 : f32
    %306 = vector.broadcast %cst_119 : f32 to vector<8x8xf32>
    %307 = arith.select %226, %305, %306 : vector<8x8xi1>, vector<8x8xf32>
    %cst_120 = arith.constant dense<0xFF800000> : vector<8xf32>
    %308 = vector.multi_reduction <maximumf>, %307, %cst_120 [1] : vector<8x8xf32> to vector<8xf32>
    %309 = vector.shape_cast %308 : vector<8xf32> to vector<8x1xf32>
    %310 = vector.broadcast %309 : vector<8x1xf32> to vector<8x8xf32>
    %311 = arith.subf %307, %310 : vector<8x8xf32>
    %312 = math.exp %311 : vector<8x8xf32>
    %cst_121 = arith.constant dense<0.000000e+00> : vector<8xf32>
    %313 = vector.multi_reduction <add>, %312, %cst_121 [1] : vector<8x8xf32> to vector<8xf32>
    %314 = vector.shape_cast %313 : vector<8xf32> to vector<8x1xf32>
    %315 = tpu.reciprocal %314 {approx = true} : vector<8x1xf32> -> vector<8x1xf32>
    %316 = vector.broadcast %315 : vector<8x1xf32> to vector<8x8xf32>
    %317 = arith.mulf %312, %316 : vector<8x8xf32>
    "tpu.trace_start"() <{level = 10 : i32, message = "qk,kd->qd"}> : () -> ()
    %cst_122 = arith.constant dense<0.000000e+00> : vector<8x8xf32>
    %318 = tpu.matmul %317, %302, %cst_122 {dimension_numbers = #tpu.dot_dimension_numbers<[1], [0], [0], [1], [0, 0, 1, 1], [], []>} : vector<8x8xf32>, vector<8x8xf32>, vector<8x8xf32> -> vector<8x8xf32>
    "tpu.trace_stop"() : () -> ()
    %319 = arith.truncf %318 : vector<8x8xf32> to vector<8x8xbf16>
    %320 = vector.extract_strided_slice %217 {offsets = [24, 0], sizes = [8, 32], strides = [1, 1]} : vector<32x32xf32> to vector<8x32xf32>
    %321 = arith.truncf %320 : vector<8x32xf32> to vector<8x32xbf16>
    %cst_123 = arith.constant dense<0.000000e+00> : vector<8x32xf32>
    %322 = tpu.matmul %319, %321, %cst_123 {dimension_numbers = #tpu.dot_dimension_numbers<[1], [0], [0], [1], [0, 0, 1, 1], [], []>} : vector<8x8xbf16>, vector<8x32xbf16>, vector<8x32xf32> -> vector<8x32xf32>
    %323 = arith.addf %299, %322 : vector<8x32xf32>
    %324 = vector.broadcast %218 : vector<1x32xf32> to vector<8x32xf32>
    %325 = arith.addf %323, %324 : vector<8x32xf32>
    %326 = arith.addf %192, %325 : vector<8x32xf32>
    %c0_124 = arith.constant 0 : index
    %c0_125 = arith.constant 0 : index
    %327 = vector.load %arg22[%c0_124, %c0_125] : memref<1x32xf32, #tpu.memory_space<vmem>>, vector<1x32xf32>
    %c0_126 = arith.constant 0 : index
    %c0_127 = arith.constant 0 : index
    %328 = vector.load %arg23[%c0_126, %c0_127] : memref<1x32xf32, #tpu.memory_space<vmem>>, vector<1x32xf32>
    %cst_128 = arith.constant dense<0.000000e+00> : vector<8xf32>
    %329 = vector.multi_reduction <add>, %326, %cst_128 [1] : vector<8x32xf32> to vector<8xf32>
    %330 = vector.shape_cast %329 : vector<8xf32> to vector<8x1xf32>
    %cst_129 = arith.constant 3.200000e+01 : f32
    %331 = vector.broadcast %cst_129 : f32 to vector<8x1xf32>
    %332 = arith.divf %330, %331 : vector<8x1xf32>
    %333 = vector.broadcast %332 : vector<8x1xf32> to vector<8x32xf32>
    %334 = arith.subf %326, %333 : vector<8x32xf32>
    %335 = arith.mulf %334, %334 : vector<8x32xf32>
    %cst_130 = arith.constant dense<0.000000e+00> : vector<8xf32>
    %336 = vector.multi_reduction <add>, %335, %cst_130 [1] : vector<8x32xf32> to vector<8xf32>
    %337 = vector.shape_cast %336 : vector<8xf32> to vector<8x1xf32>
    %cst_131 = arith.constant 3.200000e+01 : f32
    %338 = vector.broadcast %cst_131 : f32 to vector<8x1xf32>
    %339 = arith.divf %337, %338 : vector<8x1xf32>
    %cst_132 = arith.constant 9.99999996E-13 : f32
    %340 = vector.broadcast %cst_132 : f32 to vector<8x1xf32>
    %341 = arith.addf %339, %340 : vector<8x1xf32>
    %342 = math.rsqrt %341 : vector<8x1xf32>
    %343 = vector.broadcast %342 : vector<8x1xf32> to vector<8x32xf32>
    %344 = arith.mulf %334, %343 : vector<8x32xf32>
    %345 = vector.broadcast %327 : vector<1x32xf32> to vector<8x32xf32>
    %346 = arith.mulf %344, %345 : vector<8x32xf32>
    %347 = vector.broadcast %328 : vector<1x32xf32> to vector<8x32xf32>
    %348 = arith.addf %346, %347 : vector<8x32xf32>
    %c0_133 = arith.constant 0 : index
    %c0_134 = arith.constant 0 : index
    %349 = vector.load %arg24[%c0_133, %c0_134] : memref<32x128xf32, #tpu.memory_space<vmem>>, vector<32x128xf32>
    %c0_135 = arith.constant 0 : index
    %c0_136 = arith.constant 0 : index
    %350 = vector.load %arg25[%c0_135, %c0_136] : memref<1x128xf32, #tpu.memory_space<vmem>>, vector<1x128xf32>
    %351 = arith.truncf %348 : vector<8x32xf32> to vector<8x32xbf16>
    %352 = arith.truncf %349 : vector<32x128xf32> to vector<32x128xbf16>
    %cst_137 = arith.constant dense<0.000000e+00> : vector<8x128xf32>
    %353 = tpu.matmul %351, %352, %cst_137 {dimension_numbers = #tpu.dot_dimension_numbers<[1], [0], [0], [1], [0, 0, 1, 1], [], []>} : vector<8x32xbf16>, vector<32x128xbf16>, vector<8x128xf32> -> vector<8x128xf32>
    %354 = vector.broadcast %350 : vector<1x128xf32> to vector<8x128xf32>
    %355 = arith.addf %353, %354 : vector<8x128xf32>
    %cst_138 = arith.constant 0.636619746 : f32
    %356 = math.sqrt %cst_138 : f32
    %cst_139 = arith.constant 5.000000e-01 : f32
    %357 = vector.broadcast %cst_139 : f32 to vector<8x128xf32>
    %358 = arith.mulf %357, %355 : vector<8x128xf32>
    %cst_140 = arith.constant 4.471500e-02 : f32
    %359 = vector.broadcast %cst_140 : f32 to vector<8x128xf32>
    %360 = arith.mulf %359, %355 : vector<8x128xf32>
    %361 = arith.mulf %360, %355 : vector<8x128xf32>
    %362 = arith.mulf %361, %355 : vector<8x128xf32>
    %363 = arith.addf %355, %362 : vector<8x128xf32>
    %364 = vector.broadcast %356 : f32 to vector<8x128xf32>
    %365 = arith.mulf %364, %363 : vector<8x128xf32>
    %366 = math.tanh %365 : vector<8x128xf32>
    %cst_141 = arith.constant 1.000000e+00 : f32
    %367 = vector.broadcast %cst_141 : f32 to vector<8x128xf32>
    %368 = arith.addf %367, %366 : vector<8x128xf32>
    %369 = arith.mulf %358, %368 : vector<8x128xf32>
    %c0_142 = arith.constant 0 : index
    %c0_143 = arith.constant 0 : index
    %370 = vector.load %arg26[%c0_142, %c0_143] : memref<128x32xf32, #tpu.memory_space<vmem>>, vector<128x32xf32>
    %c0_144 = arith.constant 0 : index
    %c0_145 = arith.constant 0 : index
    %371 = vector.load %arg27[%c0_144, %c0_145] : memref<1x32xf32, #tpu.memory_space<vmem>>, vector<1x32xf32>
    %372 = arith.truncf %369 : vector<8x128xf32> to vector<8x128xbf16>
    %373 = arith.truncf %370 : vector<128x32xf32> to vector<128x32xbf16>
    %cst_146 = arith.constant dense<0.000000e+00> : vector<8x32xf32>
    %374 = tpu.matmul %372, %373, %cst_146 {dimension_numbers = #tpu.dot_dimension_numbers<[1], [0], [0], [1], [0, 0, 1, 1], [], []>} : vector<8x128xbf16>, vector<128x32xbf16>, vector<8x32xf32> -> vector<8x32xf32>
    %375 = vector.broadcast %371 : vector<1x32xf32> to vector<8x32xf32>
    %376 = arith.addf %374, %375 : vector<8x32xf32>
    %377 = arith.addf %326, %376 : vector<8x32xf32>
    %c0_147 = arith.constant 0 : index
    %c0_148 = arith.constant 0 : index
    %378 = vector.load %arg28[%c0_147, %c0_148] : memref<1x32xf32, #tpu.memory_space<vmem>>, vector<1x32xf32>
    %c0_149 = arith.constant 0 : index
    %c0_150 = arith.constant 0 : index
    %379 = vector.load %arg29[%c0_149, %c0_150] : memref<1x32xf32, #tpu.memory_space<vmem>>, vector<1x32xf32>
    %cst_151 = arith.constant dense<0.000000e+00> : vector<8xf32>
    %380 = vector.multi_reduction <add>, %377, %cst_151 [1] : vector<8x32xf32> to vector<8xf32>
    %381 = vector.shape_cast %380 : vector<8xf32> to vector<8x1xf32>
    %cst_152 = arith.constant 3.200000e+01 : f32
    %382 = vector.broadcast %cst_152 : f32 to vector<8x1xf32>
    %383 = arith.divf %381, %382 : vector<8x1xf32>
    %384 = vector.broadcast %383 : vector<8x1xf32> to vector<8x32xf32>
    %385 = arith.subf %377, %384 : vector<8x32xf32>
    %386 = arith.mulf %385, %385 : vector<8x32xf32>
    %cst_153 = arith.constant dense<0.000000e+00> : vector<8xf32>
    %387 = vector.multi_reduction <add>, %386, %cst_153 [1] : vector<8x32xf32> to vector<8xf32>
    %388 = vector.shape_cast %387 : vector<8xf32> to vector<8x1xf32>
    %cst_154 = arith.constant 3.200000e+01 : f32
    %389 = vector.broadcast %cst_154 : f32 to vector<8x1xf32>
    %390 = arith.divf %388, %389 : vector<8x1xf32>
    %cst_155 = arith.constant 9.99999996E-13 : f32
    %391 = vector.broadcast %cst_155 : f32 to vector<8x1xf32>
    %392 = arith.addf %390, %391 : vector<8x1xf32>
    %393 = math.rsqrt %392 : vector<8x1xf32>
    %394 = vector.broadcast %393 : vector<8x1xf32> to vector<8x32xf32>
    %395 = arith.mulf %385, %394 : vector<8x32xf32>
    %396 = vector.broadcast %378 : vector<1x32xf32> to vector<8x32xf32>
    %397 = arith.mulf %395, %396 : vector<8x32xf32>
    %398 = vector.broadcast %379 : vector<1x32xf32> to vector<8x32xf32>
    %399 = arith.addf %397, %398 : vector<8x32xf32>
    %400 = vector.extract_strided_slice %399 {offsets = [0, 0], sizes = [1, 32], strides = [1, 1]} : vector<8x32xf32> to vector<1x32xf32>
    %401 = vector.shape_cast %400 : vector<1x32xf32> to vector<1x32xf32>
    %402 = vector.broadcast %401 : vector<1x32xf32> to vector<8x32xf32>
    %c0_156 = arith.constant 0 : index
    %c0_157 = arith.constant 0 : index
    %403 = vector.load %arg30[%c0_156, %c0_157] : memref<8x32xf32, #tpu.memory_space<vmem>>, vector<8x32xf32>
    %404 = arith.addf %402, %403 : vector<8x32xf32>
    %c0_158 = arith.constant 0 : index
    %c0_159 = arith.constant 0 : index
    %405 = vector.load %arg31[%c0_158, %c0_159] : memref<1x32xf32, #tpu.memory_space<vmem>>, vector<1x32xf32>
    %c0_160 = arith.constant 0 : index
    %c0_161 = arith.constant 0 : index
    %406 = vector.load %arg32[%c0_160, %c0_161] : memref<1x32xf32, #tpu.memory_space<vmem>>, vector<1x32xf32>
    %cst_162 = arith.constant dense<0.000000e+00> : vector<8xf32>
    %407 = vector.multi_reduction <add>, %404, %cst_162 [1] : vector<8x32xf32> to vector<8xf32>
    %408 = vector.shape_cast %407 : vector<8xf32> to vector<8x1xf32>
    %cst_163 = arith.constant 3.200000e+01 : f32
    %409 = vector.broadcast %cst_163 : f32 to vector<8x1xf32>
    %410 = arith.divf %408, %409 : vector<8x1xf32>
    %411 = vector.broadcast %410 : vector<8x1xf32> to vector<8x32xf32>
    %412 = arith.subf %404, %411 : vector<8x32xf32>
    %413 = arith.mulf %412, %412 : vector<8x32xf32>
    %cst_164 = arith.constant dense<0.000000e+00> : vector<8xf32>
    %414 = vector.multi_reduction <add>, %413, %cst_164 [1] : vector<8x32xf32> to vector<8xf32>
    %415 = vector.shape_cast %414 : vector<8xf32> to vector<8x1xf32>
    %cst_165 = arith.constant 3.200000e+01 : f32
    %416 = vector.broadcast %cst_165 : f32 to vector<8x1xf32>
    %417 = arith.divf %415, %416 : vector<8x1xf32>
    %cst_166 = arith.constant 9.99999974E-6 : f32
    %418 = vector.broadcast %cst_166 : f32 to vector<8x1xf32>
    %419 = arith.addf %417, %418 : vector<8x1xf32>
    %420 = math.rsqrt %419 : vector<8x1xf32>
    %421 = vector.broadcast %420 : vector<8x1xf32> to vector<8x32xf32>
    %422 = arith.mulf %412, %421 : vector<8x32xf32>
    %423 = vector.broadcast %405 : vector<1x32xf32> to vector<8x32xf32>
    %424 = arith.mulf %422, %423 : vector<8x32xf32>
    %425 = vector.broadcast %406 : vector<1x32xf32> to vector<8x32xf32>
    %426 = arith.addf %424, %425 : vector<8x32xf32>
    %c0_167 = arith.constant 0 : index
    %c0_168 = arith.constant 0 : index
    %427 = vector.load %arg33[%c0_167, %c0_168] : memref<32x96xf32, #tpu.memory_space<vmem>>, vector<32x96xf32>
    %c0_169 = arith.constant 0 : index
    %c0_170 = arith.constant 0 : index
    %428 = vector.load %arg34[%c0_169, %c0_170] : memref<1x96xf32, #tpu.memory_space<vmem>>, vector<1x96xf32>
    %c0_171 = arith.constant 0 : index
    %c0_172 = arith.constant 0 : index
    %429 = vector.load %arg35[%c0_171, %c0_172] : memref<32x32xf32, #tpu.memory_space<vmem>>, vector<32x32xf32>
    %c0_173 = arith.constant 0 : index
    %c0_174 = arith.constant 0 : index
    %430 = vector.load %arg36[%c0_173, %c0_174] : memref<1x32xf32, #tpu.memory_space<vmem>>, vector<1x32xf32>
    %431 = arith.truncf %426 : vector<8x32xf32> to vector<8x32xbf16>
    %432 = arith.truncf %427 : vector<32x96xf32> to vector<32x96xbf16>
    %cst_175 = arith.constant dense<0.000000e+00> : vector<8x96xf32>
    %433 = tpu.matmul %431, %432, %cst_175 {dimension_numbers = #tpu.dot_dimension_numbers<[1], [0], [0], [1], [0, 0, 1, 1], [], []>} : vector<8x32xbf16>, vector<32x96xbf16>, vector<8x96xf32> -> vector<8x96xf32>
    %434 = vector.broadcast %428 : vector<1x96xf32> to vector<8x96xf32>
    %435 = arith.addf %433, %434 : vector<8x96xf32>
    %436 = tpu.iota {dimensions = array<i32: 1>} : vector<8x8xi32>
    %c8_i32 = arith.constant 8 : i32
    %437 = vector.broadcast %c8_i32 : i32 to vector<8x8xi32>
    %438 = arith.cmpi slt, %436, %437 : vector<8x8xi32>
    %439 = tpu.iota {dimensions = array<i32: 0>} : vector<8x8xi32>
    %440 = arith.cmpi sle, %436, %439 : vector<8x8xi32>
    %441 = arith.andi %438, %440 : vector<8x8xi1>
    %cst_176 = arith.constant 0.000000e+00 : f32
    %442 = vector.broadcast %cst_176 : f32 to vector<8x32xf32>
    %443 = vector.extract_strided_slice %435 {offsets = [0, 0], sizes = [8, 8], strides = [1, 1]} : vector<8x96xf32> to vector<8x8xf32>
    %444 = vector.extract_strided_slice %435 {offsets = [0, 32], sizes = [8, 8], strides = [1, 1]} : vector<8x96xf32> to vector<8x8xf32>
    %445 = vector.extract_strided_slice %435 {offsets = [0, 64], sizes = [8, 8], strides = [1, 1]} : vector<8x96xf32> to vector<8x8xf32>
    "tpu.trace_start"() <{level = 10 : i32, message = "qd,kd->qk"}> : () -> ()
    %cst_177 = arith.constant dense<0.000000e+00> : vector<8x8xf32>
    %446 = tpu.matmul %443, %444, %cst_177 {dimension_numbers = #tpu.dot_dimension_numbers<[1], [1], [0], [0], [0, 0, 1, 0], [], []>} : vector<8x8xf32>, vector<8x8xf32>, vector<8x8xf32> -> vector<8x8xf32>
    "tpu.trace_stop"() : () -> ()
    %cst_178 = arith.constant 0.353553385 : f32
    %447 = vector.broadcast %cst_178 : f32 to vector<8x8xf32>
    %448 = arith.mulf %446, %447 : vector<8x8xf32>
    %cst_179 = arith.constant -1.000000e+30 : f32
    %449 = vector.broadcast %cst_179 : f32 to vector<8x8xf32>
    %450 = arith.select %441, %448, %449 : vector<8x8xi1>, vector<8x8xf32>
    %cst_180 = arith.constant dense<0xFF800000> : vector<8xf32>
    %451 = vector.multi_reduction <maximumf>, %450, %cst_180 [1] : vector<8x8xf32> to vector<8xf32>
    %452 = vector.shape_cast %451 : vector<8xf32> to vector<8x1xf32>
    %453 = vector.broadcast %452 : vector<8x1xf32> to vector<8x8xf32>
    %454 = arith.subf %450, %453 : vector<8x8xf32>
    %455 = math.exp %454 : vector<8x8xf32>
    %cst_181 = arith.constant dense<0.000000e+00> : vector<8xf32>
    %456 = vector.multi_reduction <add>, %455, %cst_181 [1] : vector<8x8xf32> to vector<8xf32>
    %457 = vector.shape_cast %456 : vector<8xf32> to vector<8x1xf32>
    %458 = tpu.reciprocal %457 {approx = true} : vector<8x1xf32> -> vector<8x1xf32>
    %459 = vector.broadcast %458 : vector<8x1xf32> to vector<8x8xf32>
    %460 = arith.mulf %455, %459 : vector<8x8xf32>
    "tpu.trace_start"() <{level = 10 : i32, message = "qk,kd->qd"}> : () -> ()
    %cst_182 = arith.constant dense<0.000000e+00> : vector<8x8xf32>
    %461 = tpu.matmul %460, %445, %cst_182 {dimension_numbers = #tpu.dot_dimension_numbers<[1], [0], [0], [1], [0, 0, 1, 1], [], []>} : vector<8x8xf32>, vector<8x8xf32>, vector<8x8xf32> -> vector<8x8xf32>
    "tpu.trace_stop"() : () -> ()
    %462 = arith.truncf %461 : vector<8x8xf32> to vector<8x8xbf16>
    %463 = vector.extract_strided_slice %429 {offsets = [0, 0], sizes = [8, 32], strides = [1, 1]} : vector<32x32xf32> to vector<8x32xf32>
    %464 = arith.truncf %463 : vector<8x32xf32> to vector<8x32xbf16>
    %cst_183 = arith.constant dense<0.000000e+00> : vector<8x32xf32>
    %465 = tpu.matmul %462, %464, %cst_183 {dimension_numbers = #tpu.dot_dimension_numbers<[1], [0], [0], [1], [0, 0, 1, 1], [], []>} : vector<8x8xbf16>, vector<8x32xbf16>, vector<8x32xf32> -> vector<8x32xf32>
    %466 = arith.addf %442, %465 : vector<8x32xf32>
    %467 = vector.extract_strided_slice %435 {offsets = [0, 8], sizes = [8, 8], strides = [1, 1]} : vector<8x96xf32> to vector<8x8xf32>
    %468 = vector.extract_strided_slice %435 {offsets = [0, 40], sizes = [8, 8], strides = [1, 1]} : vector<8x96xf32> to vector<8x8xf32>
    %469 = vector.extract_strided_slice %435 {offsets = [0, 72], sizes = [8, 8], strides = [1, 1]} : vector<8x96xf32> to vector<8x8xf32>
    "tpu.trace_start"() <{level = 10 : i32, message = "qd,kd->qk"}> : () -> ()
    %cst_184 = arith.constant dense<0.000000e+00> : vector<8x8xf32>
    %470 = tpu.matmul %467, %468, %cst_184 {dimension_numbers = #tpu.dot_dimension_numbers<[1], [1], [0], [0], [0, 0, 1, 0], [], []>} : vector<8x8xf32>, vector<8x8xf32>, vector<8x8xf32> -> vector<8x8xf32>
    "tpu.trace_stop"() : () -> ()
    %cst_185 = arith.constant 0.353553385 : f32
    %471 = vector.broadcast %cst_185 : f32 to vector<8x8xf32>
    %472 = arith.mulf %470, %471 : vector<8x8xf32>
    %cst_186 = arith.constant -1.000000e+30 : f32
    %473 = vector.broadcast %cst_186 : f32 to vector<8x8xf32>
    %474 = arith.select %441, %472, %473 : vector<8x8xi1>, vector<8x8xf32>
    %cst_187 = arith.constant dense<0xFF800000> : vector<8xf32>
    %475 = vector.multi_reduction <maximumf>, %474, %cst_187 [1] : vector<8x8xf32> to vector<8xf32>
    %476 = vector.shape_cast %475 : vector<8xf32> to vector<8x1xf32>
    %477 = vector.broadcast %476 : vector<8x1xf32> to vector<8x8xf32>
    %478 = arith.subf %474, %477 : vector<8x8xf32>
    %479 = math.exp %478 : vector<8x8xf32>
    %cst_188 = arith.constant dense<0.000000e+00> : vector<8xf32>
    %480 = vector.multi_reduction <add>, %479, %cst_188 [1] : vector<8x8xf32> to vector<8xf32>
    %481 = vector.shape_cast %480 : vector<8xf32> to vector<8x1xf32>
    %482 = tpu.reciprocal %481 {approx = true} : vector<8x1xf32> -> vector<8x1xf32>
    %483 = vector.broadcast %482 : vector<8x1xf32> to vector<8x8xf32>
    %484 = arith.mulf %479, %483 : vector<8x8xf32>
    "tpu.trace_start"() <{level = 10 : i32, message = "qk,kd->qd"}> : () -> ()
    %cst_189 = arith.constant dense<0.000000e+00> : vector<8x8xf32>
    %485 = tpu.matmul %484, %469, %cst_189 {dimension_numbers = #tpu.dot_dimension_numbers<[1], [0], [0], [1], [0, 0, 1, 1], [], []>} : vector<8x8xf32>, vector<8x8xf32>, vector<8x8xf32> -> vector<8x8xf32>
    "tpu.trace_stop"() : () -> ()
    %486 = arith.truncf %485 : vector<8x8xf32> to vector<8x8xbf16>
    %487 = vector.extract_strided_slice %429 {offsets = [8, 0], sizes = [8, 32], strides = [1, 1]} : vector<32x32xf32> to vector<8x32xf32>
    %488 = arith.truncf %487 : vector<8x32xf32> to vector<8x32xbf16>
    %cst_190 = arith.constant dense<0.000000e+00> : vector<8x32xf32>
    %489 = tpu.matmul %486, %488, %cst_190 {dimension_numbers = #tpu.dot_dimension_numbers<[1], [0], [0], [1], [0, 0, 1, 1], [], []>} : vector<8x8xbf16>, vector<8x32xbf16>, vector<8x32xf32> -> vector<8x32xf32>
    %490 = arith.addf %466, %489 : vector<8x32xf32>
    %491 = vector.extract_strided_slice %435 {offsets = [0, 16], sizes = [8, 8], strides = [1, 1]} : vector<8x96xf32> to vector<8x8xf32>
    %492 = vector.extract_strided_slice %435 {offsets = [0, 48], sizes = [8, 8], strides = [1, 1]} : vector<8x96xf32> to vector<8x8xf32>
    %493 = vector.extract_strided_slice %435 {offsets = [0, 80], sizes = [8, 8], strides = [1, 1]} : vector<8x96xf32> to vector<8x8xf32>
    "tpu.trace_start"() <{level = 10 : i32, message = "qd,kd->qk"}> : () -> ()
    %cst_191 = arith.constant dense<0.000000e+00> : vector<8x8xf32>
    %494 = tpu.matmul %491, %492, %cst_191 {dimension_numbers = #tpu.dot_dimension_numbers<[1], [1], [0], [0], [0, 0, 1, 0], [], []>} : vector<8x8xf32>, vector<8x8xf32>, vector<8x8xf32> -> vector<8x8xf32>
    "tpu.trace_stop"() : () -> ()
    %cst_192 = arith.constant 0.353553385 : f32
    %495 = vector.broadcast %cst_192 : f32 to vector<8x8xf32>
    %496 = arith.mulf %494, %495 : vector<8x8xf32>
    %cst_193 = arith.constant -1.000000e+30 : f32
    %497 = vector.broadcast %cst_193 : f32 to vector<8x8xf32>
    %498 = arith.select %441, %496, %497 : vector<8x8xi1>, vector<8x8xf32>
    %cst_194 = arith.constant dense<0xFF800000> : vector<8xf32>
    %499 = vector.multi_reduction <maximumf>, %498, %cst_194 [1] : vector<8x8xf32> to vector<8xf32>
    %500 = vector.shape_cast %499 : vector<8xf32> to vector<8x1xf32>
    %501 = vector.broadcast %500 : vector<8x1xf32> to vector<8x8xf32>
    %502 = arith.subf %498, %501 : vector<8x8xf32>
    %503 = math.exp %502 : vector<8x8xf32>
    %cst_195 = arith.constant dense<0.000000e+00> : vector<8xf32>
    %504 = vector.multi_reduction <add>, %503, %cst_195 [1] : vector<8x8xf32> to vector<8xf32>
    %505 = vector.shape_cast %504 : vector<8xf32> to vector<8x1xf32>
    %506 = tpu.reciprocal %505 {approx = true} : vector<8x1xf32> -> vector<8x1xf32>
    %507 = vector.broadcast %506 : vector<8x1xf32> to vector<8x8xf32>
    %508 = arith.mulf %503, %507 : vector<8x8xf32>
    "tpu.trace_start"() <{level = 10 : i32, message = "qk,kd->qd"}> : () -> ()
    %cst_196 = arith.constant dense<0.000000e+00> : vector<8x8xf32>
    %509 = tpu.matmul %508, %493, %cst_196 {dimension_numbers = #tpu.dot_dimension_numbers<[1], [0], [0], [1], [0, 0, 1, 1], [], []>} : vector<8x8xf32>, vector<8x8xf32>, vector<8x8xf32> -> vector<8x8xf32>
    "tpu.trace_stop"() : () -> ()
    %510 = arith.truncf %509 : vector<8x8xf32> to vector<8x8xbf16>
    %511 = vector.extract_strided_slice %429 {offsets = [16, 0], sizes = [8, 32], strides = [1, 1]} : vector<32x32xf32> to vector<8x32xf32>
    %512 = arith.truncf %511 : vector<8x32xf32> to vector<8x32xbf16>
    %cst_197 = arith.constant dense<0.000000e+00> : vector<8x32xf32>
    %513 = tpu.matmul %510, %512, %cst_197 {dimension_numbers = #tpu.dot_dimension_numbers<[1], [0], [0], [1], [0, 0, 1, 1], [], []>} : vector<8x8xbf16>, vector<8x32xbf16>, vector<8x32xf32> -> vector<8x32xf32>
    %514 = arith.addf %490, %513 : vector<8x32xf32>
    %515 = vector.extract_strided_slice %435 {offsets = [0, 24], sizes = [8, 8], strides = [1, 1]} : vector<8x96xf32> to vector<8x8xf32>
    %516 = vector.extract_strided_slice %435 {offsets = [0, 56], sizes = [8, 8], strides = [1, 1]} : vector<8x96xf32> to vector<8x8xf32>
    %517 = vector.extract_strided_slice %435 {offsets = [0, 88], sizes = [8, 8], strides = [1, 1]} : vector<8x96xf32> to vector<8x8xf32>
    "tpu.trace_start"() <{level = 10 : i32, message = "qd,kd->qk"}> : () -> ()
    %cst_198 = arith.constant dense<0.000000e+00> : vector<8x8xf32>
    %518 = tpu.matmul %515, %516, %cst_198 {dimension_numbers = #tpu.dot_dimension_numbers<[1], [1], [0], [0], [0, 0, 1, 0], [], []>} : vector<8x8xf32>, vector<8x8xf32>, vector<8x8xf32> -> vector<8x8xf32>
    "tpu.trace_stop"() : () -> ()
    %cst_199 = arith.constant 0.353553385 : f32
    %519 = vector.broadcast %cst_199 : f32 to vector<8x8xf32>
    %520 = arith.mulf %518, %519 : vector<8x8xf32>
    %cst_200 = arith.constant -1.000000e+30 : f32
    %521 = vector.broadcast %cst_200 : f32 to vector<8x8xf32>
    %522 = arith.select %441, %520, %521 : vector<8x8xi1>, vector<8x8xf32>
    %cst_201 = arith.constant dense<0xFF800000> : vector<8xf32>
    %523 = vector.multi_reduction <maximumf>, %522, %cst_201 [1] : vector<8x8xf32> to vector<8xf32>
    %524 = vector.shape_cast %523 : vector<8xf32> to vector<8x1xf32>
    %525 = vector.broadcast %524 : vector<8x1xf32> to vector<8x8xf32>
    %526 = arith.subf %522, %525 : vector<8x8xf32>
    %527 = math.exp %526 : vector<8x8xf32>
    %cst_202 = arith.constant dense<0.000000e+00> : vector<8xf32>
    %528 = vector.multi_reduction <add>, %527, %cst_202 [1] : vector<8x8xf32> to vector<8xf32>
    %529 = vector.shape_cast %528 : vector<8xf32> to vector<8x1xf32>
    %530 = tpu.reciprocal %529 {approx = true} : vector<8x1xf32> -> vector<8x1xf32>
    %531 = vector.broadcast %530 : vector<8x1xf32> to vector<8x8xf32>
    %532 = arith.mulf %527, %531 : vector<8x8xf32>
    "tpu.trace_start"() <{level = 10 : i32, message = "qk,kd->qd"}> : () -> ()
    %cst_203 = arith.constant dense<0.000000e+00> : vector<8x8xf32>
    %533 = tpu.matmul %532, %517, %cst_203 {dimension_numbers = #tpu.dot_dimension_numbers<[1], [0], [0], [1], [0, 0, 1, 1], [], []>} : vector<8x8xf32>, vector<8x8xf32>, vector<8x8xf32> -> vector<8x8xf32>
    "tpu.trace_stop"() : () -> ()
    %534 = arith.truncf %533 : vector<8x8xf32> to vector<8x8xbf16>
    %535 = vector.extract_strided_slice %429 {offsets = [24, 0], sizes = [8, 32], strides = [1, 1]} : vector<32x32xf32> to vector<8x32xf32>
    %536 = arith.truncf %535 : vector<8x32xf32> to vector<8x32xbf16>
    %cst_204 = arith.constant dense<0.000000e+00> : vector<8x32xf32>
    %537 = tpu.matmul %534, %536, %cst_204 {dimension_numbers = #tpu.dot_dimension_numbers<[1], [0], [0], [1], [0, 0, 1, 1], [], []>} : vector<8x8xbf16>, vector<8x32xbf16>, vector<8x32xf32> -> vector<8x32xf32>
    %538 = arith.addf %514, %537 : vector<8x32xf32>
    %539 = vector.broadcast %430 : vector<1x32xf32> to vector<8x32xf32>
    %540 = arith.addf %538, %539 : vector<8x32xf32>
    %541 = arith.addf %404, %540 : vector<8x32xf32>
    %c0_205 = arith.constant 0 : index
    %c0_206 = arith.constant 0 : index
    %542 = vector.load %arg37[%c0_205, %c0_206] : memref<1x32xf32, #tpu.memory_space<vmem>>, vector<1x32xf32>
    %c0_207 = arith.constant 0 : index
    %c0_208 = arith.constant 0 : index
    %543 = vector.load %arg38[%c0_207, %c0_208] : memref<1x32xf32, #tpu.memory_space<vmem>>, vector<1x32xf32>
    %cst_209 = arith.constant dense<0.000000e+00> : vector<8xf32>
    %544 = vector.multi_reduction <add>, %541, %cst_209 [1] : vector<8x32xf32> to vector<8xf32>
    %545 = vector.shape_cast %544 : vector<8xf32> to vector<8x1xf32>
    %cst_210 = arith.constant 3.200000e+01 : f32
    %546 = vector.broadcast %cst_210 : f32 to vector<8x1xf32>
    %547 = arith.divf %545, %546 : vector<8x1xf32>
    %548 = vector.broadcast %547 : vector<8x1xf32> to vector<8x32xf32>
    %549 = arith.subf %541, %548 : vector<8x32xf32>
    %550 = arith.mulf %549, %549 : vector<8x32xf32>
    %cst_211 = arith.constant dense<0.000000e+00> : vector<8xf32>
    %551 = vector.multi_reduction <add>, %550, %cst_211 [1] : vector<8x32xf32> to vector<8xf32>
    %552 = vector.shape_cast %551 : vector<8xf32> to vector<8x1xf32>
    %cst_212 = arith.constant 3.200000e+01 : f32
    %553 = vector.broadcast %cst_212 : f32 to vector<8x1xf32>
    %554 = arith.divf %552, %553 : vector<8x1xf32>
    %cst_213 = arith.constant 9.99999974E-6 : f32
    %555 = vector.broadcast %cst_213 : f32 to vector<8x1xf32>
    %556 = arith.addf %554, %555 : vector<8x1xf32>
    %557 = math.rsqrt %556 : vector<8x1xf32>
    %558 = vector.broadcast %557 : vector<8x1xf32> to vector<8x32xf32>
    %559 = arith.mulf %549, %558 : vector<8x32xf32>
    %560 = vector.broadcast %542 : vector<1x32xf32> to vector<8x32xf32>
    %561 = arith.mulf %559, %560 : vector<8x32xf32>
    %562 = vector.broadcast %543 : vector<1x32xf32> to vector<8x32xf32>
    %563 = arith.addf %561, %562 : vector<8x32xf32>
    %c0_214 = arith.constant 0 : index
    %c0_215 = arith.constant 0 : index
    %564 = vector.load %arg39[%c0_214, %c0_215] : memref<32x128xf32, #tpu.memory_space<vmem>>, vector<32x128xf32>
    %c0_216 = arith.constant 0 : index
    %c0_217 = arith.constant 0 : index
    %565 = vector.load %arg40[%c0_216, %c0_217] : memref<1x128xf32, #tpu.memory_space<vmem>>, vector<1x128xf32>
    %566 = arith.truncf %563 : vector<8x32xf32> to vector<8x32xbf16>
    %567 = arith.truncf %564 : vector<32x128xf32> to vector<32x128xbf16>
    %cst_218 = arith.constant dense<0.000000e+00> : vector<8x128xf32>
    %568 = tpu.matmul %566, %567, %cst_218 {dimension_numbers = #tpu.dot_dimension_numbers<[1], [0], [0], [1], [0, 0, 1, 1], [], []>} : vector<8x32xbf16>, vector<32x128xbf16>, vector<8x128xf32> -> vector<8x128xf32>
    %569 = vector.broadcast %565 : vector<1x128xf32> to vector<8x128xf32>
    %570 = arith.addf %568, %569 : vector<8x128xf32>
    %cst_219 = arith.constant 0.636619746 : f32
    %571 = math.sqrt %cst_219 : f32
    %cst_220 = arith.constant 5.000000e-01 : f32
    %572 = vector.broadcast %cst_220 : f32 to vector<8x128xf32>
    %573 = arith.mulf %572, %570 : vector<8x128xf32>
    %cst_221 = arith.constant 4.471500e-02 : f32
    %574 = vector.broadcast %cst_221 : f32 to vector<8x128xf32>
    %575 = arith.mulf %574, %570 : vector<8x128xf32>
    %576 = arith.mulf %575, %570 : vector<8x128xf32>
    %577 = arith.mulf %576, %570 : vector<8x128xf32>
    %578 = arith.addf %570, %577 : vector<8x128xf32>
    %579 = vector.broadcast %571 : f32 to vector<8x128xf32>
    %580 = arith.mulf %579, %578 : vector<8x128xf32>
    %581 = math.tanh %580 : vector<8x128xf32>
    %cst_222 = arith.constant 1.000000e+00 : f32
    %582 = vector.broadcast %cst_222 : f32 to vector<8x128xf32>
    %583 = arith.addf %582, %581 : vector<8x128xf32>
    %584 = arith.mulf %573, %583 : vector<8x128xf32>
    %c0_223 = arith.constant 0 : index
    %c0_224 = arith.constant 0 : index
    %585 = vector.load %arg41[%c0_223, %c0_224] : memref<128x32xf32, #tpu.memory_space<vmem>>, vector<128x32xf32>
    %c0_225 = arith.constant 0 : index
    %c0_226 = arith.constant 0 : index
    %586 = vector.load %arg42[%c0_225, %c0_226] : memref<1x32xf32, #tpu.memory_space<vmem>>, vector<1x32xf32>
    %587 = arith.truncf %584 : vector<8x128xf32> to vector<8x128xbf16>
    %588 = arith.truncf %585 : vector<128x32xf32> to vector<128x32xbf16>
    %cst_227 = arith.constant dense<0.000000e+00> : vector<8x32xf32>
    %589 = tpu.matmul %587, %588, %cst_227 {dimension_numbers = #tpu.dot_dimension_numbers<[1], [0], [0], [1], [0, 0, 1, 1], [], []>} : vector<8x128xbf16>, vector<128x32xbf16>, vector<8x32xf32> -> vector<8x32xf32>
    %590 = vector.broadcast %586 : vector<1x32xf32> to vector<8x32xf32>
    %591 = arith.addf %589, %590 : vector<8x32xf32>
    %592 = arith.addf %541, %591 : vector<8x32xf32>
    %c0_228 = arith.constant 0 : index
    %c0_229 = arith.constant 0 : index
    %593 = vector.load %arg43[%c0_228, %c0_229] : memref<1x32xf32, #tpu.memory_space<vmem>>, vector<1x32xf32>
    %c0_230 = arith.constant 0 : index
    %c0_231 = arith.constant 0 : index
    %594 = vector.load %arg44[%c0_230, %c0_231] : memref<1x32xf32, #tpu.memory_space<vmem>>, vector<1x32xf32>
    %cst_232 = arith.constant dense<0.000000e+00> : vector<8xf32>
    %595 = vector.multi_reduction <add>, %592, %cst_232 [1] : vector<8x32xf32> to vector<8xf32>
    %596 = vector.shape_cast %595 : vector<8xf32> to vector<8x1xf32>
    %cst_233 = arith.constant 3.200000e+01 : f32
    %597 = vector.broadcast %cst_233 : f32 to vector<8x1xf32>
    %598 = arith.divf %596, %597 : vector<8x1xf32>
    %599 = vector.broadcast %598 : vector<8x1xf32> to vector<8x32xf32>
    %600 = arith.subf %592, %599 : vector<8x32xf32>
    %601 = arith.mulf %600, %600 : vector<8x32xf32>
    %cst_234 = arith.constant dense<0.000000e+00> : vector<8xf32>
    %602 = vector.multi_reduction <add>, %601, %cst_234 [1] : vector<8x32xf32> to vector<8xf32>
    %603 = vector.shape_cast %602 : vector<8xf32> to vector<8x1xf32>
    %cst_235 = arith.constant 3.200000e+01 : f32
    %604 = vector.broadcast %cst_235 : f32 to vector<8x1xf32>
    %605 = arith.divf %603, %604 : vector<8x1xf32>
    %cst_236 = arith.constant 9.99999974E-6 : f32
    %606 = vector.broadcast %cst_236 : f32 to vector<8x1xf32>
    %607 = arith.addf %605, %606 : vector<8x1xf32>
    %608 = math.rsqrt %607 : vector<8x1xf32>
    %609 = vector.broadcast %608 : vector<8x1xf32> to vector<8x32xf32>
    %610 = arith.mulf %600, %609 : vector<8x32xf32>
    %611 = vector.broadcast %593 : vector<1x32xf32> to vector<8x32xf32>
    %612 = arith.mulf %610, %611 : vector<8x32xf32>
    %613 = vector.broadcast %594 : vector<1x32xf32> to vector<8x32xf32>
    %614 = arith.addf %612, %613 : vector<8x32xf32>
    %c0_237 = arith.constant 0 : index
    %c0_238 = arith.constant 0 : index
    %615 = vector.load %arg45[%c0_237, %c0_238] : memref<32x96xf32, #tpu.memory_space<vmem>>, vector<32x96xf32>
    %c0_239 = arith.constant 0 : index
    %c0_240 = arith.constant 0 : index
    %616 = vector.load %arg46[%c0_239, %c0_240] : memref<1x96xf32, #tpu.memory_space<vmem>>, vector<1x96xf32>
    %c0_241 = arith.constant 0 : index
    %c0_242 = arith.constant 0 : index
    %617 = vector.load %arg47[%c0_241, %c0_242] : memref<32x32xf32, #tpu.memory_space<vmem>>, vector<32x32xf32>
    %c0_243 = arith.constant 0 : index
    %c0_244 = arith.constant 0 : index
    %618 = vector.load %arg48[%c0_243, %c0_244] : memref<1x32xf32, #tpu.memory_space<vmem>>, vector<1x32xf32>
    %619 = arith.truncf %614 : vector<8x32xf32> to vector<8x32xbf16>
    %620 = arith.truncf %615 : vector<32x96xf32> to vector<32x96xbf16>
    %cst_245 = arith.constant dense<0.000000e+00> : vector<8x96xf32>
    %621 = tpu.matmul %619, %620, %cst_245 {dimension_numbers = #tpu.dot_dimension_numbers<[1], [0], [0], [1], [0, 0, 1, 1], [], []>} : vector<8x32xbf16>, vector<32x96xbf16>, vector<8x96xf32> -> vector<8x96xf32>
    %622 = vector.broadcast %616 : vector<1x96xf32> to vector<8x96xf32>
    %623 = arith.addf %621, %622 : vector<8x96xf32>
    %624 = tpu.iota {dimensions = array<i32: 1>} : vector<8x8xi32>
    %c8_i32_246 = arith.constant 8 : i32
    %625 = vector.broadcast %c8_i32_246 : i32 to vector<8x8xi32>
    %626 = arith.cmpi slt, %624, %625 : vector<8x8xi32>
    %627 = tpu.iota {dimensions = array<i32: 0>} : vector<8x8xi32>
    %628 = arith.cmpi sle, %624, %627 : vector<8x8xi32>
    %629 = arith.andi %626, %628 : vector<8x8xi1>
    %cst_247 = arith.constant 0.000000e+00 : f32
    %630 = vector.broadcast %cst_247 : f32 to vector<8x32xf32>
    %631 = vector.extract_strided_slice %623 {offsets = [0, 0], sizes = [8, 8], strides = [1, 1]} : vector<8x96xf32> to vector<8x8xf32>
    %632 = vector.extract_strided_slice %623 {offsets = [0, 32], sizes = [8, 8], strides = [1, 1]} : vector<8x96xf32> to vector<8x8xf32>
    %633 = vector.extract_strided_slice %623 {offsets = [0, 64], sizes = [8, 8], strides = [1, 1]} : vector<8x96xf32> to vector<8x8xf32>
    "tpu.trace_start"() <{level = 10 : i32, message = "qd,kd->qk"}> : () -> ()
    %cst_248 = arith.constant dense<0.000000e+00> : vector<8x8xf32>
    %634 = tpu.matmul %631, %632, %cst_248 {dimension_numbers = #tpu.dot_dimension_numbers<[1], [1], [0], [0], [0, 0, 1, 0], [], []>} : vector<8x8xf32>, vector<8x8xf32>, vector<8x8xf32> -> vector<8x8xf32>
    "tpu.trace_stop"() : () -> ()
    %cst_249 = arith.constant 0.353553385 : f32
    %635 = vector.broadcast %cst_249 : f32 to vector<8x8xf32>
    %636 = arith.mulf %634, %635 : vector<8x8xf32>
    %cst_250 = arith.constant -1.000000e+30 : f32
    %637 = vector.broadcast %cst_250 : f32 to vector<8x8xf32>
    %638 = arith.select %629, %636, %637 : vector<8x8xi1>, vector<8x8xf32>
    %cst_251 = arith.constant dense<0xFF800000> : vector<8xf32>
    %639 = vector.multi_reduction <maximumf>, %638, %cst_251 [1] : vector<8x8xf32> to vector<8xf32>
    %640 = vector.shape_cast %639 : vector<8xf32> to vector<8x1xf32>
    %641 = vector.broadcast %640 : vector<8x1xf32> to vector<8x8xf32>
    %642 = arith.subf %638, %641 : vector<8x8xf32>
    %643 = math.exp %642 : vector<8x8xf32>
    %cst_252 = arith.constant dense<0.000000e+00> : vector<8xf32>
    %644 = vector.multi_reduction <add>, %643, %cst_252 [1] : vector<8x8xf32> to vector<8xf32>
    %645 = vector.shape_cast %644 : vector<8xf32> to vector<8x1xf32>
    %646 = tpu.reciprocal %645 {approx = true} : vector<8x1xf32> -> vector<8x1xf32>
    %647 = vector.broadcast %646 : vector<8x1xf32> to vector<8x8xf32>
    %648 = arith.mulf %643, %647 : vector<8x8xf32>
    "tpu.trace_start"() <{level = 10 : i32, message = "qk,kd->qd"}> : () -> ()
    %cst_253 = arith.constant dense<0.000000e+00> : vector<8x8xf32>
    %649 = tpu.matmul %648, %633, %cst_253 {dimension_numbers = #tpu.dot_dimension_numbers<[1], [0], [0], [1], [0, 0, 1, 1], [], []>} : vector<8x8xf32>, vector<8x8xf32>, vector<8x8xf32> -> vector<8x8xf32>
    "tpu.trace_stop"() : () -> ()
    %650 = arith.truncf %649 : vector<8x8xf32> to vector<8x8xbf16>
    %651 = vector.extract_strided_slice %617 {offsets = [0, 0], sizes = [8, 32], strides = [1, 1]} : vector<32x32xf32> to vector<8x32xf32>
    %652 = arith.truncf %651 : vector<8x32xf32> to vector<8x32xbf16>
    %cst_254 = arith.constant dense<0.000000e+00> : vector<8x32xf32>
    %653 = tpu.matmul %650, %652, %cst_254 {dimension_numbers = #tpu.dot_dimension_numbers<[1], [0], [0], [1], [0, 0, 1, 1], [], []>} : vector<8x8xbf16>, vector<8x32xbf16>, vector<8x32xf32> -> vector<8x32xf32>
    %654 = arith.addf %630, %653 : vector<8x32xf32>
    %655 = vector.extract_strided_slice %623 {offsets = [0, 8], sizes = [8, 8], strides = [1, 1]} : vector<8x96xf32> to vector<8x8xf32>
    %656 = vector.extract_strided_slice %623 {offsets = [0, 40], sizes = [8, 8], strides = [1, 1]} : vector<8x96xf32> to vector<8x8xf32>
    %657 = vector.extract_strided_slice %623 {offsets = [0, 72], sizes = [8, 8], strides = [1, 1]} : vector<8x96xf32> to vector<8x8xf32>
    "tpu.trace_start"() <{level = 10 : i32, message = "qd,kd->qk"}> : () -> ()
    %cst_255 = arith.constant dense<0.000000e+00> : vector<8x8xf32>
    %658 = tpu.matmul %655, %656, %cst_255 {dimension_numbers = #tpu.dot_dimension_numbers<[1], [1], [0], [0], [0, 0, 1, 0], [], []>} : vector<8x8xf32>, vector<8x8xf32>, vector<8x8xf32> -> vector<8x8xf32>
    "tpu.trace_stop"() : () -> ()
    %cst_256 = arith.constant 0.353553385 : f32
    %659 = vector.broadcast %cst_256 : f32 to vector<8x8xf32>
    %660 = arith.mulf %658, %659 : vector<8x8xf32>
    %cst_257 = arith.constant -1.000000e+30 : f32
    %661 = vector.broadcast %cst_257 : f32 to vector<8x8xf32>
    %662 = arith.select %629, %660, %661 : vector<8x8xi1>, vector<8x8xf32>
    %cst_258 = arith.constant dense<0xFF800000> : vector<8xf32>
    %663 = vector.multi_reduction <maximumf>, %662, %cst_258 [1] : vector<8x8xf32> to vector<8xf32>
    %664 = vector.shape_cast %663 : vector<8xf32> to vector<8x1xf32>
    %665 = vector.broadcast %664 : vector<8x1xf32> to vector<8x8xf32>
    %666 = arith.subf %662, %665 : vector<8x8xf32>
    %667 = math.exp %666 : vector<8x8xf32>
    %cst_259 = arith.constant dense<0.000000e+00> : vector<8xf32>
    %668 = vector.multi_reduction <add>, %667, %cst_259 [1] : vector<8x8xf32> to vector<8xf32>
    %669 = vector.shape_cast %668 : vector<8xf32> to vector<8x1xf32>
    %670 = tpu.reciprocal %669 {approx = true} : vector<8x1xf32> -> vector<8x1xf32>
    %671 = vector.broadcast %670 : vector<8x1xf32> to vector<8x8xf32>
    %672 = arith.mulf %667, %671 : vector<8x8xf32>
    "tpu.trace_start"() <{level = 10 : i32, message = "qk,kd->qd"}> : () -> ()
    %cst_260 = arith.constant dense<0.000000e+00> : vector<8x8xf32>
    %673 = tpu.matmul %672, %657, %cst_260 {dimension_numbers = #tpu.dot_dimension_numbers<[1], [0], [0], [1], [0, 0, 1, 1], [], []>} : vector<8x8xf32>, vector<8x8xf32>, vector<8x8xf32> -> vector<8x8xf32>
    "tpu.trace_stop"() : () -> ()
    %674 = arith.truncf %673 : vector<8x8xf32> to vector<8x8xbf16>
    %675 = vector.extract_strided_slice %617 {offsets = [8, 0], sizes = [8, 32], strides = [1, 1]} : vector<32x32xf32> to vector<8x32xf32>
    %676 = arith.truncf %675 : vector<8x32xf32> to vector<8x32xbf16>
    %cst_261 = arith.constant dense<0.000000e+00> : vector<8x32xf32>
    %677 = tpu.matmul %674, %676, %cst_261 {dimension_numbers = #tpu.dot_dimension_numbers<[1], [0], [0], [1], [0, 0, 1, 1], [], []>} : vector<8x8xbf16>, vector<8x32xbf16>, vector<8x32xf32> -> vector<8x32xf32>
    %678 = arith.addf %654, %677 : vector<8x32xf32>
    %679 = vector.extract_strided_slice %623 {offsets = [0, 16], sizes = [8, 8], strides = [1, 1]} : vector<8x96xf32> to vector<8x8xf32>
    %680 = vector.extract_strided_slice %623 {offsets = [0, 48], sizes = [8, 8], strides = [1, 1]} : vector<8x96xf32> to vector<8x8xf32>
    %681 = vector.extract_strided_slice %623 {offsets = [0, 80], sizes = [8, 8], strides = [1, 1]} : vector<8x96xf32> to vector<8x8xf32>
    "tpu.trace_start"() <{level = 10 : i32, message = "qd,kd->qk"}> : () -> ()
    %cst_262 = arith.constant dense<0.000000e+00> : vector<8x8xf32>
    %682 = tpu.matmul %679, %680, %cst_262 {dimension_numbers = #tpu.dot_dimension_numbers<[1], [1], [0], [0], [0, 0, 1, 0], [], []>} : vector<8x8xf32>, vector<8x8xf32>, vector<8x8xf32> -> vector<8x8xf32>
    "tpu.trace_stop"() : () -> ()
    %cst_263 = arith.constant 0.353553385 : f32
    %683 = vector.broadcast %cst_263 : f32 to vector<8x8xf32>
    %684 = arith.mulf %682, %683 : vector<8x8xf32>
    %cst_264 = arith.constant -1.000000e+30 : f32
    %685 = vector.broadcast %cst_264 : f32 to vector<8x8xf32>
    %686 = arith.select %629, %684, %685 : vector<8x8xi1>, vector<8x8xf32>
    %cst_265 = arith.constant dense<0xFF800000> : vector<8xf32>
    %687 = vector.multi_reduction <maximumf>, %686, %cst_265 [1] : vector<8x8xf32> to vector<8xf32>
    %688 = vector.shape_cast %687 : vector<8xf32> to vector<8x1xf32>
    %689 = vector.broadcast %688 : vector<8x1xf32> to vector<8x8xf32>
    %690 = arith.subf %686, %689 : vector<8x8xf32>
    %691 = math.exp %690 : vector<8x8xf32>
    %cst_266 = arith.constant dense<0.000000e+00> : vector<8xf32>
    %692 = vector.multi_reduction <add>, %691, %cst_266 [1] : vector<8x8xf32> to vector<8xf32>
    %693 = vector.shape_cast %692 : vector<8xf32> to vector<8x1xf32>
    %694 = tpu.reciprocal %693 {approx = true} : vector<8x1xf32> -> vector<8x1xf32>
    %695 = vector.broadcast %694 : vector<8x1xf32> to vector<8x8xf32>
    %696 = arith.mulf %691, %695 : vector<8x8xf32>
    "tpu.trace_start"() <{level = 10 : i32, message = "qk,kd->qd"}> : () -> ()
    %cst_267 = arith.constant dense<0.000000e+00> : vector<8x8xf32>
    %697 = tpu.matmul %696, %681, %cst_267 {dimension_numbers = #tpu.dot_dimension_numbers<[1], [0], [0], [1], [0, 0, 1, 1], [], []>} : vector<8x8xf32>, vector<8x8xf32>, vector<8x8xf32> -> vector<8x8xf32>
    "tpu.trace_stop"() : () -> ()
    %698 = arith.truncf %697 : vector<8x8xf32> to vector<8x8xbf16>
    %699 = vector.extract_strided_slice %617 {offsets = [16, 0], sizes = [8, 32], strides = [1, 1]} : vector<32x32xf32> to vector<8x32xf32>
    %700 = arith.truncf %699 : vector<8x32xf32> to vector<8x32xbf16>
    %cst_268 = arith.constant dense<0.000000e+00> : vector<8x32xf32>
    %701 = tpu.matmul %698, %700, %cst_268 {dimension_numbers = #tpu.dot_dimension_numbers<[1], [0], [0], [1], [0, 0, 1, 1], [], []>} : vector<8x8xbf16>, vector<8x32xbf16>, vector<8x32xf32> -> vector<8x32xf32>
    %702 = arith.addf %678, %701 : vector<8x32xf32>
    %703 = vector.extract_strided_slice %623 {offsets = [0, 24], sizes = [8, 8], strides = [1, 1]} : vector<8x96xf32> to vector<8x8xf32>
    %704 = vector.extract_strided_slice %623 {offsets = [0, 56], sizes = [8, 8], strides = [1, 1]} : vector<8x96xf32> to vector<8x8xf32>
    %705 = vector.extract_strided_slice %623 {offsets = [0, 88], sizes = [8, 8], strides = [1, 1]} : vector<8x96xf32> to vector<8x8xf32>
    "tpu.trace_start"() <{level = 10 : i32, message = "qd,kd->qk"}> : () -> ()
    %cst_269 = arith.constant dense<0.000000e+00> : vector<8x8xf32>
    %706 = tpu.matmul %703, %704, %cst_269 {dimension_numbers = #tpu.dot_dimension_numbers<[1], [1], [0], [0], [0, 0, 1, 0], [], []>} : vector<8x8xf32>, vector<8x8xf32>, vector<8x8xf32> -> vector<8x8xf32>
    "tpu.trace_stop"() : () -> ()
    %cst_270 = arith.constant 0.353553385 : f32
    %707 = vector.broadcast %cst_270 : f32 to vector<8x8xf32>
    %708 = arith.mulf %706, %707 : vector<8x8xf32>
    %cst_271 = arith.constant -1.000000e+30 : f32
    %709 = vector.broadcast %cst_271 : f32 to vector<8x8xf32>
    %710 = arith.select %629, %708, %709 : vector<8x8xi1>, vector<8x8xf32>
    %cst_272 = arith.constant dense<0xFF800000> : vector<8xf32>
    %711 = vector.multi_reduction <maximumf>, %710, %cst_272 [1] : vector<8x8xf32> to vector<8xf32>
    %712 = vector.shape_cast %711 : vector<8xf32> to vector<8x1xf32>
    %713 = vector.broadcast %712 : vector<8x1xf32> to vector<8x8xf32>
    %714 = arith.subf %710, %713 : vector<8x8xf32>
    %715 = math.exp %714 : vector<8x8xf32>
    %cst_273 = arith.constant dense<0.000000e+00> : vector<8xf32>
    %716 = vector.multi_reduction <add>, %715, %cst_273 [1] : vector<8x8xf32> to vector<8xf32>
    %717 = vector.shape_cast %716 : vector<8xf32> to vector<8x1xf32>
    %718 = tpu.reciprocal %717 {approx = true} : vector<8x1xf32> -> vector<8x1xf32>
    %719 = vector.broadcast %718 : vector<8x1xf32> to vector<8x8xf32>
    %720 = arith.mulf %715, %719 : vector<8x8xf32>
    "tpu.trace_start"() <{level = 10 : i32, message = "qk,kd->qd"}> : () -> ()
    %cst_274 = arith.constant dense<0.000000e+00> : vector<8x8xf32>
    %721 = tpu.matmul %720, %705, %cst_274 {dimension_numbers = #tpu.dot_dimension_numbers<[1], [0], [0], [1], [0, 0, 1, 1], [], []>} : vector<8x8xf32>, vector<8x8xf32>, vector<8x8xf32> -> vector<8x8xf32>
    "tpu.trace_stop"() : () -> ()
    %722 = arith.truncf %721 : vector<8x8xf32> to vector<8x8xbf16>
    %723 = vector.extract_strided_slice %617 {offsets = [24, 0], sizes = [8, 32], strides = [1, 1]} : vector<32x32xf32> to vector<8x32xf32>
    %724 = arith.truncf %723 : vector<8x32xf32> to vector<8x32xbf16>
    %cst_275 = arith.constant dense<0.000000e+00> : vector<8x32xf32>
    %725 = tpu.matmul %722, %724, %cst_275 {dimension_numbers = #tpu.dot_dimension_numbers<[1], [0], [0], [1], [0, 0, 1, 1], [], []>} : vector<8x8xbf16>, vector<8x32xbf16>, vector<8x32xf32> -> vector<8x32xf32>
    %726 = arith.addf %702, %725 : vector<8x32xf32>
    %727 = vector.broadcast %618 : vector<1x32xf32> to vector<8x32xf32>
    %728 = arith.addf %726, %727 : vector<8x32xf32>
    %729 = arith.addf %592, %728 : vector<8x32xf32>
    %c0_276 = arith.constant 0 : index
    %c0_277 = arith.constant 0 : index
    %730 = vector.load %arg49[%c0_276, %c0_277] : memref<1x32xf32, #tpu.memory_space<vmem>>, vector<1x32xf32>
    %c0_278 = arith.constant 0 : index
    %c0_279 = arith.constant 0 : index
    %731 = vector.load %arg50[%c0_278, %c0_279] : memref<1x32xf32, #tpu.memory_space<vmem>>, vector<1x32xf32>
    %cst_280 = arith.constant dense<0.000000e+00> : vector<8xf32>
    %732 = vector.multi_reduction <add>, %729, %cst_280 [1] : vector<8x32xf32> to vector<8xf32>
    %733 = vector.shape_cast %732 : vector<8xf32> to vector<8x1xf32>
    %cst_281 = arith.constant 3.200000e+01 : f32
    %734 = vector.broadcast %cst_281 : f32 to vector<8x1xf32>
    %735 = arith.divf %733, %734 : vector<8x1xf32>
    %736 = vector.broadcast %735 : vector<8x1xf32> to vector<8x32xf32>
    %737 = arith.subf %729, %736 : vector<8x32xf32>
    %738 = arith.mulf %737, %737 : vector<8x32xf32>
    %cst_282 = arith.constant dense<0.000000e+00> : vector<8xf32>
    %739 = vector.multi_reduction <add>, %738, %cst_282 [1] : vector<8x32xf32> to vector<8xf32>
    %740 = vector.shape_cast %739 : vector<8xf32> to vector<8x1xf32>
    %cst_283 = arith.constant 3.200000e+01 : f32
    %741 = vector.broadcast %cst_283 : f32 to vector<8x1xf32>
    %742 = arith.divf %740, %741 : vector<8x1xf32>
    %cst_284 = arith.constant 9.99999974E-6 : f32
    %743 = vector.broadcast %cst_284 : f32 to vector<8x1xf32>
    %744 = arith.addf %742, %743 : vector<8x1xf32>
    %745 = math.rsqrt %744 : vector<8x1xf32>
    %746 = vector.broadcast %745 : vector<8x1xf32> to vector<8x32xf32>
    %747 = arith.mulf %737, %746 : vector<8x32xf32>
    %748 = vector.broadcast %730 : vector<1x32xf32> to vector<8x32xf32>
    %749 = arith.mulf %747, %748 : vector<8x32xf32>
    %750 = vector.broadcast %731 : vector<1x32xf32> to vector<8x32xf32>
    %751 = arith.addf %749, %750 : vector<8x32xf32>
    %c0_285 = arith.constant 0 : index
    %c0_286 = arith.constant 0 : index
    %752 = vector.load %arg51[%c0_285, %c0_286] : memref<32x128xf32, #tpu.memory_space<vmem>>, vector<32x128xf32>
    %c0_287 = arith.constant 0 : index
    %c0_288 = arith.constant 0 : index
    %753 = vector.load %arg52[%c0_287, %c0_288] : memref<1x128xf32, #tpu.memory_space<vmem>>, vector<1x128xf32>
    %754 = arith.truncf %751 : vector<8x32xf32> to vector<8x32xbf16>
    %755 = arith.truncf %752 : vector<32x128xf32> to vector<32x128xbf16>
    %cst_289 = arith.constant dense<0.000000e+00> : vector<8x128xf32>
    %756 = tpu.matmul %754, %755, %cst_289 {dimension_numbers = #tpu.dot_dimension_numbers<[1], [0], [0], [1], [0, 0, 1, 1], [], []>} : vector<8x32xbf16>, vector<32x128xbf16>, vector<8x128xf32> -> vector<8x128xf32>
    %757 = vector.broadcast %753 : vector<1x128xf32> to vector<8x128xf32>
    %758 = arith.addf %756, %757 : vector<8x128xf32>
    %cst_290 = arith.constant 0.636619746 : f32
    %759 = math.sqrt %cst_290 : f32
    %cst_291 = arith.constant 5.000000e-01 : f32
    %760 = vector.broadcast %cst_291 : f32 to vector<8x128xf32>
    %761 = arith.mulf %760, %758 : vector<8x128xf32>
    %cst_292 = arith.constant 4.471500e-02 : f32
    %762 = vector.broadcast %cst_292 : f32 to vector<8x128xf32>
    %763 = arith.mulf %762, %758 : vector<8x128xf32>
    %764 = arith.mulf %763, %758 : vector<8x128xf32>
    %765 = arith.mulf %764, %758 : vector<8x128xf32>
    %766 = arith.addf %758, %765 : vector<8x128xf32>
    %767 = vector.broadcast %759 : f32 to vector<8x128xf32>
    %768 = arith.mulf %767, %766 : vector<8x128xf32>
    %769 = math.tanh %768 : vector<8x128xf32>
    %cst_293 = arith.constant 1.000000e+00 : f32
    %770 = vector.broadcast %cst_293 : f32 to vector<8x128xf32>
    %771 = arith.addf %770, %769 : vector<8x128xf32>
    %772 = arith.mulf %761, %771 : vector<8x128xf32>
    %c0_294 = arith.constant 0 : index
    %c0_295 = arith.constant 0 : index
    %773 = vector.load %arg53[%c0_294, %c0_295] : memref<128x32xf32, #tpu.memory_space<vmem>>, vector<128x32xf32>
    %c0_296 = arith.constant 0 : index
    %c0_297 = arith.constant 0 : index
    %774 = vector.load %arg54[%c0_296, %c0_297] : memref<1x32xf32, #tpu.memory_space<vmem>>, vector<1x32xf32>
    %775 = arith.truncf %772 : vector<8x128xf32> to vector<8x128xbf16>
    %776 = arith.truncf %773 : vector<128x32xf32> to vector<128x32xbf16>
    %cst_298 = arith.constant dense<0.000000e+00> : vector<8x32xf32>
    %777 = tpu.matmul %775, %776, %cst_298 {dimension_numbers = #tpu.dot_dimension_numbers<[1], [0], [0], [1], [0, 0, 1, 1], [], []>} : vector<8x128xbf16>, vector<128x32xbf16>, vector<8x32xf32> -> vector<8x32xf32>
    %778 = vector.broadcast %774 : vector<1x32xf32> to vector<8x32xf32>
    %779 = arith.addf %777, %778 : vector<8x32xf32>
    %780 = arith.addf %729, %779 : vector<8x32xf32>
    %c0_299 = arith.constant 0 : index
    %c0_300 = arith.constant 0 : index
    %781 = vector.load %arg55[%c0_299, %c0_300] : memref<1x32xf32, #tpu.memory_space<vmem>>, vector<1x32xf32>
    %c0_301 = arith.constant 0 : index
    %c0_302 = arith.constant 0 : index
    %782 = vector.load %arg56[%c0_301, %c0_302] : memref<1x32xf32, #tpu.memory_space<vmem>>, vector<1x32xf32>
    %cst_303 = arith.constant dense<0.000000e+00> : vector<8xf32>
    %783 = vector.multi_reduction <add>, %780, %cst_303 [1] : vector<8x32xf32> to vector<8xf32>
    %784 = vector.shape_cast %783 : vector<8xf32> to vector<8x1xf32>
    %cst_304 = arith.constant 3.200000e+01 : f32
    %785 = vector.broadcast %cst_304 : f32 to vector<8x1xf32>
    %786 = arith.divf %784, %785 : vector<8x1xf32>
    %787 = vector.broadcast %786 : vector<8x1xf32> to vector<8x32xf32>
    %788 = arith.subf %780, %787 : vector<8x32xf32>
    %789 = arith.mulf %788, %788 : vector<8x32xf32>
    %cst_305 = arith.constant dense<0.000000e+00> : vector<8xf32>
    %790 = vector.multi_reduction <add>, %789, %cst_305 [1] : vector<8x32xf32> to vector<8xf32>
    %791 = vector.shape_cast %790 : vector<8xf32> to vector<8x1xf32>
    %cst_306 = arith.constant 3.200000e+01 : f32
    %792 = vector.broadcast %cst_306 : f32 to vector<8x1xf32>
    %793 = arith.divf %791, %792 : vector<8x1xf32>
    %cst_307 = arith.constant 9.99999974E-6 : f32
    %794 = vector.broadcast %cst_307 : f32 to vector<8x1xf32>
    %795 = arith.addf %793, %794 : vector<8x1xf32>
    %796 = math.rsqrt %795 : vector<8x1xf32>
    %797 = vector.broadcast %796 : vector<8x1xf32> to vector<8x32xf32>
    %798 = arith.mulf %788, %797 : vector<8x32xf32>
    %799 = vector.broadcast %781 : vector<1x32xf32> to vector<8x32xf32>
    %800 = arith.mulf %798, %799 : vector<8x32xf32>
    %801 = vector.broadcast %782 : vector<1x32xf32> to vector<8x32xf32>
    %802 = arith.addf %800, %801 : vector<8x32xf32>
    %c0_308 = arith.constant 0 : index
    %c0_309 = arith.constant 0 : index
    %803 = vector.load %arg57[%c0_308, %c0_309] : memref<32x64xf32, #tpu.memory_space<vmem>>, vector<32x64xf32>
    %804 = arith.truncf %802 : vector<8x32xf32> to vector<8x32xbf16>
    %805 = arith.truncf %803 : vector<32x64xf32> to vector<32x64xbf16>
    %cst_310 = arith.constant dense<0.000000e+00> : vector<8x64xf32>
    %806 = tpu.matmul %804, %805, %cst_310 {dimension_numbers = #tpu.dot_dimension_numbers<[1], [0], [0], [1], [0, 0, 1, 1], [], []>} : vector<8x32xbf16>, vector<32x64xbf16>, vector<8x64xf32> -> vector<8x64xf32>
    %c0_311 = arith.constant 0 : index
    %c0_312 = arith.constant 0 : index
    %c0_313 = arith.constant 0 : index
    %807 = vector.load %arg58[%c0_311, %c0_312, %c0_313] : memref<1x8x64xf32, #tpu.memory_space<vmem>>, vector<1x8x64xf32>
    %808 = vector.shape_cast %807 : vector<1x8x64xf32> to vector<8x64xf32>
    %809 = vector.shape_cast %806 : vector<8x64xf32> to vector<1x8x64xf32>
    tpu.vector_store %arg58[%c0_311, %c0_312, %c0_313], %809 {strides = array<i32>} : memref<1x8x64xf32, #tpu.memory_space<vmem>>, vector<1x8x64xf32>,
    return
  }
  func.func @transform_0(%arg0: i32) -> (i32, i32, i32) {
    %c0_i32 = arith.constant 0 : i32
    %c0_i32_0 = arith.constant 0 : i32
    %c0_i32_1 = arith.constant 0 : i32
    return %arg0, %c0_i32, %c0_i32_0 : i32, i32, i32
  }
  func.func @transform_1(%arg0: i32) -> (i32, i32) {
    %c0_i32 = arith.constant 0 : i32
    %c0_i32_0 = arith.constant 0 : i32
    %c0_i32_1 = arith.constant 0 : i32
    return %c0_i32, %c0_i32_0 : i32, i32
  }
  func.func @transform_2(%arg0: i32) -> (i32, i32) {
    %c0_i32 = arith.constant 0 : i32
    %c0_i32_0 = arith.constant 0 : i32
    %c0_i32_1 = arith.constant 0 : i32
    return %c0_i32, %c0_i32_0 : i32, i32
  }
  func.func @transform_3(%arg0: i32) -> (i32, i32) {
    %c0_i32 = arith.constant 0 : i32
    %c0_i32_0 = arith.constant 0 : i32
    %c0_i32_1 = arith.constant 0 : i32
    return %c0_i32, %c0_i32_0 : i32, i32
  }
  func.func @transform_4(%arg0: i32) -> (i32, i32) {
    %c0_i32 = arith.constant 0 : i32
    %c0_i32_0 = arith.constant 0 : i32
    %c0_i32_1 = arith.constant 0 : i32
    return %c0_i32, %c0_i32_0 : i32, i32
  }
  func.func @transform_5(%arg0: i32) -> (i32, i32) {
    %c0_i32 = arith.constant 0 : i32
    %c0_i32_0 = arith.constant 0 : i32
    %c0_i32_1 = arith.constant 0 : i32
    return %c0_i32, %c0_i32_0 : i32, i32
  }
  func.func @transform_6(%arg0: i32) -> (i32, i32) {
    %c0_i32 = arith.constant 0 : i32
    %c0_i32_0 = arith.constant 0 : i32
    %c0_i32_1 = arith.constant 0 : i32
    return %c0_i32, %c0_i32_0 : i32, i32
  }
  func.func @transform_7(%arg0: i32) -> (i32, i32) {
    %c0_i32 = arith.constant 0 : i32
    %c0_i32_0 = arith.constant 0 : i32
    %c0_i32_1 = arith.constant 0 : i32
    return %c0_i32, %c0_i32_0 : i32, i32
  }
  func.func @transform_8(%arg0: i32) -> (i32, i32) {
    %c0_i32 = arith.constant 0 : i32
    %c0_i32_0 = arith.constant 0 : i32
    %c0_i32_1 = arith.constant 0 : i32
    return %c0_i32, %c0_i32_0 : i32, i32
  }
  func.func @transform_9(%arg0: i32) -> (i32, i32) {
    %c0_i32 = arith.constant 0 : i32
    %c0_i32_0 = arith.constant 0 : i32
    %c0_i32_1 = arith.constant 0 : i32
    return %c0_i32, %c0_i32_0 : i32, i32
  }
  func.func @transform_10(%arg0: i32) -> (i32, i32) {
    %c0_i32 = arith.constant 0 : i32
    %c0_i32_0 = arith.constant 0 : i32
    %c0_i32_1 = arith.constant 0 : i32
    return %c0_i32, %c0_i32_0 : i32, i32
  }
  func.func @transform_11(%arg0: i32) -> (i32, i32) {
    %c0_i32 = arith.constant 0 : i32
    %c0_i32_0 = arith.constant 0 : i32
    %c0_i32_1 = arith.constant 0 : i32
    return %c0_i32, %c0_i32_0 : i32, i32
  }
  func.func @transform_12(%arg0: i32) -> (i32, i32) {
    %c0_i32 = arith.constant 0 : i32
    %c0_i32_0 = arith.constant 0 : i32
    %c0_i32_1 = arith.constant 0 : i32
    return %c0_i32, %c0_i32_0 : i32, i32
  }
  func.func @transform_13(%arg0: i32) -> (i32, i32) {
    %c0_i32 = arith.constant 0 : i32
    %c0_i32_0 = arith.constant 0 : i32
    %c0_i32_1 = arith.constant 0 : i32
    return %c0_i32, %c0_i32_0 : i32, i32
  }
  func.func @transform_14(%arg0: i32) -> (i32, i32) {
    %c0_i32 = arith.constant 0 : i32
    %c0_i32_0 = arith.constant 0 : i32
    %c0_i32_1 = arith.constant 0 : i32
    return %c0_i32, %c0_i32_0 : i32, i32
  }
  func.func @transform_15(%arg0: i32) -> (i32, i32) {
    %c0_i32 = arith.constant 0 : i32
    %c0_i32_0 = arith.constant 0 : i32
    %c0_i32_1 = arith.constant 0 : i32
    return %c0_i32, %c0_i32_0 : i32, i32
  }
  func.func @transform_16(%arg0: i32) -> (i32, i32) {
    %c0_i32 = arith.constant 0 : i32
    %c0_i32_0 = arith.constant 0 : i32
    %c0_i32_1 = arith.constant 0 : i32
    return %c0_i32, %c0_i32_0 : i32, i32
  }
  func.func @transform_17(%arg0: i32) -> (i32, i32) {
    %c0_i32 = arith.constant 0 : i32
    %c0_i32_0 = arith.constant 0 : i32
    %c0_i32_1 = arith.constant 0 : i32
    return %c0_i32, %c0_i32_0 : i32, i32
  }
  func.func @transform_18(%arg0: i32) -> (i32, i32) {
    %c0_i32 = arith.constant 0 : i32
    %c0_i32_0 = arith.constant 0 : i32
    %c0_i32_1 = arith.constant 0 : i32
    return %c0_i32, %c0_i32_0 : i32, i32
  }
  func.func @transform_19(%arg0: i32) -> (i32, i32) {
    %c0_i32 = arith.constant 0 : i32
    %c0_i32_0 = arith.constant 0 : i32
    %c0_i32_1 = arith.constant 0 : i32
    return %c0_i32, %c0_i32_0 : i32, i32
  }
  func.func @transform_20(%arg0: i32) -> (i32, i32) {
    %c0_i32 = arith.constant 0 : i32
    %c0_i32_0 = arith.constant 0 : i32
    %c0_i32_1 = arith.constant 0 : i32
    return %c0_i32, %c0_i32_0 : i32, i32
  }
  func.func @transform_21(%arg0: i32) -> (i32, i32) {
    %c0_i32 = arith.constant 0 : i32
    %c0_i32_0 = arith.constant 0 : i32
    %c0_i32_1 = arith.constant 0 : i32
    return %c0_i32, %c0_i32_0 : i32, i32
  }
  func.func @transform_22(%arg0: i32) -> (i32, i32) {
    %c0_i32 = arith.constant 0 : i32
    %c0_i32_0 = arith.constant 0 : i32
    %c0_i32_1 = arith.constant 0 : i32
    return %c0_i32, %c0_i32_0 : i32, i32
  }
  func.func @transform_23(%arg0: i32) -> (i32, i32) {
    %c0_i32 = arith.constant 0 : i32
    %c0_i32_0 = arith.constant 0 : i32
    %c0_i32_1 = arith.constant 0 : i32
    return %c0_i32, %c0_i32_0 : i32, i32
  }
  func.func @transform_24(%arg0: i32) -> (i32, i32) {
    %c0_i32 = arith.constant 0 : i32
    %c0_i32_0 = arith.constant 0 : i32
    %c0_i32_1 = arith.constant 0 : i32
    return %c0_i32, %c0_i32_0 : i32, i32
  }
  func.func @transform_25(%arg0: i32) -> (i32, i32) {
    %c0_i32 = arith.constant 0 : i32
    %c0_i32_0 = arith.constant 0 : i32
    %c0_i32_1 = arith.constant 0 : i32
    return %c0_i32, %c0_i32_0 : i32, i32
  }
  func.func @transform_26(%arg0: i32) -> (i32, i32) {
    %c0_i32 = arith.constant 0 : i32
    %c0_i32_0 = arith.constant 0 : i32
    %c0_i32_1 = arith.constant 0 : i32
    return %c0_i32, %c0_i32_0 : i32, i32
  }
  func.func @transform_27(%arg0: i32) -> (i32, i32) {
    %c0_i32 = arith.constant 0 : i32
    %c0_i32_0 = arith.constant 0 : i32
    %c0_i32_1 = arith.constant 0 : i32
    return %c0_i32, %c0_i32_0 : i32, i32
  }
  func.func @transform_28(%arg0: i32) -> (i32, i32) {
    %c0_i32 = arith.constant 0 : i32
    %c0_i32_0 = arith.constant 0 : i32
    %c0_i32_1 = arith.constant 0 : i32
    return %c0_i32, %c0_i32_0 : i32, i32
  }
  func.func @transform_29(%arg0: i32) -> (i32, i32) {
    %c0_i32 = arith.constant 0 : i32
    %c0_i32_0 = arith.constant 0 : i32
    %c0_i32_1 = arith.constant 0 : i32
    return %c0_i32, %c0_i32_0 : i32, i32
  }
  func.func @transform_30(%arg0: i32) -> (i32, i32) {
    %c0_i32 = arith.constant 0 : i32
    %c0_i32_0 = arith.constant 0 : i32
    %c0_i32_1 = arith.constant 0 : i32
    return %c0_i32, %c0_i32_0 : i32, i32
  }
  func.func @transform_31(%arg0: i32) -> (i32, i32) {
    %c0_i32 = arith.constant 0 : i32
    %c0_i32_0 = arith.constant 0 : i32
    %c0_i32_1 = arith.constant 0 : i32
    return %c0_i32, %c0_i32_0 : i32, i32
  }
  func.func @transform_32(%arg0: i32) -> (i32, i32) {
    %c0_i32 = arith.constant 0 : i32
    %c0_i32_0 = arith.constant 0 : i32
    %c0_i32_1 = arith.constant 0 : i32
    return %c0_i32, %c0_i32_0 : i32, i32
  }
  func.func @transform_33(%arg0: i32) -> (i32, i32) {
    %c0_i32 = arith.constant 0 : i32
    %c0_i32_0 = arith.constant 0 : i32
    %c0_i32_1 = arith.constant 0 : i32
    return %c0_i32, %c0_i32_0 : i32, i32
  }
  func.func @transform_34(%arg0: i32) -> (i32, i32) {
    %c0_i32 = arith.constant 0 : i32
    %c0_i32_0 = arith.constant 0 : i32
    %c0_i32_1 = arith.constant 0 : i32
    return %c0_i32, %c0_i32_0 : i32, i32
  }
  func.func @transform_35(%arg0: i32) -> (i32, i32) {
    %c0_i32 = arith.constant 0 : i32
    %c0_i32_0 = arith.constant 0 : i32
    %c0_i32_1 = arith.constant 0 : i32
    return %c0_i32, %c0_i32_0 : i32, i32
  }
  func.func @transform_36(%arg0: i32) -> (i32, i32) {
    %c0_i32 = arith.constant 0 : i32
    %c0_i32_0 = arith.constant 0 : i32
    %c0_i32_1 = arith.constant 0 : i32
    return %c0_i32, %c0_i32_0 : i32, i32
  }
  func.func @transform_37(%arg0: i32) -> (i32, i32) {
    %c0_i32 = arith.constant 0 : i32
    %c0_i32_0 = arith.constant 0 : i32
    %c0_i32_1 = arith.constant 0 : i32
    return %c0_i32, %c0_i32_0 : i32, i32
  }
  func.func @transform_38(%arg0: i32) -> (i32, i32) {
    %c0_i32 = arith.constant 0 : i32
    %c0_i32_0 = arith.constant 0 : i32
    %c0_i32_1 = arith.constant 0 : i32
    return %c0_i32, %c0_i32_0 : i32, i32
  }
  func.func @transform_39(%arg0: i32) -> (i32, i32) {
    %c0_i32 = arith.constant 0 : i32
    %c0_i32_0 = arith.constant 0 : i32
    %c0_i32_1 = arith.constant 0 : i32
    return %c0_i32, %c0_i32_0 : i32, i32
  }
  func.func @transform_40(%arg0: i32) -> (i32, i32) {
    %c0_i32 = arith.constant 0 : i32
    %c0_i32_0 = arith.constant 0 : i32
    %c0_i32_1 = arith.constant 0 : i32
    return %c0_i32, %c0_i32_0 : i32, i32
  }
  func.func @transform_41(%arg0: i32) -> (i32, i32) {
    %c0_i32 = arith.constant 0 : i32
    %c0_i32_0 = arith.constant 0 : i32
    %c0_i32_1 = arith.constant 0 : i32
    return %c0_i32, %c0_i32_0 : i32, i32
  }
  func.func @transform_42(%arg0: i32) -> (i32, i32) {
    %c0_i32 = arith.constant 0 : i32
    %c0_i32_0 = arith.constant 0 : i32
    %c0_i32_1 = arith.constant 0 : i32
    return %c0_i32, %c0_i32_0 : i32, i32
  }
  func.func @transform_43(%arg0: i32) -> (i32, i32) {
    %c0_i32 = arith.constant 0 : i32
    %c0_i32_0 = arith.constant 0 : i32
    %c0_i32_1 = arith.constant 0 : i32
    return %c0_i32, %c0_i32_0 : i32, i32
  }
  func.func @transform_44(%arg0: i32) -> (i32, i32) {
    %c0_i32 = arith.constant 0 : i32
    %c0_i32_0 = arith.constant 0 : i32
    %c0_i32_1 = arith.constant 0 : i32
    return %c0_i32, %c0_i32_0 : i32, i32
  }
  func.func @transform_45(%arg0: i32) -> (i32, i32) {
    %c0_i32 = arith.constant 0 : i32
    %c0_i32_0 = arith.constant 0 : i32
    %c0_i32_1 = arith.constant 0 : i32
    return %c0_i32, %c0_i32_0 : i32, i32
  }
  func.func @transform_46(%arg0: i32) -> (i32, i32) {
    %c0_i32 = arith.constant 0 : i32
    %c0_i32_0 = arith.constant 0 : i32
    %c0_i32_1 = arith.constant 0 : i32
    return %c0_i32, %c0_i32_0 : i32, i32
  }
  func.func @transform_47(%arg0: i32) -> (i32, i32) {
    %c0_i32 = arith.constant 0 : i32
    %c0_i32_0 = arith.constant 0 : i32
    %c0_i32_1 = arith.constant 0 : i32
    return %c0_i32, %c0_i32_0 : i32, i32
  }
  func.func @transform_48(%arg0: i32) -> (i32, i32) {
    %c0_i32 = arith.constant 0 : i32
    %c0_i32_0 = arith.constant 0 : i32
    %c0_i32_1 = arith.constant 0 : i32
    return %c0_i32, %c0_i32_0 : i32, i32
  }
  func.func @transform_49(%arg0: i32) -> (i32, i32) {
    %c0_i32 = arith.constant 0 : i32
    %c0_i32_0 = arith.constant 0 : i32
    %c0_i32_1 = arith.constant 0 : i32
    return %c0_i32, %c0_i32_0 : i32, i32
  }
  func.func @transform_50(%arg0: i32) -> (i32, i32) {
    %c0_i32 = arith.constant 0 : i32
    %c0_i32_0 = arith.constant 0 : i32
    %c0_i32_1 = arith.constant 0 : i32
    return %c0_i32, %c0_i32_0 : i32, i32
  }
  func.func @transform_51(%arg0: i32) -> (i32, i32) {
    %c0_i32 = arith.constant 0 : i32
    %c0_i32_0 = arith.constant 0 : i32
    %c0_i32_1 = arith.constant 0 : i32
    return %c0_i32, %c0_i32_0 : i32, i32
  }
  func.func @transform_52(%arg0: i32) -> (i32, i32) {
    %c0_i32 = arith.constant 0 : i32
    %c0_i32_0 = arith.constant 0 : i32
    %c0_i32_1 = arith.constant 0 : i32
    return %c0_i32, %c0_i32_0 : i32, i32
  }
  func.func @transform_53(%arg0: i32) -> (i32, i32) {
    %c0_i32 = arith.constant 0 : i32
    %c0_i32_0 = arith.constant 0 : i32
    %c0_i32_1 = arith.constant 0 : i32
    return %c0_i32, %c0_i32_0 : i32, i32
  }
  func.func @transform_54(%arg0: i32) -> (i32, i32) {
    %c0_i32 = arith.constant 0 : i32
    %c0_i32_0 = arith.constant 0 : i32
    %c0_i32_1 = arith.constant 0 : i32
    return %c0_i32, %c0_i32_0 : i32, i32
  }
  func.func @transform_55(%arg0: i32) -> (i32, i32) {
    %c0_i32 = arith.constant 0 : i32
    %c0_i32_0 = arith.constant 0 : i32
    %c0_i32_1 = arith.constant 0 : i32
    return %c0_i32, %c0_i32_0 : i32, i32
  }
  func.func @transform_56(%arg0: i32) -> (i32, i32) {
    %c0_i32 = arith.constant 0 : i32
    %c0_i32_0 = arith.constant 0 : i32
    %c0_i32_1 = arith.constant 0 : i32
    return %c0_i32, %c0_i32_0 : i32, i32
  }
  func.func @transform_57(%arg0: i32) -> (i32, i32, i32) {
    %c0_i32 = arith.constant 0 : i32
    %c0_i32_0 = arith.constant 0 : i32
    %c0_i32_1 = arith.constant 0 : i32
    return %arg0, %c0_i32, %c0_i32_0 : i32, i32, i32
  }
}

</mosaic_0001>

<bundles_post_ra>
// kernel: captioning_forward.1
= control target key start
LH: loop header
LB: loop body
LE: loop exit
PB: predicated region body
PF: predicated region fallthrough
CT: control target
= control target key end

     0   :  { %s5615_s6 = smov 1   ;;  %s5616_s10 = smov 2   ;;  %s6817_s0 = inlined_call_operand.smem [shape: u32[58], index: -1, kind: input, shape index: {}] }
   0x1   :  { %s5708_s5 = sld [smem:[%s6817_s0]]   ;;  %s5617_s14 = smov 3  }
   0x2   :  { %s5713_s9 = sld [smem:[%s6817_s0 + %s5615_s6]]   ;;  %s5618_s18 = smov 4  }
   0x3   :  { %s5718_s13 = sld [smem:[%s6817_s0 + %s5616_s10]]   ;;  %s5619_s22 = smov 5  }
   0x4   :  { %s5723_s17 = sld [smem:[%s6817_s0 + %s5617_s14]]   ;;  %s5620_s26 = smov 6  }
   0x5   :  { %s5728_s21 = sld [smem:[%s6817_s0 + %s5618_s18]]   ;;  %s5621_s30 = smov 7  }
   0x6   :  { %s5733_s25 = sld [smem:[%s6817_s0 + %s5619_s22]]   ;;  %s5622_s4 = smov 8  }
   0x7   :  { %6885 = sst [smem:[#allocation39_spill]] %s5708_s5  ;;  %s5623_s10 = smov 9  }
   0x8   :  { %6886 = sst [smem:[#allocation40_spill]] %s5713_s9  ;;  %s5624_s15 = smov 10  }
   0x9   :  { %6887 = sst [smem:[#allocation41_spill]] %s5718_s13  ;;  %s5625_s20 = smov 11  }
   0xa   :  { %6888 = sst [smem:[#allocation42_spill]] %s5723_s17  ;;  %s5627_s1 = smov 13  }
   0xb   :  { %6889 = sst [smem:[#allocation43_spill]] %s5728_s21  ;;  %s5628_s7 = smov 14  }
   0xc   :  { %6890 = sst [smem:[#allocation44_spill]] %s5733_s25  ;;  %s5630_s22 = smov 16  }
   0xd   :  { %s5738_s29 = sld [smem:[%s6817_s0 + %s5620_s26]]   ;;  %s5626_s26 = smov 12  }
   0xe   :  { %s5743_s3 = sld [smem:[%s6817_s0 + %s5621_s30]]   ;;  %s5631_s28 = smov 17  }
   0xf   :  { %s5748_s8 = sld [smem:[%s6817_s0 + %s5622_s4]]  }
  0x10   :  { %s5753_s14 = sld [smem:[%s6817_s0 + %s5623_s10]]  }
  0x11   :  { %s5758_s19 = sld [smem:[%s6817_s0 + %s5624_s15]]   ;;  %s5629_s15 = smov 15  }
  0x12   :  { %s5763_s24 = sld [smem:[%s6817_s0 + %s5625_s20]]  }
  0x13   :  { %6891 = sst [smem:[#allocation45_spill]] %s5738_s29 }
  0x14   :  { %6892 = sst [smem:[#allocation46_spill]] %s5743_s3 }
  0x15   :  { %6893 = sst [smem:[#allocation47_spill]] %s5748_s8 }
  0x16   :  { %6894 = sst [smem:[#allocation48_spill]] %s5753_s14 }
  0x17   :  { %6895 = sst [smem:[#allocation49_spill]] %s5758_s19 }
  0x18   :  { %6896 = sst [smem:[#allocation50_spill]] %s5763_s24 }
  0x19   :  { %s5768_s30 = sld [smem:[%s6817_s0 + %s5626_s26]]  }
  0x1a   :  { %s5773_s6 = sld [smem:[%s6817_s0 + %s5627_s1]]  }
  0x1b   :  { %s5778_s12 = sld [smem:[%s6817_s0 + %s5628_s7]]   ;;  %s5632_s7 = smov 18  }
  0x1c   :  { %s5783_s20 = sld [smem:[%s6817_s0 + %s5629_s15]]   ;;  %s5633_s15 = smov 19  }
  0x1d   :  { %s5788_s27 = sld [smem:[%s6817_s0 + %s5630_s22]]   ;;  %s5634_s22 = smov 20  }
  0x1e   :  { %s5793_s4 = sld [smem:[%s6817_s0 + %s5631_s28]]   ;;  %s5635_s28 = smov 21  }
  0x1f   :  { %6897 = sst [smem:[#allocation51_spill]] %s5768_s30 }
  0x20   :  { %6898 = sst [smem:[#allocation52_spill]] %s5773_s6 }
  0x21   :  { %6899 = sst [smem:[#allocation53_spill]] %s5778_s12 }
  0x22   :  { %6900 = sst [smem:[#allocation54_spill]] %s5783_s20 }
  0x23   :  { %6901 = sst [smem:[#allocation55_spill]] %s5788_s27 }
  0x24   :  { %6902 = sst [smem:[#allocation56_spill]] %s5793_s4 }
  0x25   :  { %s5798_s12 = sld [smem:[%s6817_s0 + %s5632_s7]]   ;;  %s5636_s7 = smov 22  }
  0x26   :  { %s5803_s20 = sld [smem:[%s6817_s0 + %s5633_s15]]   ;;  %s5637_s15 = smov 23  }
  0x27   :  { %s5808_s27 = sld [smem:[%s6817_s0 + %s5634_s22]]   ;;  %s5638_s22 = smov 24  }
  0x28   :  { %s5813_s4 = sld [smem:[%s6817_s0 + %s5635_s28]]   ;;  %s5639_s28 = smov 25  }
  0x2b   :  { %6903 = sst [smem:[#allocation57_spill]] %s5798_s12 }
  0x2c   :  { %6904 = sst [smem:[#allocation58_spill]] %s5803_s20 }
  0x2d   :  { %6905 = sst [smem:[#allocation59_spill]] %s5808_s27 }
  0x2e   :  { %6906 = sst [smem:[#allocation60_spill]] %s5813_s4 }
  0x2f   :  { %s5818_s12 = sld [smem:[%s6817_s0 + %s5636_s7]]   ;;  %s5640_s7 = smov 26  }
  0x30   :  { %s5823_s20 = sld [smem:[%s6817_s0 + %s5637_s15]]   ;;  %s5641_s15 = smov 27  }
  0x31   :  { %s5828_s27 = sld [smem:[%s6817_s0 + %s5638_s22]]   ;;  %s5642_s22 = smov 28  }
  0x32   :  { %s5833_s4 = sld [smem:[%s6817_s0 + %s5639_s28]]   ;;  %s5643_s28 = smov 29  }
  0x35   :  { %6907 = sst [smem:[#allocation61_spill]] %s5818_s12 }
  0x36   :  { %6908 = sst [smem:[#allocation62_spill]] %s5823_s20 }
  0x37   :  { %6909 = sst [smem:[#allocation63_spill]] %s5828_s27 }
  0x38   :  { %6910 = sst [smem:[#allocation64_spill]] %s5833_s4 }
  0x39   :  { %s5838_s12 = sld [smem:[%s6817_s0 + %s5640_s7]]   ;;  %s5644_s7 = smov 30  }
  0x3a   :  { %s5843_s20 = sld [smem:[%s6817_s0 + %s5641_s15]]   ;;  %s5645_s15 = smov 31  }
  0x3b   :  { %s5848_s27 = sld [smem:[%s6817_s0 + %s5642_s22]]   ;;  %s5646_s22 = smov 32  }
  0x3c   :  { %s5853_s4 = sld [smem:[%s6817_s0 + %s5643_s28]]   ;;  %s5647_s28 = smov 33  }
  0x3f   :  { %6911 = sst [smem:[#allocation65_spill]] %s5838_s12 }
  0x40   :  { %6912 = sst [smem:[#allocation66_spill]] %s5843_s20 }
  0x41   :  { %6913 = sst [smem:[#allocation67_spill]] %s5848_s27 }
  0x42   :  { %6914 = sst [smem:[#allocation68_spill]] %s5853_s4 }
  0x43   :  { %s5858_s12 = sld [smem:[%s6817_s0 + %s5644_s7]]   ;;  %s5648_s7 = smov 34  }
  0x44   :  { %s5863_s20 = sld [smem:[%s6817_s0 + %s5645_s15]]   ;;  %s5649_s15 = smov 35  }
  0x45   :  { %s5868_s27 = sld [smem:[%s6817_s0 + %s5646_s22]]   ;;  %s5650_s22 = smov 36  }
  0x46   :  { %s5873_s4 = sld [smem:[%s6817_s0 + %s5647_s28]]   ;;  %s5651_s28 = smov 37  }
  0x47   :  { %s5893_s30 = sld [smem:[%s6817_s0 + %s5651_s28]]   ;;  %s5655_s28 = smov 41  }
  0x48   :  { %s5913_s6 = sld [smem:[%s6817_s0 + %s5655_s28]]   ;;  %s5659_s28 = smov 45  }
  0x49   :  { %6915 = sst [smem:[#allocation69_spill]] %s5858_s12 }
  0x4a   :  { %6916 = sst [smem:[#allocation70_spill]] %s5863_s20 }
  0x4b   :  { %6917 = sst [smem:[#allocation71_spill]] %s5868_s27 }
  0x4c   :  { %6918 = sst [smem:[#allocation72_spill]] %s5873_s4 }
  0x4d   :  { %s5878_s12 = sld [smem:[%s6817_s0 + %s5648_s7]]   ;;  %s5652_s7 = smov 38  }
  0x4e   :  { %s5883_s20 = sld [smem:[%s6817_s0 + %s5649_s15]]   ;;  %s5653_s15 = smov 39  }
  0x4f   :  { %s5888_s27 = sld [smem:[%s6817_s0 + %s5650_s22]]   ;;  %s5654_s22 = smov 40  }
  0x50   :  { %s5903_s19 = sld [smem:[%s6817_s0 + %s5653_s15]]   ;;  %s5657_s15 = smov 43  }
  0x51   :  { %s5908_s14 = sld [smem:[%s6817_s0 + %s5654_s22]]   ;;  %s5658_s22 = smov 44  }
  0x52   :  { %6922 = sst [smem:[#allocation76_spill]] %s5913_s6 }
  0x53   :  { %6919 = sst [smem:[#allocation73_spill]] %s5878_s12 }
  0x54   :  { %s5898_s12 = sld [smem:[%s6817_s0 + %s5652_s7]]   ;;  %s5656_s7 = smov 42  }
  0x55   :  { %s5923_s24 = sld [smem:[%s6817_s0 + %s5657_s15]]   ;;  %s5661_s15 = smov 47  }
  0x56   :  { %s5933_s8 = sld [smem:[%s6817_s0 + %s5659_s28]]   ;;  %s5663_s28 = smov 49  }
  0x57   :  { %6921 = sst [smem:[#allocation75_spill]] %s5908_s14 }
  0x58   :  { %s5928_s14 = sld [smem:[%s6817_s0 + %s5658_s22]]   ;;  %s5662_s22 = smov 48  }
  0x59   :  { %s5943_s29 = sld [smem:[%s6817_s0 + %s5661_s15]]   ;;  %s5665_s15 = smov 51  }
  0x5a   :  { %6920 = sst [smem:[#allocation74_spill]] %s5898_s12 }
  0x5b   :  { %s5918_s12 = sld [smem:[%s6817_s0 + %s5656_s7]]   ;;  %s5660_s7 = smov 46  }
  0x5c   :  { %6925 = sst [smem:[#allocation79_spill]] %s5933_s8 }
  0x5d   :  { %s5938_s3 = sld [smem:[%s6817_s0 + %s5660_s7]]   ;;  %s5664_s7 = smov 50  }
  0x5e   :  { %6924 = sst [smem:[#allocation78_spill]] %s5928_s14 }
  0x5f   :  { %s5948_s14 = sld [smem:[%s6817_s0 + %s5662_s22]]   ;;  %s5666_s22 = smov 52  }
  0x60   :  { %s5953_s21 = sld [smem:[%s6817_s0 + %s5663_s28]]   ;;  %s5667_s28 = smov 53  }
  0x61   :  { %6923 = sst [smem:[#allocation77_spill]] %s5918_s12 }
  0x62   :  { %s5963_s17 = sld [smem:[%s6817_s0 + %s5665_s15]]   ;;  %s5669_s15 = smov 55  }
  0x63   :  { %6926 = sst [smem:[#allocation80_spill]] %s5938_s3 }
  0x64   :  { %s5958_s3 = sld [smem:[%s6817_s0 + %s5664_s7]]   ;;  %s5668_s7 = smov 54  }
  0x65   :  { %s5968_s25 = sld [smem:[%s6817_s0 + %s5666_s22]]   ;;  %s5670_s22 = smov 56  }
  0x66   :  { %s5973_s13 = sld [smem:[%s6817_s0 + %s5667_s28]]   ;;  %s5671_s28 = smov 57  }
  0x67   :  { %s5983_s5 = sld [smem:[%s6817_s0 + %s5669_s15]]  }
  0x68   :  { %s5993_s9 = sld [smem:[%s6817_s0 + %s5671_s28]]  }
  0x6a   :  { %6927 = sst [smem:[#allocation81_spill]] %s5958_s3 }
  0x6b   :  { %6928 = sst [smem:[#allocation82_spill]] %s5968_s25 }
  0x6c   :  { %6929 = sst [smem:[#allocation83_spill]] %s5973_s13 }
  0x6d   :  { %s5978_s3 = sld [smem:[%s6817_s0 + %s5668_s7]]  }
  0x6e   :  { %6931 = sst [smem:[#allocation85_spill]] %s5983_s5 }
  0x6f   :  { %s5988_s25 = sld [smem:[%s6817_s0 + %s5670_s22]]  }
  0x70   :  { %6932 = sst [smem:[#allocation86_spill]] %s5993_s9 }
  0x73   :  { %6930 = sst [smem:[#allocation84_spill]] %s5978_s3 }
  0x74   :  { %120 = vsyncpa [#allocation3], 0 }
  0x75   :  { %121 = vsyncpa [#allocation6], 0 }
  0x76   :  { %122 = vsyncpa [#allocation9], 0 }
  0x77   :  { %123 = vsyncpa [#allocation12], 0 }
  0x78   :  { %124 = vsyncpa [#allocation15], 0 }
  0x79   :  { %125 = vsyncpa [#allocation18], 0 }
  0x7a   :  { %126 = vsyncpa [#allocation21], 0 }
  0x7b   :  { %127 = vsyncpa [#allocation24], 0 }
  0x7c   :  { %128 = vsyncpa [#allocation27], 0 }
  0x7d   :  { %129 = vsyncpa [#allocation4], 0 }
  0x7e   :  { %131 = vsyncpa [#allocation4 + $0x1], 0  ;;  %s5995_s7 = smov 0   ;;  %s5997_s10 = smov 0  }
  0x7f   :  { %s5999_s11 = smov 0   ;;  %s6001_s15 = smov 0  }
  0x80 LB: > { %s6933_s13 = sld [smem:[#allocation83_spill]]  ;;  %s6016_s0 = sadd.s32 4294967295, %s5613_s15   ;;  %s5609_s11 = sphi %s5999_s11, %s7022_s11   ;;  %s5605_s10 = sphi %s5997_s10, %s7021_s10   ;;  %s5601_s7 = sphi %s5995_s7, %s7020_s7   ;;  %s5613_s15 = sphi %s6001_s15, %s7019_s15  }
  0x81   : > { %s6934_s12 = sld [smem:[#allocation77_spill]]  ;;  %s4518_s16 = sadd.s32 4294967294, %s5613_s15  }
  0x82   : > { %s6935_s8 = sld [smem:[#allocation79_spill]]  ;;  %s6020_s18 = sadd.s32 1, %s5613_s15  }
  0x83   : > { %s6936_s6 = sld [smem:[#allocation76_spill]]  ;;  %s1346_s22 = sadd.s32 1, %s5609_s11 }
  0x84   : > { %s6937_s5 = sld [smem:[#allocation85_spill]]  ;;  %s1343_s23 = ssub.s32 %s5613_s15, %s6020_s18 }
  0x85   : > { %s6938_s4 = sld [smem:[#allocation72_spill]]  ;;  %p1356_p0 = scmp.ne.s32.totalorder %s5609_s11, %s5605_s10 }
  0x86   : > { %s6939_s3 = sld [smem:[#allocation84_spill]]  ;;  %p1344_p1 = scmp.eq.s32.totalorder %s1343_s23, 0 }
  0x87   : > { %6940 = sst [smem:[#allocation87_spill]] %s5601_s7  ;;  %p1357_p2 = scmp.eq.s32.totalorder %s6016_s0, 1 }
  0x88   : > { %6941 = sst [smem:[#allocation88_spill]] %s5605_s10  ;;  %p1362_p3 = scmp.ne.s32.totalorder %s5605_s10, %s5601_s7 }
  0x89   : > { %6942 = sst [smem:[#allocation89_spill]] %s5609_s11  ;;  %p1363_p4 = scmp.eq.s32.totalorder %s4518_s16, 1 }
  0x8a   : > { %6943 = sst [smem:[#allocation90_spill]] %s5613_s15  ;;  %p6033_p5 = por %p1357_p2, %p1356_p0 }
  0x8b   : > { %6944 = sst [smem:[#allocation91_spill]] %s6020_s18  ;;  %p6037_p6 = por %p1363_p4, %p1362_p3 }
  0x8c   : > { %s6031_s26 = scalar_select %p1344_p1, %s5609_s11, %s1346_s22  }
  0x8d   : > { %s6946_s28 = scalar_select %p6033_p5, 1, 0 }
  0x8e   : > { %6945 = sst [smem:[#allocation92_spill]] %s6031_s26  ;;  %p4519_p7 = scmp.ge.s32.totalorder %s5613_s15, 1 }
  0x8f   : > { %6947 = sst [smem:[#allocation93_spill]] %s6946_s28  ;;  %p1370_p8 = scmp.lt.s32.totalorder %s5613_s15, 3 }
  0x90   : > { %s6948_s1 = scalar_select %p6037_p6, 1, 0 }
  0x91   : > { %p4755_p9 = scmp.eq.s32.totalorder %s6016_s0, 0  ;;  %p6044_p10 = pnand %p4519_p7, %p1370_p8 }
  0x92   : > { %6949 = sst [smem:[#allocation94_spill]] %s6948_s1  ;;  %s1493_s16 = sshll.u32 %s5883_s20, 4  ;;  %s1494_s16 = int_to_ptr.hbm [resolvable:$true] %s1493_s16 }
  0x93   : > { %p4702_p11 = pneg %p6044_p10  ;;  %s5672_s22 = smov [#allocation5]  }
  0x94   : > { %s1495_s23 = sshll.u32 %s5672_s22, 4  ;;  %s1517_s26 = sshll.u32 %s5893_s30, 4  ;;  %s1496_s23 = int_to_ptr.vmem [resolvable:$true] %s1495_s23  ;;  %s6058_s26 = int_to_ptr.hbm [resolvable:$true] %s1517_s26 }
  0x95   : > { %p6054_p12 = pnand %p4755_p9, %p4702_p11  ;;  %s1547_s18 = sshll.u32 %s6936_s6, 4  ;;  %s6076_s18 = int_to_ptr.hbm [resolvable:$true] %s1547_s18 }
  0x96   : > { %s5673_s1 = smov [#allocation8]   ;;  %s5035_s15 = sshra.s32 %s1494_s16, 4  ;;  %s5036_s15 = int_to_ptr.hbm [resolvable:$true] %s5035_s15 }
  0x97   : > { %s6061_s7 = sshll.u32 %s5673_s1, 4  ;;  %s5037_s28 = scalar_lea.hbm %s5036_s15, 1  ;;  %s1520_s7 = int_to_ptr.vmem [resolvable:$true] %s6061_s7 }
  0x98   : > { %p5038_p13 = scmp.ne.s32.totalorder %s5036_s15, %s5037_s28  ;;  %p6065_p0 = pneg %p6054_p12 }
  0x99   : > { %s5042_s9 = scalar_lea.hbm %s5883_s20, 1  ;;  %p5043_p3 = scmp.lt.s32.totalorder %s5036_s15, %s5883_s20 }
  0x9a   : > { %p5040_p1 = pnand %p6065_p0, %p5038_p13  ;;  %p5044_p4 = scmp.lt.s32.totalorder %s5042_s9, %s5037_s28 }
  0x9c   : > { %p5041_p2 = pneg %p5040_p1  ;;  %p5045_p7 = por %p5044_p4, %p5043_p3 }
  0x9e   : > { %p5046_p8 = pnand %p5045_p7, %p5041_p2 }
  0xa0   : > { %5049 = shalt.err (!%p5046_p8)
}
  0xa1   : > { %4708 = dma.hbm_to_vmem [thread:$0]  (!%p6054_p12), %s1494_s16, 16, %s1496_s23, [#allocation6]  }
  0xa2   : > { %s5065_s1 = sshra.s32 %s6058_s26, 4  ;;  %s5072_s9 = scalar_lea.hbm %s5893_s30, 1  ;;  %s5066_s1 = int_to_ptr.hbm [resolvable:$true] %s5065_s1 }
  0xa3   : > { %s5067_s10 = scalar_lea.hbm %s5066_s1, 1  ;;  %p5073_p2 = scmp.lt.s32.totalorder %s5066_s1, %s5893_s30 }
  0xa4   : > { %p5068_p11 = scmp.ne.s32.totalorder %s5066_s1, %s5067_s10  ;;  %p5074_p3 = scmp.lt.s32.totalorder %s5072_s9, %s5067_s10 }
  0xa6   : > { %p5070_p13 = pnand %p5068_p11, %p6065_p0  ;;  %p5075_p4 = por %p5074_p3, %p5073_p2 }
  0xa8   : > { %p5071_p1 = pneg %p5070_p13 }
  0xaa   : > { %p5076_p7 = pnand %p5075_p4, %p5071_p1 }
  0xac   : > { %5079 = shalt.err (!%p5076_p7)
}
  0xad   : > { %4714 = dma.hbm_to_vmem [thread:$0]  (!%p6054_p12), %s6058_s26, 16, %s1520_s7, [#allocation9]  }
  0xae   : > { %s1571_s15 = sshll.u32 %s5923_s24, 4  ;;  %s5674_s28 = smov [#allocation11]   ;;  %s6087_s15 = int_to_ptr.hbm [resolvable:$true] %s1571_s15 }
  0xaf   : > { %s1549_s16 = sshll.u32 %s5674_s28, 4  ;;  %s5095_s23 = sshra.s32 %s6076_s18, 4  ;;  %s1550_s16 = int_to_ptr.vmem [resolvable:$true] %s1549_s16  ;;  %s5096_s23 = int_to_ptr.hbm [resolvable:$true] %s5095_s23 }
  0xb0   : > { %s5097_s10 = scalar_lea.hbm %s5096_s23, 1  ;;  %s5102_s1 = scalar_lea.hbm %s6936_s6, 1 }
  0xb1   : > { %p5098_p8 = scmp.ne.s32.totalorder %s5096_s23, %s5097_s10  ;;  %p5103_p1 = scmp.lt.s32.totalorder %s5096_s23, %s6936_s6 }
  0xb2   : > { %p5104_p2 = scmp.lt.s32.totalorder %s5102_s1, %s5097_s10 }
  0xb3   : > { %p5100_p11 = pnand %p5098_p8, %p6065_p0 }
  0xb4   : > { %p5105_p3 = por %p5104_p2, %p5103_p1 }
  0xb5   : > { %p5101_p13 = pneg %p5100_p11 }
  0xb7   : > { %p5106_p4 = pnand %p5105_p3, %p5101_p13 }
  0xb9   : > { %5109 = shalt.err (!%p5106_p4)
}
  0xba   : > { %4720 = dma.hbm_to_vmem [thread:$0]  (!%p6054_p12), %s6076_s18, 16, %s1550_s16, [#allocation12]  }
  0xbb   : > { %s5675_s7 = smov [#allocation14]   ;;  %s1601_s9 = sshll.u32 %s5943_s29, 4  ;;  %s6098_s9 = int_to_ptr.hbm [resolvable:$true] %s1601_s9 }
  0xbc   : > { %s1573_s26 = sshll.u32 %s5675_s7, 4  ;;  %s5125_s28 = sshra.s32 %s6087_s15, 4  ;;  %s1574_s26 = int_to_ptr.vmem [resolvable:$true] %s1573_s26  ;;  %s5126_s28 = int_to_ptr.hbm [resolvable:$true] %s5125_s28 }
  0xbd   : > { %s5127_s23 = scalar_lea.hbm %s5126_s28, 1  ;;  %s5132_s10 = scalar_lea.hbm %s5923_s24, 1 }
  0xbe   : > { %p5128_p7 = scmp.ne.s32.totalorder %s5126_s28, %s5127_s23  ;;  %p5133_p13 = scmp.lt.s32.totalorder %s5126_s28, %s5923_s24 }
  0xbf   : > { %p5134_p1 = scmp.lt.s32.totalorder %s5132_s10, %s5127_s23 }
  0xc0   : > { %p5130_p8 = pnand %p5128_p7, %p6065_p0 }
  0xc1   : > { %p5135_p2 = por %p5134_p1, %p5133_p13 }
  0xc2   : > { %p5131_p11 = pneg %p5130_p8 }
  0xc4   : > { %p5136_p3 = pnand %p5135_p2, %p5131_p11 }
  0xc6   : > { %5139 = shalt.err (!%p5136_p3)
}
  0xc7   : > { %4726 = dma.hbm_to_vmem [thread:$0]  (!%p6054_p12), %s6087_s15, 16, %s1574_s26, [#allocation15]  }
  0xc8   : > { %s1625_s18 = sshll.u32 %s5953_s21, 4  ;;  %s5676_s16 = smov [#allocation17]   ;;  %s6109_s18 = int_to_ptr.hbm [resolvable:$true] %s1625_s18 }
  0xc9   : > { %s1603_s1 = sshll.u32 %s5676_s16, 4  ;;  %s5155_s7 = sshra.s32 %s6098_s9, 4  ;;  %s1604_s1 = int_to_ptr.vmem [resolvable:$true] %s1603_s1  ;;  %s5156_s7 = int_to_ptr.hbm [resolvable:$true] %s5155_s7 }
  0xca   : > { %s5157_s28 = scalar_lea.hbm %s5156_s7, 1  ;;  %s5162_s23 = scalar_lea.hbm %s5943_s29, 1 }
  0xcb   : > { %p5158_p4 = scmp.ne.s32.totalorder %s5156_s7, %s5157_s28  ;;  %p5163_p11 = scmp.lt.s32.totalorder %s5156_s7, %s5943_s29 }
  0xcc   : > { %p5164_p13 = scmp.lt.s32.totalorder %s5162_s23, %s5157_s28 }
  0xcd   : > { %p5160_p7 = pnand %p5158_p4, %p6065_p0 }
  0xce   : > { %p5165_p1 = por %p5164_p13, %p5163_p11 }
  0xcf   : > { %p5161_p8 = pneg %p5160_p7 }
  0xd1   : > { %p5166_p2 = pnand %p5165_p1, %p5161_p8 }
  0xd3   : > { %5169 = shalt.err (!%p5166_p2)
}
  0xd4   : > { %4732 = dma.hbm_to_vmem [thread:$0]  (!%p6054_p12), %s6098_s9, 16, %s1604_s1, [#allocation18]  }
  0xd5   : > { %s5677_s15 = smov [#allocation20]   ;;  %s1655_s10 = sshll.u32 %s6933_s13, 4  ;;  %s6120_s10 = int_to_ptr.hbm [resolvable:$true] %s1655_s10 }
  0xd6   : > { %s1627_s26 = sshll.u32 %s5677_s15, 4  ;;  %s5185_s16 = sshra.s32 %s6109_s18, 4  ;;  %s1628_s26 = int_to_ptr.vmem [resolvable:$true] %s1627_s26  ;;  %s5186_s16 = int_to_ptr.hbm [resolvable:$true] %s5185_s16 }
  0xd7   : > { %s5187_s7 = scalar_lea.hbm %s5186_s16, 1  ;;  %s5192_s28 = scalar_lea.hbm %s5953_s21, 1 }
  0xd8   : > { %p5188_p3 = scmp.ne.s32.totalorder %s5186_s16, %s5187_s7  ;;  %p5193_p8 = scmp.lt.s32.totalorder %s5186_s16, %s5953_s21 }
  0xd9   : > { %p5194_p11 = scmp.lt.s32.totalorder %s5192_s28, %s5187_s7 }
  0xda   : > { %p5190_p4 = pnand %p5188_p3, %p6065_p0 }
  0xdb   : > { %p5195_p13 = por %p5194_p11, %p5193_p8 }
  0xdc   : > { %p5191_p7 = pneg %p5190_p4 }
  0xde   : > { %p5196_p1 = pnand %p5195_p13, %p5191_p7 }
  0xe0   : > { %5199 = shalt.err (!%p5196_p1)
}
  0xe1   : > { %4738 = dma.hbm_to_vmem [thread:$0]  (!%p6054_p12), %s6109_s18, 16, %s1628_s26, [#allocation21]  }
  0xe2   : > { %s1478_s9 = sshll.u32 %s6938_s4, 4  ;;  %s5678_s1 = smov [#allocation23]   ;;  %s6131_s9 = int_to_ptr.hbm [resolvable:$true] %s1478_s9 }
  0xe3   : > { %s1657_s23 = sshll.u32 %s5678_s1, 4  ;;  %s5215_s15 = sshra.s32 %s6120_s10, 4  ;;  %s1658_s23 = int_to_ptr.vmem [resolvable:$true] %s1657_s23  ;;  %s5216_s15 = int_to_ptr.hbm [resolvable:$true] %s5215_s15 }
  0xe4   : > { %s5217_s16 = scalar_lea.hbm %s5216_s15, 1  ;;  %s5222_s7 = scalar_lea.hbm %s6933_s13, 1 }
  0xe5   : > { %p5218_p2 = scmp.ne.s32.totalorder %s5216_s15, %s5217_s16  ;;  %p5223_p7 = scmp.lt.s32.totalorder %s5216_s15, %s6933_s13 }
  0xe6   : > { %p5224_p8 = scmp.lt.s32.totalorder %s5222_s7, %s5217_s16 }
  0xe7   : > { %p5220_p3 = pnand %p5218_p2, %p6065_p0 }
  0xe8   : > { %p5225_p11 = por %p5224_p8, %p5223_p7 }
  0xe9   : > { %p5221_p4 = pneg %p5220_p3 }
  0xeb   : > { %p5226_p13 = pnand %p5225_p11, %p5221_p4 }
  0xed   : > { %5229 = shalt.err (!%p5226_p13)
}
  0xee   : > { %4744 = dma.hbm_to_vmem [thread:$0]  (!%p6054_p12), %s6120_s10, 16, %s1658_s23, [#allocation24]  }
  0xef   : > { %s5679_s18 = smov [#allocation2]   ;;  %s1505_s28 = sshll.u32 %s5888_s27, 4  ;;  %s6142_s28 = int_to_ptr.hbm [resolvable:$true] %s1505_s28 }
  0xf0   : > { %s1480_s26 = sshll.u32 %s5679_s18, 4  ;;  %s5245_s1 = sshra.s32 %s6131_s9, 4  ;;  %s1481_s26 = int_to_ptr.vmem [resolvable:$true] %s1480_s26  ;;  %s5246_s1 = int_to_ptr.hbm [resolvable:$true] %s5245_s1 }
  0xf1   : > { %s5247_s15 = scalar_lea.hbm %s5246_s1, 1  ;;  %s5252_s16 = scalar_lea.hbm %s6938_s4, 1 }
  0xf2   : > { %p5248_p1 = scmp.ne.s32.totalorder %s5246_s1, %s5247_s15  ;;  %p5253_p4 = scmp.lt.s32.totalorder %s5246_s1, %s6938_s4 }
  0xf3   : > { %p5254_p7 = scmp.lt.s32.totalorder %s5252_s16, %s5247_s15 }
  0xf4   : > { %p5250_p2 = pnand %p5248_p1, %p6065_p0 }
  0xf5   : > { %p5255_p8 = por %p5254_p7, %p5253_p4 }
  0xf6   : > { %p5251_p3 = pneg %p5250_p2 }
  0xf8   : > { %p5256_p11 = pnand %p5255_p8, %p5251_p3 }
  0xfa   : > { %5259 = shalt.err (!%p5256_p11)
}
  0xfb   : > { %4705 = dma.hbm_to_vmem [thread:$0]  (!%p6054_p12), %s6131_s9, 16, %s1481_s26, [#allocation3]  }
  0xfc   : > { %s1532_s10 = sshll.u32 %s5903_s19, 4  ;;  %s5680_s23 = smov [#allocation7]   ;;  %s6153_s10 = int_to_ptr.hbm [resolvable:$true] %s1532_s10 }
  0xfd   : > { %s1507_s7 = sshll.u32 %s5680_s23, 4  ;;  %s5275_s18 = sshra.s32 %s6142_s28, 4  ;;  %s1508_s7 = int_to_ptr.vmem [resolvable:$true] %s1507_s7  ;;  %s5276_s18 = int_to_ptr.hbm [resolvable:$true] %s5275_s18 }
  0xfe   : > { %s5277_s1 = scalar_lea.hbm %s5276_s18, 1  ;;  %s5282_s15 = scalar_lea.hbm %s5888_s27, 1 }
  0xff   : > { %p5278_p13 = scmp.ne.s32.totalorder %s5276_s18, %s5277_s1  ;;  %p5283_p3 = scmp.lt.s32.totalorder %s5276_s18, %s5888_s27 }
 0x100   : > { %p5284_p4 = scmp.lt.s32.totalorder %s5282_s15, %s5277_s1 }
 0x101   : > { %p5280_p1 = pnand %p5278_p13, %p6065_p0 }
 0x102   : > { %p5285_p7 = por %p5284_p4, %p5283_p3 }
 0x103   : > { %p5281_p2 = pneg %p5280_p1 }
 0x105   : > { %p5286_p8 = pnand %p5285_p7, %p5281_p2 }
 0x107   : > { %5289 = shalt.err (!%p5286_p8)
}
 0x108   : > { %4711 = dma.hbm_to_vmem [thread:$0]  (!%p6054_p12), %s6142_s28, 16, %s1508_s7, [#allocation6]  }
 0x109   : > { %s5681_s9 = smov [#allocation10]   ;;  %s1559_s16 = sshll.u32 %s6934_s12, 4  ;;  %s6164_s16 = int_to_ptr.hbm [resolvable:$true] %s1559_s16 }
 0x10a   : > { %s1534_s26 = sshll.u32 %s5681_s9, 4  ;;  %s5305_s23 = sshra.s32 %s6153_s10, 4  ;;  %s1535_s26 = int_to_ptr.vmem [resolvable:$true] %s1534_s26  ;;  %s5306_s23 = int_to_ptr.hbm [resolvable:$true] %s5305_s23 }
 0x10b   : > { %s5307_s18 = scalar_lea.hbm %s5306_s23, 1  ;;  %s5312_s1 = scalar_lea.hbm %s5903_s19, 1 }
 0x10c   : > { %p5308_p11 = scmp.ne.s32.totalorder %s5306_s23, %s5307_s18  ;;  %p5313_p2 = scmp.lt.s32.totalorder %s5306_s23, %s5903_s19 }
 0x10d   : > { %p5314_p3 = scmp.lt.s32.totalorder %s5312_s1, %s5307_s18 }
 0x10e   : > { %p5310_p13 = pnand %p5308_p11, %p6065_p0 }
 0x10f   : > { %p5315_p4 = por %p5314_p3, %p5313_p2 }
 0x110   : > { %p5311_p1 = pneg %p5310_p13 }
 0x112   : > { %p5316_p7 = pnand %p5315_p4, %p5311_p1 }
 0x114   : > { %5319 = shalt.err (!%p5316_p7)
}
 0x115   : > { %4717 = dma.hbm_to_vmem [thread:$0]  (!%p6054_p12), %s6153_s10, 16, %s1535_s26, [#allocation9]  }
 0x116   : > { %s1586_s28 = sshll.u32 %s6935_s8, 4  ;;  %s5682_s7 = smov [#allocation13]   ;;  %s6175_s28 = int_to_ptr.hbm [resolvable:$true] %s1586_s28 }
 0x117   : > { %s1561_s15 = sshll.u32 %s5682_s7, 4  ;;  %s5335_s9 = sshra.s32 %s6164_s16, 4  ;;  %s1562_s15 = int_to_ptr.vmem [resolvable:$true] %s1561_s15  ;;  %s5336_s9 = int_to_ptr.hbm [resolvable:$true] %s5335_s9 }
 0x118   : > { %s5337_s23 = scalar_lea.hbm %s5336_s9, 1  ;;  %s5342_s18 = scalar_lea.hbm %s6934_s12, 1 }
 0x119   : > { %p5338_p8 = scmp.ne.s32.totalorder %s5336_s9, %s5337_s23  ;;  %p5343_p1 = scmp.lt.s32.totalorder %s5336_s9, %s6934_s12 }
 0x11a   : > { %p5344_p2 = scmp.lt.s32.totalorder %s5342_s18, %s5337_s23 }
 0x11b   : > { %p5340_p11 = pnand %p5338_p8, %p6065_p0 }
 0x11c   : > { %p5345_p3 = por %p5344_p2, %p5343_p1 }
 0x11d   : > { %p5341_p13 = pneg %p5340_p11 }
 0x11f   : > { %p5346_p4 = pnand %p5345_p3, %p5341_p13 }
 0x121   : > { %5349 = shalt.err (!%p5346_p4)
}
 0x122   : > { %4723 = dma.hbm_to_vmem [thread:$0]  (!%p6054_p12), %s6164_s16, 16, %s1562_s15, [#allocation12]  }
 0x123   : > { %s5683_s10 = smov [#allocation16]   ;;  %s1613_s1 = sshll.u32 %s5948_s14, 4  ;;  %s6186_s1 = int_to_ptr.hbm [resolvable:$true] %s1613_s1 }
 0x124   : > { %s1588_s26 = sshll.u32 %s5683_s10, 4  ;;  %s5365_s7 = sshra.s32 %s6175_s28, 4  ;;  %s1589_s26 = int_to_ptr.vmem [resolvable:$true] %s1588_s26  ;;  %s5366_s7 = int_to_ptr.hbm [resolvable:$true] %s5365_s7 }
 0x125   : > { %s5367_s9 = scalar_lea.hbm %s5366_s7, 1  ;;  %s5372_s23 = scalar_lea.hbm %s6935_s8, 1 }
 0x126   : > { %p5368_p7 = scmp.ne.s32.totalorder %s5366_s7, %s5367_s9  ;;  %p5373_p13 = scmp.lt.s32.totalorder %s5366_s7, %s6935_s8 }
 0x127   : > { %p5374_p1 = scmp.lt.s32.totalorder %s5372_s23, %s5367_s9 }
 0x128   : > { %p5370_p8 = pnand %p5368_p7, %p6065_p0 }
 0x129   : > { %p5375_p2 = por %p5374_p1, %p5373_p13 }
 0x12a   : > { %p5371_p11 = pneg %p5370_p8 }
 0x12c   : > { %p5376_p3 = pnand %p5375_p2, %p5371_p11 }
 0x12e   : > { %5379 = shalt.err (!%p5376_p3)
}
 0x12f   : > { %4729 = dma.hbm_to_vmem [thread:$0]  (!%p6054_p12), %s6175_s28, 16, %s1589_s26, [#allocation15]  }
 0x130   : > { %s1640_s16 = sshll.u32 %s5963_s17, 4  ;;  %s5684_s15 = smov [#allocation19]   ;;  %s6197_s16 = int_to_ptr.hbm [resolvable:$true] %s1640_s16 }
 0x131   : > { %s1615_s18 = sshll.u32 %s5684_s15, 4  ;;  %s5395_s10 = sshra.s32 %s6186_s1, 4  ;;  %s1616_s18 = int_to_ptr.vmem [resolvable:$true] %s1615_s18  ;;  %s5396_s10 = int_to_ptr.hbm [resolvable:$true] %s5395_s10 }
 0x132   : > { %s5397_s7 = scalar_lea.hbm %s5396_s10, 1  ;;  %s5402_s9 = scalar_lea.hbm %s5948_s14, 1 }
 0x133   : > { %p5398_p4 = scmp.ne.s32.totalorder %s5396_s10, %s5397_s7  ;;  %p5403_p11 = scmp.lt.s32.totalorder %s5396_s10, %s5948_s14 }
 0x134   : > { %p5404_p13 = scmp.lt.s32.totalorder %s5402_s9, %s5397_s7 }
 0x135   : > { %p5400_p7 = pnand %p5398_p4, %p6065_p0 }
 0x136   : > { %p5405_p1 = por %p5404_p13, %p5403_p11 }
 0x137   : > { %p5401_p8 = pneg %p5400_p7 }
 0x139   : > { %p5406_p2 = pnand %p5405_p1, %p5401_p8 }
 0x13b   : > { %5409 = shalt.err (!%p5406_p2)
}
 0x13c   : > { %4735 = dma.hbm_to_vmem [thread:$0]  (!%p6054_p12), %s6186_s1, 16, %s1616_s18, [#allocation18]  }
 0x13d   : > { %s5685_s28 = smov [#allocation22]   ;;  %s1667_s23 = sshll.u32 %s6939_s3, 4  ;;  %s6208_s23 = int_to_ptr.hbm [resolvable:$true] %s1667_s23 }
 0x13e   : > { %s1642_s26 = sshll.u32 %s5685_s28, 4  ;;  %s5425_s15 = sshra.s32 %s6197_s16, 4  ;;  %s1643_s26 = int_to_ptr.vmem [resolvable:$true] %s1642_s26  ;;  %s5426_s15 = int_to_ptr.hbm [resolvable:$true] %s5425_s15 }
 0x13f   : > { %s5427_s10 = scalar_lea.hbm %s5426_s15, 1  ;;  %s5432_s7 = scalar_lea.hbm %s5963_s17, 1 }
 0x140   : > { %p5428_p3 = scmp.ne.s32.totalorder %s5426_s15, %s5427_s10  ;;  %p5433_p8 = scmp.lt.s32.totalorder %s5426_s15, %s5963_s17 }
 0x141   : > { %p5434_p11 = scmp.lt.s32.totalorder %s5432_s7, %s5427_s10 }
 0x142   : > { %p5430_p4 = pnand %p5428_p3, %p6065_p0 }
 0x143   : > { %p5435_p13 = por %p5434_p11, %p5433_p8 }
 0x144   : > { %p5431_p7 = pneg %p5430_p4 }
 0x146   : > { %p5436_p1 = pnand %p5435_p13, %p5431_p7 }
 0x148   : > { %5439 = shalt.err (!%p5436_p1)
}
 0x149   : > { %4741 = dma.hbm_to_vmem [thread:$0]  (!%p6054_p12), %s6197_s16, 16, %s1643_s26, [#allocation21]  }
 0x14a   : > { %s1679_s1 = sshll.u32 %s6937_s5, 4  ;;  %s5686_s18 = smov [#allocation25]   ;;  %s6219_s1 = int_to_ptr.hbm [resolvable:$true] %s1679_s1 }
 0x14b   : > { %s1669_s9 = sshll.u32 %s5686_s18, 4  ;;  %s5455_s28 = sshra.s32 %s6208_s23, 4  ;;  %s1670_s9 = int_to_ptr.vmem [resolvable:$true] %s1669_s9  ;;  %s5456_s28 = int_to_ptr.hbm [resolvable:$true] %s5455_s28 }
 0x14c   : > { %s5457_s15 = scalar_lea.hbm %s5456_s28, 1  ;;  %s5462_s10 = scalar_lea.hbm %s6939_s3, 1 }
 0x14d   : > { %p5458_p2 = scmp.ne.s32.totalorder %s5456_s28, %s5457_s15  ;;  %p5463_p7 = scmp.lt.s32.totalorder %s5456_s28, %s6939_s3 }
 0x14e   : > { %p5464_p8 = scmp.lt.s32.totalorder %s5462_s10, %s5457_s15 }
 0x14f   : > { %p5460_p3 = pnand %p5458_p2, %p6065_p0 }
 0x150   : > { %p5465_p11 = por %p5464_p8, %p5463_p7 }
 0x151   : > { %p5461_p4 = pneg %p5460_p3 }
 0x153   : > { %p5466_p13 = pnand %p5465_p11, %p5461_p4 }
 0x155   : > { %5469 = shalt.err (!%p5466_p13)
}
 0x156   : > { %4747 = dma.hbm_to_vmem [thread:$0]  (!%p6054_p12), %s6208_s23, 16, %s1670_s9, [#allocation24]  }
 0x157   : > { %s5687_s16 = smov [#allocation26]   ;;  %s5485_s7 = sshra.s32 %s6219_s1, 4  ;;  %s5486_s7 = int_to_ptr.hbm [resolvable:$true] %s5485_s7 }
 0x158   : > { %s1681_s26 = sshll.u32 %s5687_s16, 4  ;;  %s5487_s18 = scalar_lea.hbm %s5486_s7, 1  ;;  %s1682_s26 = int_to_ptr.vmem [resolvable:$true] %s1681_s26 }
 0x159   : > { %p5488_p1 = scmp.ne.s32.totalorder %s5486_s7, %s5487_s18  ;;  %s5492_s28 = scalar_lea.hbm %s6937_s5, 1 }
 0x15a   : > { %p5493_p4 = scmp.lt.s32.totalorder %s5486_s7, %s6937_s5  ;;  %p5494_p7 = scmp.lt.s32.totalorder %s5492_s28, %s5487_s18 }
 0x15b   : > { %p5490_p2 = pnand %p5488_p1, %p6065_p0 }
 0x15c   : > { %p5495_p8 = por %p5494_p7, %p5493_p4 }
 0x15d   : > { %p5491_p3 = pneg %p5490_p2 }
 0x15f   : > { %p5496_p11 = pnand %p5495_p8, %p5491_p3 }
 0x161   : > { %5499 = shalt.err (!%p5496_p11)
}
 0x162   : > { %4750 = dma.hbm_to_vmem [thread:$0]  (!%p6054_p12), %s6219_s1, 16, %s1682_s26, [#allocation27]  }
 0x163   : > { %1705 = sbr.rel (%p6044_p10) target bundleno = 10701 (0x29cd), region = 248 }
 0x168   : > { %5560 = dma.done.wait (%p4755_p9), [#allocation3], 16  }
 0x169   : > { %5562 = vsyncadd (%p4755_p9), [#allocation3], 4294967280 }
 0x16a   : > { %5564 = dma.done.wait (%p4755_p9), [#allocation6], 32  }
 0x16b   : > { %5566 = vsyncadd (%p4755_p9), [#allocation6], 4294967264 }
 0x16c   : > { %5568 = dma.done.wait (%p4755_p9), [#allocation9], 32  }
 0x16d   : > { %5570 = vsyncadd (%p4755_p9), [#allocation9], 4294967264 }
 0x16e   : > { %5572 = dma.done.wait (%p4755_p9), [#allocation12], 32  }
 0x16f   : > { %5574 = vsyncadd (%p4755_p9), [#allocation12], 4294967264 }
 0x170   : > { %5576 = dma.done.wait (%p4755_p9), [#allocation15], 32  }
 0x171   : > { %5578 = vsyncadd (%p4755_p9), [#allocation15], 4294967264 }
 0x172   : > { %5580 = dma.done.wait (%p4755_p9), [#allocation18], 32  }
 0x173   : > { %5582 = vsyncadd (%p4755_p9), [#allocation18], 4294967264 }
 0x174   : > { %5584 = dma.done.wait (%p4755_p9), [#allocation21], 32  }
 0x175   : > { %5586 = vsyncadd (%p4755_p9), [#allocation21], 4294967264 }
 0x176   : > { %5588 = dma.done.wait (%p4755_p9), [#allocation24], 32  }
 0x177   : > { %5590 = vsyncadd (%p4755_p9), [#allocation24], 4294967264 }
 0x178   : > { %5592 = dma.done.wait (%p4755_p9), [#allocation27], 16  }
 0x179   : > { %5594 = vsyncadd (%p4755_p9), [#allocation27], 4294967280  ;;  %s6953_s11 = sld [smem:[#allocation40_spill]]  ;;  %p1913_p10 = scmp.lt.s32.totalorder %s6016_s0, 1  ;;  %vm1960_vm0 = vcmask 523264   ;;  %vm1992_vm1 = vcmask 261120  }
 0x17a   : > { %s6955_s23 = sld [smem:[#allocation39_spill]]  ;;  %v5688_v48 = vmov 32.0   ;;  %s6863_s28 = smov 88   ;;  %vm2068_vm6 = vcmask 64512   ;;  %vm2206_vm8 = vcmask 1043456  }
 0x17b   : > { %s1914_s22 = scalar_select %p1913_p10, %s6016_s0, 1  ;;  %4941 = vrcp.f32 %v5688_v48 }
 0x17c   : > { %s6956_s15 = sld [smem:[#allocation41_spill]] }
 0x17d   : > { %s4635_s1 = sshll.u32 %s1914_s22, 4  ;;  %s6957_s10 = sld [smem:[#allocation44_spill]] }
 0x17e   : > { %s6959_s26 = sld [smem:[#allocation42_spill]]  ;;  %s6857_s22 = smov 96  }
 0x17f   : > { %s6954_s2 = smov %s6953_s11  ;;  %v1935_v0 = vld [vmem:[%s6953_s11 + $0x70] sm:$0xff]  ;;  %s6960_s7 = sld [smem:[#allocation43_spill]] }
 0x180   : > { %v1936_v1 = vld [vmem:[%s6954_s2 + $0x78] sm:$0xff]  ;;  %v1933_v2 = vld [vmem:[%s6954_s2 + $0x60] sm:$0xff]  ;;  %v1934_v4 = vld [vmem:[%s6954_s2 + $0x68] sm:$0xff]  ;;  %s1917_s9 = scalar_lea.vmem %s6955_s23, %s4635_s1  ;;  %s6961_s18 = sld [smem:[#allocation45_spill]] }
 0x181   : > { %v1954_v3 = vpack.c.bf16 %v1936_v1, %v1935_v0  ;;  %v1943_v5 = vld [vmem:[%s6954_s2 + $0xb0] sm:$0xff]  ;;  %v1944_v6 = vld [vmem:[%s6954_s2 + $0xb8] sm:$0xff]  ;;  %v1953_v7 = vpack.c.bf16 %v1934_v4, %v1933_v2  ;;  %v1941_v9 = vld [vmem:[%s6954_s2 + $0xa0] sm:$0xff]  ;;  %v4942_v49 = vpop.eup %4941  ;;  %s6859_s11 = smov 64   ;;  %s6861_s23 = smov 56  }
 0x182   : > { %v1958_v8 = vpack.c.bf16 %v1944_v6, %v1943_v5  ;;  %v1942_v10 = vld [vmem:[%s6954_s2 + $0xa8] sm:$0xff]  ;;  %v1931_v11 = vld [vmem:[%s6954_s2 + $0x50] sm:$0xff]  ;;  %v1932_v12 = vld [vmem:[%s6954_s2 + $0x58] sm:$0xff]  ;;  %v1997_v50 = vmul.f32 32.0, %v4942_v49  ;;  %vm2001_vm2 = vweird.f32 %v4942_v49  ;;  %s6853_s1 = smov 80   ;;  %s6987_s3 = sld [smem:[#allocation59_spill]] }
 0x183   : > { %1964 = vmatpush.bf16.msra.mxu0 %v1954_v3  ;;  %v1957_v13 = vpack.c.bf16 %v1942_v10, %v1941_v9  ;;  %v1939_v14 = vld [vmem:[%s6954_s2 + $0x90] sm:$0xff]  ;;  %v1940_v15 = vld [vmem:[%s6954_s2 + $0x98] sm:$0xff]  ;;  %v1952_v16 = vpack.c.bf16 %v1932_v12, %v1931_v11  ;;  %v1929_v17 = vld [vmem:[%s6954_s2 + $0x40] sm:$0xff]  ;;  %s6958_s16 = smov %s6957_s10  ;;  %s6988_s4 = sld [smem:[#allocation62_spill]] }
 0x184   : > { %1981 = vmatpush.bf16.msra.mxu1 %v1958_v8  ;;  %v1930_v18 = vld [vmem:[%s6954_s2 + $0x48] sm:$0xff]  ;;  %v1937_v19 = vld [vmem:[%s6954_s2 + $0x80] sm:$0xff]  ;;  %v1956_v21 = vpack.c.bf16 %v1940_v15, %v1939_v14  ;;  %v1927_v22 = vld [vmem:[%s6954_s2 + $0x30] sm:$0xff]  ;;  %v1998_v51 = vsub.f32 1.0, %v1997_v50  ;;  %s6989_s5 = sld [smem:[#allocation64_spill]] }
 0x185   : > { %v1938_v20 = vld [vmem:[%s6954_s2 + $0x88] sm:$0xff]  ;;  %v1928_v23 = vld [vmem:[%s6954_s2 + $0x38] sm:$0xff]  ;;  %v1951_v24 = vpack.c.bf16 %v1930_v18, %v1929_v17  ;;  %v1925_v27 = vld [vmem:[%s6954_s2 + $0x20] sm:$0xff]  ;;  %s6991_s6 = sld [smem:[#allocation61_spill]] }
 0x186   : > { %v1920_v25 = vld [vmem:[%s1917_s9 + $0x8] sm:$0xff]  ;;  %v1955_v26 = vpack.c.bf16 %v1938_v20, %v1937_v19  ;;  %v1950_v29 = vpack.c.bf16 %v1928_v23, %v1927_v22  ;;  %v1923_v31 = vld [vmem:[%s6954_s2 + $0x10] sm:$0xff]  ;;  %v1924_v33 = vld [vmem:[%s6954_s2 + $0x18] sm:$0xff]  ;;  %v1999_v52 = vmul.f32 %v4942_v49, %v1998_v51  ;;  %s7006_s8 = sld [smem:[#allocation74_spill]] }
 0x187   : > { %1965 = vmatpush.bf16.msra.mxu0 %v1953_v7  ;;  %v1926_v28 = vld [vmem:[%s6954_s2 + $0x28] sm:$0xff]  ;;  %v1946_v30 = vpack.c.bf16 %v1920_v25, %v1920_v25  ;;  %v1948_v34 = vpack.c.bf16 %v1924_v33, %v1923_v31  ;;  %v1921_v35 = vld [vmem:[%s6954_s2] sm:$0xff]  ;;  %v2032_v60 = vld [vmem:[%s6957_s10 + $0x10] sm:$0xff]  ;;  %v2062_v25 = vlaneseq  ;;  %s6865_s10 = smov 120  }
 0x188   : > { %1982 = vmatpush.bf16.msra.mxu1 %v1957_v13  ;;  %v1949_v32 = vpack.c.bf16 %v1926_v28, %v1925_v27  ;;  %v1922_v36 = vld [vmem:[%s6954_s2 + $0x8] sm:$0xff]  ;;  %v1919_v38 = vld [vmem:[%s1917_s9] sm:$0xff]  ;;  %v2000_v53 = vadd.f32 %v4942_v49, %v1999_v52  ;;  %v2033_v61 = vld [vmem:[%s6958_s16 + $0x18] sm:$0xff]  ;;  %s6855_s9 = smov 104   ;;  %s6986_s2 = smov 40  }
 0x189   : > { %v1947_v37 = vpack.c.bf16 %v1922_v36, %v1921_v35  ;;  %v1945_v39 = vpack.c.bf16 %v1919_v38, %v1919_v38  ;;  %v1959_v42 = vld [vmem:[%s6956_s15] sm:$0xff]  ;;  %v2042_v62 = vpack.c.bf16 %v2033_v61, %v2032_v60  ;;  %v2031_v0 = vld [vmem:[%s6958_s16 + $0x8] sm:$0xff]  ;;  %s6962_s15 = sld [smem:[#allocation46_spill]] }
 0x18a   : > { %v6308_v54 = vsel %vm2001_vm2, %v4942_v49, %v2000_v53  ;;  %v2030_v63 = vld [vmem:[%s6958_s16] sm:$0xff] }
 0x18b   : > { %1966 = vmatpush.bf16.msra.mxu0 %v1952_v16  ;;  %2055 = vmatpush.bf16.msra.mxu2 %v2042_v62  ;;  %v2041_v1 = vpack.c.bf16 %v2031_v0, %v2030_v63  ;;  %v4905_v11 = vld [vmem:[%s6959_s26] ss:$0 sm:$0xff] }
 0x18c   : > { %1983 = vmatpush.bf16.msra.mxu1 %v1956_v21  ;;  %v4906_v14 = vld [vmem:[%s6960_s7] ss:$0 sm:$0xff]  ;;  %s6849_s7 = smov 112  }
 0x18d   : > { %v4907_v18 = vld [vmem:[%s6961_s18] ss:$0 sm:$0xff]  ;;  %s6851_s18 = smov 72  }
 0x18f   : > { %1967 = vmatpush.bf16.msra.mxu0 %v1951_v24  ;;  %2056 = vmatpush.bf16.msra.mxu2 %v2041_v1  ;;  %s6963_s26 = smov %s6962_s15 }
 0x190   : > { %1984 = vmatpush.bf16.msra.mxu1 %v1955_v26  ;;  %v6335_v26 = vand.u32 127, %v2062_v25 }
 0x192   : > { %vm2064_vm7 = vcmp.lt.s32.totalorder %v6335_v26, 5 }
 0x193   : > { %1968 = vmatpush.bf16.msra.mxu0 %v1950_v29  ;;  %4557 = vmatmul.msk.bf16.vlgmr.msra.gmra.mxu1 %vm1960_vm0, %v1946_v30 }
 0x197   : > { %1969 = vmatpush.bf16.msra.mxu0 %v1949_v32 }
 0x19b   : > { %1970 = vmatpush.bf16.msra.mxu0 %v1948_v34 }
 0x19f   : > { %1971 = vmatpush.bf16.msra.mxu0 %v1947_v37 }
 0x1a2   : > { %1972 = vmatmul.bf16.vlgmr.msra.gmra.mxu0 %v1945_v39 }
 0x210   : > { %v1986_v40 = vpop.f32.mrf.mxu1 }
 0x218   : > { %v1988_v41 = vpop.f32.mrf.mxu1 }
 0x219   : > { %v2035_v41 = vld [vmem:[%s6962_s15] sm:$0xff]  ;;  %s6845_s15 = smov 48  }
 0x21f   : > { %v1973_v43 = vpop.f32.mrf.mxu0 }
 0x220   : > { %v1974_v44 = vadd.f32 %v1973_v43, %v1959_v42  ;;  %v2133_v42 = vpack.c.bf16 %v2035_v41, %v2035_v41 }
 0x222   : > { %v6304_v45 = vadd.f32 %v1986_v40, %v1974_v44  ;;  %v2227_v43 = vsel %vm2206_vm8, %v2133_v42, 0  ;;  %v2037_v42 = vld [vmem:[%s6963_s26 + $0x10] sm:$0xff] }
 0x223   : > { %2236 = vmatpush.bf16.msrb.mxu1 %v2227_v43  ;;  %v2310_v43 = vpack.c.bf16 %v2037_v42, %v2037_v42 }
 0x224   : > { %v1993_v46 = vsel %vm1992_vm1, %v6304_v45, 0.0 }
 0x225   : > { %1994 = vadd.xlane.f32.xlu0 %v1993_v46 }
 0x227   : > { %v1975_v47 = vpop.f32.mrf.mxu0 }
 0x298   : > { %v1995_v55 = vpop.xlane.xlu0 %1994 }
 0x299   : > { %v2003_v56 = vmul.f32 %v6308_v54, %v1995_v55 }
 0x29b   : > { %v2004_v57 = vsub.f32 %v6304_v45, %v2003_v56 }
 0x29d   : > { %v2005_v58 = vmul.f32 %v2004_v57, %v2004_v57 }
 0x29f   : > { %v2006_v59 = vsel %vm1992_vm1, %v2005_v58, 0.0 }
 0x2a0   : > { %2007 = vadd.xlane.f32.xlu0 %v2006_v59  ;;  %v2036_v59 = vld [vmem:[%s6963_s26 + $0x8] sm:$0xff] }
 0x2a1   : > { %v2202_v60 = vpack.c.bf16 %v2036_v59, %v2036_v59 }
 0x2a3   : > { %v2208_v61 = vsel %vm2206_vm8, %v2202_v60, 0 }
 0x313   : > { %v2008_v2 = vpop.xlane.xlu0 %2007 }
 0x314   : > { %v2009_v3 = vmul.f32 %v2008_v2, %v6308_v54 }
 0x316   : > { %v2010_v4 = vadd.f32 1e-12, %v2009_v3 }
 0x318   : > { %4943 = vrsqrt.f32 %v2010_v4  ;;  %vm2017_vm4 = vweird.f32 %v2010_v4 }
 0x31e   : > { %v4944_v5 = vpop.eup %4943 }
 0x31f   : > { %v2012_v6 = vmul.f32 %v4944_v5, %v2010_v4  ;;  %vm2018_vm3 = vweird.f32 %v4944_v5 }
 0x320   : > { %vm2019_vm5 = vmor %vm2017_vm4, %vm2018_vm3 }
 0x321   : > { %v2013_v7 = vmul.f32 %v4944_v5, %v2012_v6 }
 0x323   : > { %v2014_v8 = vmul.f32 0.5, %v2013_v7 }
 0x325   : > { %v2015_v9 = vsub.f32 1.5, %v2014_v8 }
 0x327   : > { %v2016_v10 = vmul.f32 %v4944_v5, %v2015_v9 }
 0x329   : > { %v2020_v12 = vsel %vm2019_vm5, %v4944_v5, %v2016_v10 }
 0x32a   : > { %v2021_v13 = vmul.f32 %v2020_v12, %v2004_v57 }
 0x32c   : > { %v2025_v15 = vmul.f32 %v4905_v11, %v2021_v13 }
 0x32e   : > { %v2029_v16 = vadd.f32 %v4906_v14, %v2025_v15 }
 0x330   : > { %v2040_v17 = vpack.c.bf16 %v2029_v16, %v2029_v16 }
 0x332   : > { %4558 = vmatmul.msk.bf16.vlgmr.msra.gmra.mxu2 %vm1992_vm1, %v2040_v17 }
 0x3b5   : > { %v2058_v19 = vpop.f32.mrf.mxu2 }
 0x3b6   : > { %v6322_v20 = vadd.f32 %v4907_v18, %v2058_v19 }
 0x3b8   : > { %2136 = vrot.lane.b32.xlu0 %v6322_v20, %s6863_s28  ;;  %2106 = vrot.lane.b32.xlu2 %v6322_v20, %s6859_s11  ;;  %s6976_s11 = sld [smem:[#allocation57_spill]] }
 0x3b9   : > { %2066 = vrot.lane.b32.xlu1 %v6322_v20, %s6857_s22 }
 0x3bd   : > { %v2060_v21 = vpop.f32.mrf.mxu2 }
 0x412   : > { %v2107_v23 = vpop.permute.xlu2 %2106 }
 0x42a   : > { %v2137_v24 = vpop.permute.xlu0 %2136 }
 0x42b   : > { %v2067_v22 = vpop.permute.xlu1 %2066 }
 0x42c   : > { %4559 = vmatpush.xpose.msk.msra.mxu3 %vm2068_vm6, %v2067_v22 }
 0x42f   : > { %4560 = vmatmul.msk.f32.vlgmr.msra.gmra.mxu3 %vm2068_vm6, %v6322_v20 }
 0x430   : > { %2127 = vmatpush.msrb.mxu3 %v2107_v23 }
 0x432   : > { %4562 = vmatpush.xpose.msk.msra.mxu3 %vm2068_vm6, %v2137_v24 }
 0x4b2   : > { %v2090_v27 = vpop.f32.mrf.mxu3 }
 0x4b3   : > { %v2093_v28 = vmul.f32 0.35355338, %v2090_v27 }
 0x4b5   : > { %v2094_v29 = vsel %vm2064_vm7, %v2093_v28, -1e+30 }
 0x4b6   : > { %v2095_v30 = vsel %vm2068_vm6, %v2094_v29, -inf }
 0x4b7   : > { %2096 = vmax.xlane.f32.xlu1 %v2095_v30 }
 0x4d0   : > { %2175 = vrot.lane.b32.xlu1 %v6322_v20, %s6861_s23 }
 0x4d8   : > { %2244 = vrot.lane.b32.xlu1 %v6322_v20, %s6853_s1  ;;  %s6967_s1 = sld [smem:[#allocation52_spill]] }
 0x4de   : > { %v2495_v42 = vld [vmem:[%s6967_s1 + $0x10] sm:$0xff] }
 0x4e0   : > { %2331 = vrot.lane.b32.xlu1 %v6322_v20, %s6855_s9  ;;  %s6969_s9 = sld [smem:[#allocation49_spill]] }
 0x52a   : > { %v2097_v31 = vpop.xlane.xlu1 %2096 }
 0x52b   : > { %v2098_v32 = vsub.f32 %v2094_v29, %v2097_v31 }
 0x52d   : > { %v2099_v33 = vmul.f32 1.442695, %v2098_v32 }
 0x52f   : > { %4945 = vpow2.f32 %v2099_v33 }
 0x535   : > { %v4946_v34 = vpop.eup %4945 }
 0x536   : > { %v2101_v35 = vsel %vm2068_vm6, %v4946_v34, 0.0 }
 0x537   : > { %2102 = vadd.xlane.f32.xlu2 %v2101_v35  ;;  %v2038_v35 = vld [vmem:[%s6963_s26 + $0x18] sm:$0xff] }
 0x542   : > { %v2176_v36 = vpop.permute.xlu1 %2175 }
 0x543   : > { %2196 = vmatpush.msrb.mxu2 %v2176_v36  ;;  %v2399_v36 = vpack.c.bf16 %v2038_v35, %v2038_v35  ;;  %v2502_v35 = vld [vmem:[%s6967_s1 + $0x48] sm:$0xff] }
 0x545   : > { %2217 = vmatpush.bf16.msra.mxu2 %v2208_v61 }
 0x54a   : > { %v2245_v63 = vpop.permute.xlu1 %2244 }
 0x54f   : > { %2134 = vrot.lane.b32.xlu2 %v6322_v20, %s6865_s10 }
 0x552   : > { %v2332_v3 = vpop.permute.xlu1 %2331 }
 0x5aa   : > { %v2103_v37 = vpop.xlane.xlu2 %2102 }
 0x5ab   : > { %4947 = vrcp.f32 %v2103_v37 }
 0x5b1   : > { %v4948_v38 = vpop.eup %4947 }
 0x5b2   : > { %v2105_v39 = vmul.f32 %v4948_v38, %v4946_v34  ;;  %v2135_v40 = vpop.permute.xlu2 %2134 }
 0x5b4   : > { %4561 = vmatmul.msk.f32.vlgmr.msrb.gmra.mxu3 %vm2068_vm6, %v2105_v39 }
 0x5bc   : > { %4563 = vmatmul.msk.f32.vlgmr.msra.gmra.mxu3 %vm2068_vm6, %v2135_v40 }
 0x637   : > { %v2129_v44 = vpop.f32.mrf.mxu3 }
 0x638   : > { %v2132_v46 = vpack.c.bf16 %v2129_v44, %v2129_v44  ;;  %v2315_v44 = vsel %vm2206_vm8, %v2310_v43, 0  ;;  %v2496_v43 = vld [vmem:[%s6967_s1 + $0x18] sm:$0xff] }
 0x639   : > { %2324 = vmatpush.bf16.msrb.mxu3 %v2315_v44  ;;  %v2512_v44 = vpack.c.bf16 %v2496_v43, %v2495_v42 }
 0x63a   : > { %4566 = vmatmul.msk.bf16.vlgmr.msrb.gmra.mxu1 %vm2068_vm6, %v2132_v46 }
 0x63f   : > { %v2159_v47 = vpop.f32.mrf.mxu3 }
 0x640   : > { %v2162_v48 = vmul.f32 0.35355338, %v2159_v47 }
 0x642   : > { %v2163_v49 = vsel %vm2064_vm7, %v2162_v48, -1e+30 }
 0x643   : > { %v2164_v50 = vsel %vm2068_vm6, %v2163_v49, -inf }
 0x644   : > { %2165 = vmax.xlane.f32.xlu0 %v2164_v50 }
 0x658   : > { %2242 = vrot.lane.b32.xlu0 %v6322_v20, %s6849_s7  ;;  %s6965_s7 = sld [smem:[#allocation50_spill]] }
 0x6b7   : > { %v6360_v51 = vpop.f32.mrf.mxu1  ;;  %v2166_v52 = vpop.xlane.xlu0 %2165 }
 0x6b8   : > { %v2167_v53 = vsub.f32 %v2163_v49, %v2166_v52 }
 0x6ba   : > { %v2168_v55 = vmul.f32 1.442695, %v2167_v53 }
 0x6bc   : > { %4949 = vpow2.f32 %v2168_v55 }
 0x6bf   : > { %v2240_v56 = vpop.f32.mrf.mxu1 }
 0x6c2   : > { %v4950_v57 = vpop.eup %4949 }
 0x6c3   : > { %v2170_v58 = vsel %vm2068_vm6, %v4950_v57, 0.0 }
 0x6c4   : > { %2171 = vadd.xlane.f32.xlu2 %v2170_v58 }
 0x6ca   : > { %v2243_v10 = vpop.permute.xlu0 %2242 }
 0x6dc   : > { %2333 = vrot.lane.b32.xlu2 %v6322_v20, %s6851_s18  ;;  %s6966_s18 = smov %s6965_s7 }
 0x737   : > { %v2172_v62 = vpop.xlane.xlu2 %2171 }
 0x738   : > { %4951 = vrcp.f32 %v2172_v62 }
 0x73e   : > { %v4952_v0 = vpop.eup %4951 }
 0x73f   : > { %v2334_v1 = vpop.permute.xlu2 %2333  ;;  %v2174_v2 = vmul.f32 %v4952_v0, %v4950_v57 }
 0x740   : > { %4571 = vmatpush.xpose.msk.msrb.mxu0 %vm2068_vm6, %v2334_v1  ;;  %v2460_v1 = vld [vmem:[%s6966_s18 + $0x18] sm:$0xff] }
 0x741   : > { %4564 = vmatmul.msk.f32.vlgmr.msrb.gmra.mxu2 %vm2068_vm6, %v2174_v2 }
 0x742   : > { %4567 = vmatpush.xpose.msk.msrb.mxu2 %vm2068_vm6, %v2245_v63 }
 0x743   : > { %4572 = vmatmul.msk.f32.vlgmr.msrb.gmra.mxu0 %vm2068_vm6, %v2332_v3  ;;  %v2457_v3 = vld [vmem:[%s6966_s18] sm:$0xff] }
 0x7c0   : > { %v2356_v4 = vpop.f32.mrf.mxu0 }
 0x7c1   : > { %v2359_v5 = vmul.f32 0.35355338, %v2356_v4  ;;  %v2458_v4 = vld [vmem:[%s6966_s18 + $0x8] sm:$0xff] }
 0x7c3   : > { %v2360_v6 = vsel %vm2064_vm7, %v2359_v5, -1e+30  ;;  %v2463_v5 = vpack.c.bf16 %v2458_v4, %v2457_v3 }
 0x7c4   : > { %v2198_v7 = vpop.f32.mrf.mxu2  ;;  %v2361_v8 = vsel %vm2068_vm6, %v2360_v6, -inf }
 0x7c5   : > { %v2201_v9 = vpack.c.bf16 %v2198_v7, %v2198_v7  ;;  %2362 = vmax.xlane.f32.xlu0 %v2361_v8  ;;  %v2508_v7 = vld [vmem:[%s6967_s1 + $0x78] sm:$0xff]  ;;  %v2505_v8 = vld [vmem:[%s6967_s1 + $0x60] sm:$0xff] }
 0x7c7   : > { %4565 = vmatmul.msk.bf16.vlgmr.msra.gmra.mxu2 %vm2068_vm6, %v2201_v9 }
 0x7d7   : > { %4568 = vmatmul.msk.f32.vlgmr.msrb.gmra.mxu2 %vm2068_vm6, %v2243_v10 }
 0x7d9   : > { %2283 = vrot.lane.b32.xlu0 %v6322_v20, %s6845_s15  ;;  %s6847_s15 = smov 40  }
 0x838   : > { %v2363_v11 = vpop.xlane.xlu0 %2362 }
 0x839   : > { %v2364_v15 = vsub.f32 %v2360_v6, %v2363_v11  ;;  %v2507_v6 = vld [vmem:[%s6967_s1 + $0x70] sm:$0xff]  ;;  %v2506_v11 = vld [vmem:[%s6967_s1 + $0x68] sm:$0xff] }
 0x83a   : > { %v2518_v10 = vpack.c.bf16 %v2508_v7, %v2507_v6 }
 0x83b   : > { %v2365_v16 = vmul.f32 1.442695, %v2364_v15 }
 0x83c   : > { %2522 = vmatpush.bf16.msra.mxu3 %v2518_v10 }
 0x83d   : > { %4953 = vpow2.f32 %v2365_v16 }
 0x843   : > { %v4954_v22 = vpop.eup %4953 }
 0x844   : > { %v2367_v23 = vsel %vm2068_vm6, %v4954_v22, 0.0 }
 0x84a   : > { %v2219_v12 = vpop.f32.mrf.mxu2 }
 0x84b   : > { %v2284_v13 = vpop.permute.xlu0 %2283  ;;  %v2239_v50 = vadd.f32 %v6360_v51, %v2219_v12 }
 0x84c   : > { %2304 = vmatpush.msra.mxu2 %v2284_v13  ;;  %v2517_v13 = vpack.c.bf16 %v2506_v11, %v2505_v8 }
 0x84e   : > { %2523 = vmatpush.bf16.msra.mxu3 %v2517_v13 }
 0x852   : > { %v2221_v14 = vpop.f32.mrf.mxu2 }
 0x85a   : > { %v2267_v17 = vpop.f32.mrf.mxu2 }
 0x85b   : > { %v2270_v18 = vmul.f32 0.35355338, %v2267_v17 }
 0x85d   : > { %v2271_v19 = vsel %vm2064_vm7, %v2270_v18, -1e+30 }
 0x85e   : > { %v2272_v21 = vsel %vm2068_vm6, %v2271_v19, -inf }
 0x85f   : > { %2273 = vmax.xlane.f32.xlu1 %v2272_v21 }
 0x867   : > { %2368 = vadd.xlane.f32.xlu1 %v2367_v23 }
 0x880   : > { %2372 = vrot.lane.b32.xlu1 %v6322_v20, %s6847_s15  ;;  %v2404_v20 = vsel %vm2206_vm8, %v2399_v36, 0  ;;  %s6964_s15 = sld [smem:[#allocation47_spill]] }
 0x881   : > { %2413 = vmatpush.bf16.msrb.mxu2 %v2404_v20  ;;  %v2499_v20 = vld [vmem:[%s6967_s1 + $0x30] sm:$0xff] }
 0x886   : > { %v4908_v55 = vld [vmem:[%s6964_s15] ss:$0 sm:$0xff]  ;;  %s6968_s15 = sld [smem:[#allocation48_spill]] }
 0x8d2   : > { %v2274_v24 = vpop.xlane.xlu1 %2273 }
 0x8d3   : > { %v2275_v27 = vsub.f32 %v2271_v19, %v2274_v24 }
 0x8d5   : > { %v2276_v28 = vmul.f32 1.442695, %v2275_v27  ;;  %v4910_v27 = vld [vmem:[%s6969_s9] ss:$0 sm:$0xff]  ;;  %s6970_s9 = sld [smem:[#allocation51_spill]] }
 0x8d7   : > { %4955 = vpow2.f32 %v2276_v28 }
 0x8da   : > { %v2369_v31 = vpop.xlane.xlu1 %2368 }
 0x8db   : > { %4957 = vrcp.f32 %v2369_v31  ;;  %v2503_v31 = vld [vmem:[%s6967_s1 + $0x50] sm:$0xff] }
 0x8dd   : > { %v4956_v29 = vpop.eup %4955 }
 0x8de   : > { %v2278_v30 = vsel %vm2068_vm6, %v4956_v29, 0.0 }
 0x8df   : > { %2279 = vadd.xlane.f32.xlu2 %v2278_v30 }
 0x8e1   : > { %v4958_v32 = vpop.eup %4957 }
 0x8e2   : > { %v2371_v33 = vmul.f32 %v4958_v32, %v4954_v22  ;;  %v4909_v22 = vld [vmem:[%s6968_s15] ss:$0 sm:$0xff]  ;;  %v2504_v32 = vld [vmem:[%s6967_s1 + $0x58] sm:$0xff]  ;;  %s6972_s15 = sld [smem:[#allocation56_spill]] }
 0x8e8   : > { %s6973_s22 = smov %s6972_s15  ;;  %v2570_v11 = vld [vmem:[%s6972_s15 + $0x10] sm:$0xff]  ;;  %s6977_s15 = smov 96  }
 0x8f2   : > { %v2373_v34 = vpop.permute.xlu1 %2372 }
 0x8f3   : > { %2393 = vmatpush.msra.mxu1 %v2373_v34  ;;  %v2501_v34 = vld [vmem:[%s6967_s1 + $0x40] sm:$0xff] }
 0x8f4   : > { %4573 = vmatmul.msk.f32.vlgmr.msra.gmra.mxu1 %vm2068_vm6, %v2371_v33  ;;  %v2516_v33 = vpack.c.bf16 %v2504_v32, %v2503_v31  ;;  %v2515_v36 = vpack.c.bf16 %v2502_v35, %v2501_v34  ;;  %v4915_v35 = vld [vmem:[%s6976_s11] ss:$0 sm:$0xff]  ;;  %s6978_s11 = smov 64  }
 0x8f6   : > { %2524 = vmatpush.bf16.msra.mxu3 %v2516_v33 }
 0x8fa   : > { %2525 = vmatpush.bf16.msra.mxu3 %v2515_v36 }
 0x952   : > { %v2280_v37 = vpop.xlane.xlu2 %2279 }
 0x953   : > { %4959 = vrcp.f32 %v2280_v37  ;;  %v2500_v37 = vld [vmem:[%s6967_s1 + $0x38] sm:$0xff] }
 0x959   : > { %v4960_v38 = vpop.eup %4959 }
 0x95a   : > { %v2282_v39 = vmul.f32 %v4960_v38, %v4956_v29  ;;  %v2514_v38 = vpack.c.bf16 %v2500_v37, %v2499_v20 }
 0x95c   : > { %4569 = vmatmul.msk.f32.vlgmr.msra.gmra.mxu2 %vm2068_vm6, %v2282_v39  ;;  %v2497_v39 = vld [vmem:[%s6967_s1 + $0x20] sm:$0xff]  ;;  %2526 = vmatpush.bf16.msra.mxu3 %v2514_v38 }
 0x971   : > { %v2395_v40 = vpop.f32.mrf.mxu1 }
 0x972   : > { %v2398_v41 = vpack.c.bf16 %v2395_v40, %v2395_v40  ;;  %v2498_v40 = vld [vmem:[%s6967_s1 + $0x28] sm:$0xff] }
 0x974   : > { %4574 = vmatmul.msk.bf16.vlgmr.msrb.gmra.mxu2 %vm2068_vm6, %v2398_v41  ;;  %v2513_v41 = vpack.c.bf16 %v2498_v40, %v2497_v39 }
 0x976   : > { %2527 = vmatpush.bf16.msra.mxu3 %v2513_v41 }
 0x97a   : > { %2528 = vmatpush.bf16.msra.mxu3 %v2512_v44 }
 0x9df   : > { %v2306_v46 = vpop.f32.mrf.mxu2 }
 0x9e0   : > { %v2309_v47 = vpack.c.bf16 %v2306_v46, %v2306_v46  ;;  %v2493_v46 = vld [vmem:[%s6967_s1] sm:$0xff] }
 0x9e2   : > { %4570 = vmatmul.msk.bf16.vlgmr.msrb.gmra.mxu3 %vm2068_vm6, %v2309_v47  ;;  %v2494_v47 = vld [vmem:[%s6967_s1 + $0x8] sm:$0xff]  ;;  %s6984_s1 = smov 112  }
 0x9f7   : > { %v2415_v48 = vpop.f32.mrf.mxu2 }
 0x9ff   : > { %v2417_v49 = vpop.f32.mrf.mxu2 }
 0xa00   : > { %v4911_v49 = vld [vmem:[%s6970_s9] ss:$0 sm:$0xff]  ;;  %s6974_s9 = sld [smem:[#allocation54_spill]] }
 0xa65   : > { %v2326_v52 = vpop.f32.mrf.mxu3 }
 0xa66   : > { %v2330_v53 = vadd.f32 %v2326_v52, %v2239_v50 }
 0xa68   : > { %v2419_v56 = vadd.f32 %v2415_v48, %v2330_v53  ;;  %v2511_v48 = vpack.c.bf16 %v2494_v47, %v2493_v46 }
 0xa6a   : > { %v2423_v57 = vadd.f32 %v4908_v55, %v2419_v56  ;;  %2529 = vmatpush.bf16.msra.mxu3 %v2511_v48 }
 0xa6c   : > { %v6396_v58 = vadd.f32 %v2423_v57, %v6304_v45  ;;  %v2459_v45 = vld [vmem:[%s6965_s7 + $0x10] sm:$0xff]  ;;  %s6971_s7 = sld [smem:[#allocation53_spill]] }
 0xa6d   : > { %v2328_v59 = vpop.f32.mrf.mxu3  ;;  %v2464_v2 = vpack.c.bf16 %v2460_v1, %v2459_v45 }
 0xa6e   : > { %v2427_v60 = vsel %vm1992_vm1, %v6396_v58, 0.0 }
 0xa6f   : > { %2428 = vadd.xlane.f32.xlu2 %v2427_v60  ;;  %2477 = vmatpush.bf16.msra.mxu0 %v2464_v2 }
 0xa72   : > { %v4912_v45 = vld [vmem:[%s6971_s7] ss:$0 sm:$0xff]  ;;  %s6975_s7 = sld [smem:[#allocation55_spill]] }
 0xa73   : > { %2478 = vmatpush.bf16.msra.mxu0 %v2463_v5 }
 0xa78   : > { %v4914_v31 = vld [vmem:[%s6975_s7] ss:$0 sm:$0xff]  ;;  %s6980_s7 = sld [smem:[#allocation58_spill]] }
 0xae2   : > { %v2429_v51 = vpop.xlane.xlu2 %2428 }
 0xae3   : > { %v2430_v61 = vmul.f32 %v2429_v51, %v6308_v54 }
 0xae5   : > { %v2431_v62 = vsub.f32 %v6396_v58, %v2430_v61 }
 0xae7   : > { %v2432_v63 = vmul.f32 %v2431_v62, %v2431_v62 }
 0xae9   : > { %v2433_v0 = vsel %vm1992_vm1, %v2432_v63, 0.0 }
 0xaea   : > { %2434 = vadd.xlane.f32.xlu2 %v2433_v0 }
 0xb5d   : > { %v2435_v9 = vpop.xlane.xlu2 %2434 }
 0xb5e   : > { %v2436_v12 = vmul.f32 %v2435_v9, %v6308_v54 }
 0xb60   : > { %v2437_v14 = vadd.f32 1e-12, %v2436_v12  ;;  %v2571_v12 = vld [vmem:[%s6973_s22 + $0x18] sm:$0xff] }
 0xb61   : > { %v2580_v13 = vpack.c.bf16 %v2571_v12, %v2570_v11 }
 0xb62   : > { %4961 = vrsqrt.f32 %v2437_v14  ;;  %vm2444_vm10 = vweird.f32 %v2437_v14 }
 0xb63   : > { %2593 = vmatpush.bf16.msrb.mxu1 %v2580_v13 }
 0xb68   : > { %v4962_v15 = vpop.eup %4961 }
 0xb69   : > { %v2439_v16 = vmul.f32 %v4962_v15, %v2437_v14  ;;  %vm2445_vm9 = vweird.f32 %v4962_v15  ;;  %v2569_v14 = vld [vmem:[%s6973_s22 + $0x8] sm:$0xff] }
 0xb6a   : > { %vm2446_vm11 = vmor %vm2444_vm10, %vm2445_vm9 }
 0xb6b   : > { %v2440_v17 = vmul.f32 %v4962_v15, %v2439_v16 }
 0xb6d   : > { %v2441_v18 = vmul.f32 0.5, %v2440_v17 }
 0xb6f   : > { %v2442_v19 = vsub.f32 1.5, %v2441_v18 }
 0xb71   : > { %v2443_v21 = vmul.f32 %v4962_v15, %v2442_v19 }
 0xb73   : > { %v2447_v23 = vsel %vm2446_vm11, %v4962_v15, %v2443_v21 }
 0xb74   : > { %v2448_v24 = vmul.f32 %v2447_v23, %v2431_v62 }
 0xb76   : > { %v2452_v28 = vmul.f32 %v4909_v22, %v2448_v24 }
 0xb78   : > { %v2456_v29 = vadd.f32 %v4910_v27, %v2452_v28  ;;  %v4913_v28 = vld [vmem:[%s6974_s9] ss:$0 sm:$0xff]  ;;  %s6979_s9 = smov 104  }
 0xb7a   : > { %v2462_v30 = vpack.c.bf16 %v2456_v29, %v2456_v29 }
 0xb7c   : > { %4575 = vmatmul.msk.bf16.vlgmr.msra.gmra.mxu0 %vm1992_vm1, %v2462_v30 }
 0xbf9   : > { %v2480_v50 = vpop.f32.mrf.mxu0 }
 0xbfa   : > { %v2481_v52 = vadd.f32 %v4911_v49, %v2480_v50 }
 0xbfc   : > { %v2485_v53 = vmul.f32 0.044715, %v2481_v52  ;;  %v2484_v61 = vmul.f32 0.5, %v2481_v52 }
 0xbfe   : > { %v2486_v55 = vmul.f32 %v2485_v53, %v2481_v52 }
 0xc00   : > { %v2487_v56 = vmul.f32 %v2486_v55, %v2481_v52 }
 0xc01   : > { %v2482_v57 = vpop.f32.mrf.mxu0 }
 0xc02   : > { %v2488_v59 = vadd.f32 %v2487_v56, %v2481_v52 }
 0xc04   : > { %v2489_v60 = vmul.f32 0.7978845, %v2488_v59 }
 0xc06   : > { %4963 = vtanh.f32 %v2489_v60 }
 0xc0c   : > { %v4964_v51 = vpop.eup %4963 }
 0xc0d   : > { %v2491_v62 = vadd.f32 1.0, %v4964_v51 }
 0xc0f   : > { %v2492_v63 = vmul.f32 %v2491_v62, %v2484_v61 }
 0xc11   : > { %v2510_v0 = vpack.c.bf16 %v2492_v63, %v2492_v63 }
 0xc13   : > { %2530 = vmatmul.bf16.vlgmr.msra.gmra.mxu3 %v2510_v0  ;;  %v2574_v0 = vld [vmem:[%s6980_s7 + $0x8] sm:$0xff] }
 0xc96   : > { %v2531_v1 = vpop.f32.mrf.mxu3 }
 0xc97   : > { %v2532_v2 = vadd.f32 %v4912_v45, %v2531_v1  ;;  %v2736_v45 = vpack.c.bf16 %v2574_v0, %v2574_v0 }
 0xc99   : > { %v6430_v3 = vadd.f32 %v2532_v2, %v6396_v58  ;;  %v2568_v58 = vld [vmem:[%s6973_s22] sm:$0xff]  ;;  %v2741_v1 = vsel %vm2206_vm8, %v2736_v45, 0 }
 0xc9a   : > { %v2579_v15 = vpack.c.bf16 %v2569_v14, %v2568_v58 }
 0xc9b   : > { %v2538_v4 = vsel %vm1992_vm1, %v6430_v3, 0.0 }
 0xc9c   : > { %2539 = vadd.xlane.f32.xlu0 %v2538_v4  ;;  %2594 = vmatpush.bf16.msrb.mxu1 %v2579_v15 }
 0xc9e   : > { %v2533_v5 = vpop.f32.mrf.mxu3 }
 0xd0f   : > { %v2540_v6 = vpop.xlane.xlu0 %2539 }
 0xd10   : > { %v2541_v7 = vmul.f32 %v2540_v6, %v6308_v54 }
 0xd12   : > { %v2542_v8 = vsub.f32 %v6430_v3, %v2541_v7 }
 0xd14   : > { %v2543_v9 = vmul.f32 %v2542_v8, %v2542_v8 }
 0xd16   : > { %v2544_v10 = vsel %vm1992_vm1, %v2543_v9, 0.0 }
 0xd17   : > { %2545 = vadd.xlane.f32.xlu2 %v2544_v10 }
 0xd8a   : > { %v2546_v16 = vpop.xlane.xlu2 %2545 }
 0xd8b   : > { %v2547_v17 = vmul.f32 %v2546_v16, %v6308_v54 }
 0xd8d   : > { %v2548_v18 = vadd.f32 1e-12, %v2547_v17 }
 0xd8f   : > { %4965 = vrsqrt.f32 %v2548_v18  ;;  %vm2555_vm13 = vweird.f32 %v2548_v18 }
 0xd95   : > { %v4966_v19 = vpop.eup %4965 }
 0xd96   : > { %v2550_v21 = vmul.f32 %v4966_v19, %v2548_v18  ;;  %vm2556_vm12 = vweird.f32 %v4966_v19 }
 0xd97   : > { %vm2557_vm14 = vmor %vm2555_vm13, %vm2556_vm12  ;;  %vm3168_vm12 = vcmp.lt.s32.totalorder %v6335_v26, 8 }
 0xd98   : > { %v2551_v22 = vmul.f32 %v4966_v19, %v2550_v21 }
 0xd9a   : > { %v2552_v23 = vmul.f32 0.5, %v2551_v22 }
 0xd9c   : > { %v2553_v24 = vsub.f32 1.5, %v2552_v23 }
 0xd9e   : > { %v2554_v27 = vmul.f32 %v4966_v19, %v2553_v24 }
 0xda0   : > { %v2558_v29 = vsel %vm2557_vm14, %v4966_v19, %v2554_v27 }
 0xda1   : > { %v2559_v30 = vmul.f32 %v2558_v29, %v2542_v8 }
 0xda3   : > { %v2563_v32 = vmul.f32 %v4913_v28, %v2559_v30 }
 0xda5   : > { %v2567_v33 = vadd.f32 %v4914_v31, %v2563_v32 }
 0xda7   : > { %v2578_v34 = vpack.c.bf16 %v2567_v33, %v2567_v33 }
 0xda9   : > { %4576 = vmatmul.msk.bf16.vlgmr.msrb.gmra.mxu1 %vm1992_vm1, %v2578_v34 }
 0xe26   : > { %v2596_v36 = vpop.f32.mrf.mxu1 }
 0xe27   : > { %v6446_v20 = vadd.f32 %v4915_v35, %v2596_v36 }
 0xe29   : > { %2709 = vrot.lane.b32.xlu0 %v6446_v20, %s6861_s23  ;;  %2668 = vrot.lane.b32.xlu2 %v6446_v20, %s6865_s10  ;;  %s6981_s23 = smov %s6980_s7  ;;  %s6983_s10 = smov 72  }
 0xe2a   : > { %2670 = vrot.lane.b32.xlu1 %v6446_v20, %s6863_s28  ;;  %s6982_s28 = smov 80   ;;  %v2573_v12 = vld [vmem:[%s6981_s23] sm:$0xff]  ;;  %s6985_s7 = smov 48  }
 0xe2b   : > { %v2667_v13 = vpack.c.bf16 %v2573_v12, %v2573_v12 }
 0xe2d   : > { %v2760_v58 = vsel %vm2206_vm8, %v2667_v13, 0 }
 0xe2e   : > { %v2598_v37 = vpop.f32.mrf.mxu1 }
 0xe32   : > { %2601 = vrot.lane.b32.xlu1 %v6446_v20, %s6977_s15 }
 0xe83   : > { %v2669_v39 = vpop.permute.xlu2 %2668 }
 0xe9b   : > { %v2710_v41 = vpop.permute.xlu0 %2709 }
 0xe9c   : > { %v2671_v38 = vpop.permute.xlu1 %2670 }
 0xe9d   : > { %4580 = vmatpush.xpose.msk.msra.mxu1 %vm2068_vm6, %v2671_v38 }
 0xea0   : > { %4581 = vmatmul.msk.f32.vlgmr.msra.gmra.mxu1 %vm2068_vm6, %v2669_v39 }
 0xea1   : > { %2769 = vmatpush.bf16.msrb.mxu1 %v2760_v58 }
 0xea4   : > { %v2602_v40 = vpop.permute.xlu1 %2601 }
 0xea5   : > { %4577 = vmatpush.xpose.msk.msra.mxu2 %vm2068_vm6, %v2602_v40 }
 0xea8   : > { %4578 = vmatmul.msk.f32.vlgmr.msra.gmra.mxu2 %vm2068_vm6, %v6446_v20 }
 0xea9   : > { %2730 = vmatpush.msrb.mxu2 %v2710_v41 }
 0xf1d   : > { %v2693_v42 = vpop.f32.mrf.mxu1 }
 0xf1e   : > { %v2696_v43 = vmul.f32 0.35355338, %v2693_v42 }
 0xf20   : > { %v2697_v44 = vsel %vm2064_vm7, %v2696_v43, -1e+30 }
 0xf21   : > { %v2698_v46 = vsel %vm2068_vm6, %v2697_v44, -inf }
 0xf22   : > { %2699 = vmax.xlane.f32.xlu1 %v2698_v46 }
 0xf2b   : > { %v2624_v47 = vpop.f32.mrf.mxu2 }
 0xf2c   : > { %v2627_v48 = vmul.f32 0.35355338, %v2624_v47 }
 0xf2e   : > { %v2628_v49 = vsel %vm2064_vm7, %v2627_v48, -1e+30 }
 0xf2f   : > { %v2629_v50 = vsel %vm2068_vm6, %v2628_v49, -inf }
 0xf30   : > { %2630 = vmax.xlane.f32.xlu0 %v2629_v50  ;;  %v2575_v50 = vld [vmem:[%s6981_s23 + $0x10] sm:$0xff] }
 0xf3b   : > { %2640 = vrot.lane.b32.xlu1 %v6446_v20, %s6978_s11 }
 0xf44   : > { %2864 = vrot.lane.b32.xlu0 %v6446_v20, %s6979_s9 }
 0xf95   : > { %v2700_v52 = vpop.xlane.xlu1 %2699 }
 0xf96   : > { %v2701_v53 = vsub.f32 %v2697_v44, %v2700_v52  ;;  %v2843_v52 = vpack.c.bf16 %v2575_v50, %v2575_v50  ;;  %v3035_v50 = vld [vmem:[%s6989_s5 + $0x48] sm:$0xff] }
 0xf98   : > { %v2702_v55 = vmul.f32 1.442695, %v2701_v53  ;;  %v2848_v53 = vsel %vm2206_vm8, %v2843_v52, 0 }
 0xf99   : > { %2857 = vmatpush.bf16.msrb.mxu3 %v2848_v53  ;;  %v3032_v53 = vld [vmem:[%s6989_s5 + $0x30] sm:$0xff] }
 0xf9a   : > { %4967 = vpow2.f32 %v2702_v55 }
 0xfa0   : > { %v4968_v56 = vpop.eup %4967 }
 0xfa1   : > { %v2704_v57 = vsel %vm2068_vm6, %v4968_v56, 0.0 }
 0xfa2   : > { %2705 = vadd.xlane.f32.xlu2 %v2704_v57 }
 0xfa3   : > { %v2631_v59 = vpop.xlane.xlu0 %2630 }
 0xfa4   : > { %v2632_v60 = vsub.f32 %v2628_v49, %v2631_v59 }
 0xfa6   : > { %v2633_v51 = vmul.f32 1.442695, %v2632_v60 }
 0xfa8   : > { %4969 = vpow2.f32 %v2633_v51 }
 0xfad   : > { %v2641_v61 = vpop.permute.xlu1 %2640 }
 0xfae   : > { %v4970_v62 = vpop.eup %4969  ;;  %2661 = vmatpush.msrb.mxu0 %v2641_v61  ;;  %v2576_v61 = vld [vmem:[%s6981_s23 + $0x18] sm:$0xff] }
 0xfaf   : > { %v2635_v63 = vsel %vm2068_vm6, %v4970_v62, 0.0 }
 0xfb0   : > { %2636 = vadd.xlane.f32.xlu1 %v2635_v63  ;;  %2750 = vmatpush.bf16.msra.mxu0 %v2741_v1 }
 0xfb6   : > { %v2865_v18 = vpop.permute.xlu0 %2864 }
 0xfba   : > { %2777 = vrot.lane.b32.xlu2 %v6446_v20, %s6982_s28 }
 0xfc2   : > { %2866 = vrot.lane.b32.xlu2 %v6446_v20, %s6983_s10 }
 0xfc9   : > { %2775 = vrot.lane.b32.xlu1 %v6446_v20, %s6984_s1 }
0x1015   : > { %v2706_v2 = vpop.xlane.xlu2 %2705 }
0x1016   : > { %4971 = vrcp.f32 %v2706_v2 }
0x101c   : > { %v4972_v4 = vpop.eup %4971 }
0x101d   : > { %v2708_v5 = vmul.f32 %v4972_v4, %v4968_v56  ;;  %v2778_v6 = vpop.permute.xlu2 %2777  ;;  %v4916_v4 = vld [vmem:[%s6987_s3] ss:$0 sm:$0xff]  ;;  %s6990_s3 = sld [smem:[#allocation60_spill]] }
0x101e   : > { %4585 = vmatpush.xpose.msk.msra.mxu2 %vm2068_vm6, %v2778_v6 }
0x101f   : > { %4582 = vmatmul.msk.f32.vlgmr.msrb.gmra.mxu2 %vm2068_vm6, %v2708_v5 }
0x1023   : > { %v2637_v7 = vpop.xlane.xlu1 %2636 }
0x1024   : > { %4973 = vrcp.f32 %v2637_v7 }
0x1025   : > { %v2867_v10 = vpop.permute.xlu2 %2866 }
0x102a   : > { %v4974_v8 = vpop.eup %4973 }
0x102b   : > { %v2639_v9 = vmul.f32 %v4974_v8, %v4970_v62 }
0x102d   : > { %4579 = vmatmul.msk.f32.vlgmr.msrb.gmra.mxu0 %vm2068_vm6, %v2639_v9 }
0x102e   : > { %4589 = vmatpush.xpose.msk.msrb.mxu0 %vm2068_vm6, %v2867_v10 }
0x103b   : > { %v2776_v11 = vpop.permute.xlu1 %2775 }
0x103c   : > { %4586 = vmatmul.msk.f32.vlgmr.msra.gmra.mxu2 %vm2068_vm6, %v2776_v11 }
0x10a2   : > { %v2732_v14 = vpop.f32.mrf.mxu2 }
0x10a3   : > { %v2735_v15 = vpack.c.bf16 %v2732_v14, %v2732_v14 }
0x10a5   : > { %4583 = vmatmul.msk.bf16.vlgmr.msra.gmra.mxu0 %vm2068_vm6, %v2735_v15  ;;  %v2993_v15 = vld [vmem:[%s6988_s4 + $0x18] sm:$0xff] }
0x10aa   : > { %v2663_v16 = vpop.f32.mrf.mxu0 }
0x10ab   : > { %v2666_v17 = vpack.c.bf16 %v2663_v16, %v2663_v16 }
0x10ad   : > { %4584 = vmatmul.msk.bf16.vlgmr.msrb.gmra.mxu1 %vm2068_vm6, %v2666_v17  ;;  %v2990_v17 = vld [vmem:[%s6988_s4] sm:$0xff] }
0x10b5   : > { %4590 = vmatmul.msk.f32.vlgmr.msrb.gmra.mxu0 %vm2068_vm6, %v2865_v18  ;;  %v2991_v18 = vld [vmem:[%s6988_s4 + $0x8] sm:$0xff] }
0x10bf   : > { %v2800_v19 = vpop.f32.mrf.mxu2 }
0x10c0   : > { %v2803_v21 = vmul.f32 0.35355338, %v2800_v19  ;;  %v2996_v19 = vpack.c.bf16 %v2991_v18, %v2990_v17 }
0x10c2   : > { %v2804_v22 = vsel %vm2064_vm7, %v2803_v21, -1e+30  ;;  %v3040_v21 = vld [vmem:[%s6989_s5 + $0x70] sm:$0xff] }
0x10c3   : > { %v2805_v23 = vsel %vm2068_vm6, %v2804_v22, -inf }
0x10c4   : > { %2806 = vmax.xlane.f32.xlu1 %v2805_v23  ;;  %v3038_v23 = vld [vmem:[%s6989_s5 + $0x60] sm:$0xff] }
0x1122   : > { %v2752_v24 = vpop.f32.mrf.mxu0 }
0x112a   : > { %v2754_v27 = vpop.f32.mrf.mxu0  ;;  %v2771_v28 = vpop.f32.mrf.mxu1 }
0x112b   : > { %v2772_v29 = vadd.f32 %v2771_v28, %v2752_v24  ;;  %v3039_v28 = vld [vmem:[%s6989_s5 + $0x68] sm:$0xff] }
0x1132   : > { %v2773_v30 = vpop.f32.mrf.mxu1  ;;  %v2889_v31 = vpop.f32.mrf.mxu0 }
0x1133   : > { %v2892_v32 = vmul.f32 0.35355338, %v2889_v31  ;;  %v3050_v30 = vpack.c.bf16 %v3039_v28, %v3038_v23 }
0x1135   : > { %v2893_v33 = vsel %vm2064_vm7, %v2892_v32, -1e+30 }
0x1136   : > { %v2894_v34 = vsel %vm2068_vm6, %v2893_v33, -inf }
0x1137   : > { %v2807_v35 = vpop.xlane.xlu1 %2806  ;;  %2895 = vmax.xlane.f32.xlu2 %v2894_v34 }
0x1138   : > { %v2808_v36 = vsub.f32 %v2804_v22, %v2807_v35  ;;  %v3041_v22 = vld [vmem:[%s6989_s5 + $0x78] sm:$0xff] }
0x1139   : > { %v3051_v27 = vpack.c.bf16 %v3041_v22, %v3040_v21 }
0x113a   : > { %v2809_v37 = vmul.f32 1.442695, %v2808_v36 }
0x113b   : > { %3055 = vmatpush.bf16.msra.mxu3 %v3051_v27 }
0x113c   : > { %4975 = vpow2.f32 %v2809_v37 }
0x113f   : > { %3056 = vmatpush.bf16.msra.mxu3 %v3050_v30 }
0x1142   : > { %v4976_v38 = vpop.eup %4975 }
0x1143   : > { %v2811_v39 = vsel %vm2068_vm6, %v4976_v38, 0.0 }
0x1144   : > { %2812 = vadd.xlane.f32.xlu0 %v2811_v39 }
0x114f   : > { %2816 = vrot.lane.b32.xlu2 %v6446_v20, %s6985_s7 }
0x11aa   : > { %v2896_v40 = vpop.xlane.xlu2 %2895 }
0x11ab   : > { %v2897_v41 = vsub.f32 %v2893_v33, %v2896_v40 }
0x11ad   : > { %v2898_v42 = vmul.f32 1.442695, %v2897_v41  ;;  %v4918_v41 = vld [vmem:[%s6991_s6] ss:$0 sm:$0xff]  ;;  %s6992_s6 = sld [smem:[#allocation63_spill]] }
0x11af   : > { %4977 = vpow2.f32 %v2898_v42 }
0x11b2   : > { %v2817_v43 = vpop.permute.xlu2 %2816 }
0x11b3   : > { %2837 = vmatpush.msrb.mxu2 %v2817_v43 }
0x11b5   : > { %v4978_v44 = vpop.eup %4977 }
0x11b6   : > { %v2900_v46 = vsel %vm2068_vm6, %v4978_v44, 0.0 }
0x11b7   : > { %2901 = vadd.xlane.f32.xlu1 %v2900_v46  ;;  %v2813_v47 = vpop.xlane.xlu0 %2812  ;;  %v3036_v46 = vld [vmem:[%s6989_s5 + $0x50] sm:$0xff] }
0x11b8   : > { %4979 = vrcp.f32 %v2813_v47  ;;  %v3037_v47 = vld [vmem:[%s6989_s5 + $0x58] sm:$0xff] }
0x11be   : > { %v4980_v48 = vpop.eup %4979 }
0x11bf   : > { %v2815_v49 = vmul.f32 %v4980_v48, %v4976_v38  ;;  %v4917_v38 = vld [vmem:[%s6990_s3] ss:$0 sm:$0xff]  ;;  %v3049_v48 = vpack.c.bf16 %v3037_v47, %v3036_v46  ;;  %s6993_s3 = sld [smem:[#allocation65_spill]] }
0x11c1   : > { %4587 = vmatmul.msk.f32.vlgmr.msrb.gmra.mxu2 %vm2068_vm6, %v2815_v49  ;;  %3057 = vmatpush.bf16.msra.mxu3 %v3049_v48  ;;  %v3034_v49 = vld [vmem:[%s6989_s5 + $0x40] sm:$0xff] }
0x11c2   : > { %v3048_v52 = vpack.c.bf16 %v3035_v50, %v3034_v49 }
0x11c5   : > { %3058 = vmatpush.bf16.msra.mxu3 %v3048_v52 }
0x11d0   : > { %2905 = vrot.lane.b32.xlu1 %v6446_v20, %s6986_s2  ;;  %v2932_v20 = vpack.c.bf16 %v2576_v61, %v2576_v61  ;;  %v3029_v61 = vld [vmem:[%s6989_s5 + $0x18] sm:$0xff] }
0x11d2   : > { %v2937_v62 = vsel %vm2206_vm8, %v2932_v20, 0 }
0x11d3   : > { %2946 = vmatpush.bf16.msra.mxu2 %v2937_v62  ;;  %v3026_v62 = vld [vmem:[%s6989_s5] sm:$0xff] }
0x122a   : > { %v2902_v55 = vpop.xlane.xlu1 %2901 }
0x122b   : > { %4981 = vrcp.f32 %v2902_v55  ;;  %v3033_v55 = vld [vmem:[%s6989_s5 + $0x38] sm:$0xff] }
0x1231   : > { %v4982_v56 = vpop.eup %4981 }
0x1232   : > { %v2904_v57 = vmul.f32 %v4982_v56, %v4978_v44  ;;  %v3047_v56 = vpack.c.bf16 %v3033_v55, %v3032_v53 }
0x1234   : > { %3059 = vmatpush.bf16.msra.mxu3 %v3047_v56 }
0x1242   : > { %v2906_v59 = vpop.permute.xlu1 %2905 }
0x1243   : > { %2926 = vmatpush.msra.mxu1 %v2906_v59  ;;  %v3031_v59 = vld [vmem:[%s6989_s5 + $0x28] sm:$0xff] }
0x1244   : > { %v2839_v60 = vpop.f32.mrf.mxu2  ;;  %4591 = vmatmul.msk.f32.vlgmr.msra.gmra.mxu1 %vm2068_vm6, %v2904_v57  ;;  %v3030_v57 = vld [vmem:[%s6989_s5 + $0x20] sm:$0xff] }
0x1245   : > { %v2842_v51 = vpack.c.bf16 %v2839_v60, %v2839_v60  ;;  %v3046_v60 = vpack.c.bf16 %v3031_v59, %v3030_v57 }
0x1247   : > { %4588 = vmatmul.msk.bf16.vlgmr.msrb.gmra.mxu3 %vm2068_vm6, %v2842_v51  ;;  %v3028_v51 = vld [vmem:[%s6989_s5 + $0x10] sm:$0xff] }
0x1248   : > { %3060 = vmatpush.bf16.msra.mxu3 %v3046_v60  ;;  %v3045_v20 = vpack.c.bf16 %v3029_v61, %v3028_v51 }
0x124c   : > { %3061 = vmatpush.bf16.msra.mxu3 %v3045_v20 }
0x12c1   : > { %v2928_v63 = vpop.f32.mrf.mxu1 }
0x12c2   : > { %v2931_v0 = vpack.c.bf16 %v2928_v63, %v2928_v63  ;;  %v3027_v63 = vld [vmem:[%s6989_s5 + $0x8] sm:$0xff]  ;;  %s6997_s5 = sld [smem:[#allocation71_spill]] }
0x12c4   : > { %4592 = vmatmul.msk.bf16.vlgmr.msra.gmra.mxu2 %vm2068_vm6, %v2931_v0  ;;  %v3044_v0 = vpack.c.bf16 %v3027_v63, %v3026_v62 }
0x12c6   : > { %3062 = vmatpush.bf16.msra.mxu3 %v3044_v0 }
0x12c8   : > { %v3138_v53 = vld [vmem:[%s6997_s5 + $0x10] sm:$0xff]  ;;  %v3139_v55 = vld [vmem:[%s6997_s5 + $0x18] sm:$0xff]  ;;  %v3136_v57 = vld [vmem:[%s6997_s5] sm:$0xff] }
0x12c9   : > { %v3148_v56 = vpack.c.bf16 %v3139_v55, %v3138_v53  ;;  %v3137_v59 = vld [vmem:[%s6997_s5 + $0x8] sm:$0xff]  ;;  %s7001_s5 = smov 88  }
0x12ca   : > { %v2859_v45 = vpop.f32.mrf.mxu3  ;;  %v3147_v60 = vpack.c.bf16 %v3137_v59, %v3136_v57 }
0x12cb   : > { %v2863_v1 = vadd.f32 %v2859_v45, %v2772_v29  ;;  %v4919_v45 = vld [vmem:[%s6992_s6] ss:$0 sm:$0xff]  ;;  %s6994_s6 = sld [smem:[#allocation66_spill]]  ;;  %3161 = vmatpush.bf16.msrb.mxu1 %v3148_v56 }
0x12cf   : > { %3162 = vmatpush.bf16.msrb.mxu1 %v3147_v60 }
0x12d2   : > { %v2861_v2 = vpop.f32.mrf.mxu3 }
0x1347   : > { %v2948_v5 = vpop.f32.mrf.mxu2 }
0x1348   : > { %v2952_v6 = vadd.f32 %v2948_v5, %v2863_v1 }
0x134a   : > { %v2956_v7 = vadd.f32 %v4916_v4, %v2952_v6 }
0x134c   : > { %v6513_v8 = vadd.f32 %v2956_v7, %v6430_v3  ;;  %v2992_v3 = vld [vmem:[%s6988_s4 + $0x10] sm:$0xff]  ;;  %s6996_s4 = sld [smem:[#allocation68_spill]] }
0x134d   : > { %v2997_v16 = vpack.c.bf16 %v2993_v15, %v2992_v3  ;;  %v4920_v3 = vld [vmem:[%s6993_s3] ss:$0 sm:$0xff]  ;;  %s6995_s3 = sld [smem:[#allocation67_spill]] }
0x134e   : > { %v2960_v9 = vsel %vm1992_vm1, %v6513_v8, 0.0 }
0x134f   : > { %v2950_v10 = vpop.f32.mrf.mxu2  ;;  %2961 = vadd.xlane.f32.xlu0 %v2960_v9  ;;  %3010 = vmatpush.bf16.msra.mxu0 %v2997_v16 }
0x1353   : > { %3011 = vmatpush.bf16.msra.mxu0 %v2996_v19 }
0x13c2   : > { %v2962_v11 = vpop.xlane.xlu0 %2961 }
0x13c3   : > { %v2963_v12 = vmul.f32 %v2962_v11, %v6308_v54 }
0x13c5   : > { %v2964_v13 = vsub.f32 %v6513_v8, %v2963_v12 }
0x13c7   : > { %v2965_v58 = vmul.f32 %v2964_v13, %v2964_v13 }
0x13c9   : > { %v2966_v14 = vsel %vm1992_vm1, %v2965_v58, 0.0 }
0x13ca   : > { %2967 = vadd.xlane.f32.xlu2 %v2966_v14 }
0x143d   : > { %v2968_v24 = vpop.xlane.xlu2 %2967 }
0x143e   : > { %v2969_v29 = vmul.f32 %v2968_v24, %v6308_v54 }
0x1440   : > { %v2970_v31 = vadd.f32 1e-12, %v2969_v29 }
0x1442   : > { %4983 = vrsqrt.f32 %v2970_v31  ;;  %vm2977_vm2 = vweird.f32 %v2970_v31 }
0x1448   : > { %v4984_v32 = vpop.eup %4983 }
0x1449   : > { %v2972_v33 = vmul.f32 %v4984_v32, %v2970_v31  ;;  %vm2978_vm15 = vweird.f32 %v4984_v32 }
0x144a   : > { %vm2979_vm3 = vmor %vm2977_vm2, %vm2978_vm15 }
0x144b   : > { %v2973_v34 = vmul.f32 %v4984_v32, %v2972_v33 }
0x144d   : > { %v2974_v35 = vmul.f32 0.5, %v2973_v34 }
0x144f   : > { %v2975_v36 = vsub.f32 1.5, %v2974_v35 }
0x1451   : > { %v2976_v37 = vmul.f32 %v4984_v32, %v2975_v36  ;;  %v4921_v36 = vld [vmem:[%s6994_s6] ss:$0 sm:$0xff]  ;;  %s6999_s6 = sld [smem:[#allocation70_spill]] }
0x1453   : > { %v2980_v39 = vsel %vm2979_vm3, %v4984_v32, %v2976_v37 }
0x1454   : > { %v2981_v40 = vmul.f32 %v2980_v39, %v2964_v13  ;;  %v4922_v39 = vld [vmem:[%s6995_s3] ss:$0 sm:$0xff]  ;;  %s7000_s3 = smov 120  }
0x1456   : > { %v2985_v42 = vmul.f32 %v4917_v38, %v2981_v40 }
0x1458   : > { %v2989_v43 = vadd.f32 %v4918_v41, %v2985_v42  ;;  %v3102_v42 = vld [vmem:[%s6996_s4] sm:$0xff]  ;;  %s6998_s4 = sld [smem:[#allocation69_spill]] }
0x145a   : > { %v2995_v44 = vpack.c.bf16 %v2989_v43, %v2989_v43 }
0x145c   : > { %4593 = vmatmul.msk.bf16.vlgmr.msra.gmra.mxu0 %vm1992_vm1, %v2995_v44 }
0x14d9   : > { %v3013_v1 = vpop.f32.mrf.mxu0 }
0x14da   : > { %v3014_v2 = vadd.f32 %v4919_v45, %v3013_v1 }
0x14dc   : > { %v3018_v4 = vmul.f32 0.044715, %v3014_v2  ;;  %v3017_v12 = vmul.f32 0.5, %v3014_v2 }
0x14de   : > { %v3019_v5 = vmul.f32 %v3018_v4, %v3014_v2  ;;  %v4923_v4 = vld [vmem:[%s6998_s4] ss:$0 sm:$0xff]  ;;  %s7004_s4 = smov 56  }
0x14e0   : > { %v3020_v6 = vmul.f32 %v3019_v5, %v3014_v2 }
0x14e1   : > { %v3015_v7 = vpop.f32.mrf.mxu0 }
0x14e2   : > { %v3021_v9 = vadd.f32 %v3020_v6, %v3014_v2  ;;  %v4924_v7 = vld [vmem:[%s6999_s6] ss:$0 sm:$0xff]  ;;  %s7005_s6 = sld [smem:[#allocation73_spill]] }
0x14e4   : > { %v3022_v10 = vmul.f32 0.7978845, %v3021_v9 }
0x14e6   : > { %4985 = vtanh.f32 %v3022_v10 }
0x14e8   : > { %v3141_v55 = vld [vmem:[%s7005_s6] sm:$0xff] }
0x14e9   : > { %v3240_v56 = vpack.c.bf16 %v3141_v55, %v3141_v55 }
0x14eb   : > { %v3333_v57 = vsel %vm2206_vm8, %v3240_v56, 0 }
0x14ec   : > { %v4986_v11 = vpop.eup %4985 }
0x14ed   : > { %v3024_v13 = vadd.f32 1.0, %v4986_v11 }
0x14ef   : > { %v3025_v58 = vmul.f32 %v3024_v13, %v3017_v12  ;;  %v4925_v12 = vld [vmem:[#allocation2] ss:$0 sm:$0xff] }
0x14f1   : > { %v3043_v14 = vpack.c.bf16 %v3025_v58, %v3025_v58 }
0x14f3   : > { %3063 = vmatmul.bf16.vlgmr.msra.gmra.mxu3 %v3043_v14 }
0x1576   : > { %v3064_v15 = vpop.f32.mrf.mxu3 }
0x1577   : > { %v3065_v16 = vadd.f32 %v4920_v3, %v3064_v15 }
0x1579   : > { %v3068_v17 = vadd.f32 %v3065_v16, %v6513_v8 }
0x157b   : > { %v3071_v18 = vsel %vm1992_vm1, %v3068_v17, 0.0 }
0x157c   : > { %3072 = vadd.xlane.f32.xlu0 %v3071_v18 }
0x157e   : > { %v3066_v19 = vpop.f32.mrf.mxu3 }
0x15ef   : > { %v3073_v21 = vpop.xlane.xlu0 %3072 }
0x15f0   : > { %v3074_v22 = vmul.f32 %v3073_v21, %v6308_v54 }
0x15f2   : > { %v3075_v23 = vsub.f32 %v3068_v17, %v3074_v22  ;;  %v3170_v17 = vshrl.u32 %v2062_v25, 7 }
0x15f4   : > { %v3076_v24 = vmul.f32 %v3075_v23, %v3075_v23  ;;  %vm3171_vm13 = vcmp.le.s32.totalorder %v6335_v26, %v3170_v17 }
0x15f5   : > { %vm6585_vm14 = vmand %vm3168_vm12, %vm3171_vm13 }
0x15f6   : > { %v3077_v27 = vsel %vm1992_vm1, %v3076_v24, 0.0 }
0x15f7   : > { %3078 = vadd.xlane.f32.xlu1 %v3077_v27 }
0x166a   : > { %v3079_v28 = vpop.xlane.xlu1 %3078 }
0x166b   : > { %v3080_v29 = vmul.f32 %v3079_v28, %v6308_v54 }
0x166d   : > { %v3081_v30 = vadd.f32 1e-12, %v3080_v29 }
0x166f   : > { %4987 = vrsqrt.f32 %v3081_v30  ;;  %vm3088_vm5 = vweird.f32 %v3081_v30 }
0x1675   : > { %v4988_v8 = vpop.eup %4987 }
0x1676   : > { %v3083_v31 = vmul.f32 %v4988_v8, %v3081_v30  ;;  %vm3089_vm4 = vweird.f32 %v4988_v8 }
0x1677   : > { %vm3090_vm7 = vmor %vm3088_vm5, %vm3089_vm4 }
0x1678   : > { %v3084_v32 = vmul.f32 %v4988_v8, %v3083_v31 }
0x167a   : > { %v3085_v33 = vmul.f32 0.5, %v3084_v32 }
0x167c   : > { %v3086_v34 = vsub.f32 1.5, %v3085_v33 }
0x167e   : > { %v3087_v35 = vmul.f32 %v4988_v8, %v3086_v34 }
0x1680   : > { %v3091_v37 = vsel %vm3090_vm7, %v4988_v8, %v3087_v35 }
0x1681   : > { %v3092_v38 = vmul.f32 %v3091_v37, %v3075_v23 }
0x1683   : > { %v3096_v40 = vmul.f32 %v4921_v36, %v3092_v38 }
0x1685   : > { %v3100_v41 = vadd.f32 %v4922_v39, %v3096_v40 }
0x1687   : > { %v3101_v43 = vperm.slane %v3100_v41, 0 }
0x1689   : > { %v6554_v44 = vadd.f32 %v3102_v42, %v3101_v43  ;;  %v3142_v42 = vld [vmem:[%s7005_s6 + $0x8] sm:$0xff] }
0x168b   : > { %v3106_v46 = vsel %vm1992_vm1, %v6554_v44, 0.0 }
0x168c   : > { %3107 = vadd.xlane.f32.xlu0 %v3106_v46  ;;  %v3309_v46 = vpack.c.bf16 %v3142_v42, %v3142_v42  ;;  %v4926_v42 = vld [vmem:[#allocation5] ss:$0 sm:$0xff] }
0x16ff   : > { %v3108_v47 = vpop.xlane.xlu0 %3107 }
0x1700   : > { %v3109_v48 = vmul.f32 %v3108_v47, %v6308_v54  ;;  %v3314_v47 = vsel %vm2206_vm8, %v3309_v46, 0 }
0x1702   : > { %v3110_v49 = vsub.f32 %v6554_v44, %v3109_v48 }
0x1704   : > { %v3111_v50 = vmul.f32 %v3110_v49, %v3110_v49 }
0x1706   : > { %v3112_v52 = vsel %vm1992_vm1, %v3111_v50, 0.0 }
0x1707   : > { %3113 = vadd.xlane.f32.xlu0 %v3112_v52 }
0x177a   : > { %v3114_v51 = vpop.xlane.xlu0 %3113 }
0x177b   : > { %v3115_v61 = vmul.f32 %v3114_v51, %v6308_v54 }
0x177d   : > { %v3116_v20 = vadd.f32 1e-05, %v3115_v61 }
0x177f   : > { %4989 = vrsqrt.f32 %v3116_v20  ;;  %vm3123_vm10 = vweird.f32 %v3116_v20 }
0x1785   : > { %v4990_v62 = vpop.eup %4989 }
0x1786   : > { %v3118_v63 = vmul.f32 %v4990_v62, %v3116_v20  ;;  %vm3124_vm9 = vweird.f32 %v4990_v62 }
0x1787   : > { %vm3125_vm11 = vmor %vm3123_vm10, %vm3124_vm9 }
0x1788   : > { %v3119_v0 = vmul.f32 %v4990_v62, %v3118_v63 }
0x178a   : > { %v3120_v45 = vmul.f32 0.5, %v3119_v0 }
0x178c   : > { %v3121_v1 = vsub.f32 1.5, %v3120_v45 }
0x178e   : > { %v3122_v2 = vmul.f32 %v4990_v62, %v3121_v1 }
0x1790   : > { %v3126_v5 = vsel %vm3125_vm11, %v4990_v62, %v3122_v2 }
0x1791   : > { %v3127_v6 = vmul.f32 %v3126_v5, %v3110_v49 }
0x1793   : > { %v3131_v9 = vmul.f32 %v4923_v4, %v3127_v6 }
0x1795   : > { %v3135_v10 = vadd.f32 %v4924_v7, %v3131_v9 }
0x1797   : > { %v3146_v11 = vpack.c.bf16 %v3135_v10, %v3135_v10 }
0x1799   : > { %4594 = vmatmul.msk.bf16.vlgmr.msrb.gmra.mxu1 %vm1992_vm1, %v3146_v11 }
0x1816   : > { %v3164_v13 = vpop.f32.mrf.mxu1 }
0x1817   : > { %v6569_v58 = vadd.f32 %v4925_v12, %v3164_v13 }
0x1819   : > { %3241 = vrot.lane.b32.xlu2 %v6569_v58, %s7000_s3  ;;  %3243 = vrot.lane.b32.xlu0 %v6569_v58, %s7001_s5 }
0x181e   : > { %v3166_v14 = vpop.f32.mrf.mxu1 }
0x1821   : > { %3174 = vrot.lane.b32.xlu0 %v6569_v58, %s6977_s15 }
0x1873   : > { %v3242_v15 = vpop.permute.xlu2 %3241 }
0x188b   : > { %v3244_v3 = vpop.permute.xlu0 %3243 }
0x188c   : > { %4598 = vmatpush.xpose.msk.msra.mxu1 %vm2068_vm6, %v3244_v3 }
0x188f   : > { %4599 = vmatmul.msk.f32.vlgmr.msra.gmra.mxu1 %vm2068_vm6, %v3242_v15 }
0x1890   : > { %3342 = vmatpush.bf16.msrb.mxu1 %v3333_v57 }
0x1893   : > { %v3175_v16 = vpop.permute.xlu0 %3174 }
0x1894   : > { %4595 = vmatpush.xpose.msk.msrb.mxu2 %vm2068_vm6, %v3175_v16 }
0x1897   : > { %4596 = vmatmul.msk.f32.vlgmr.msrb.gmra.mxu2 %vm2068_vm6, %v6569_v58 }
0x190c   : > { %v3266_v18 = vpop.f32.mrf.mxu1 }
0x190d   : > { %v3269_v21 = vmul.f32 0.35355338, %v3266_v18 }
0x190f   : > { %v3270_v22 = vsel %vm6585_vm14, %v3269_v21, -1e+30 }
0x1910   : > { %v3271_v23 = vsel %vm2068_vm6, %v3270_v22, -inf }
0x1911   : > { %3272 = vmax.xlane.f32.xlu1 %v3271_v23 }
0x191a   : > { %v3197_v24 = vpop.f32.mrf.mxu2 }
0x191b   : > { %v3200_v27 = vmul.f32 0.35355338, %v3197_v24 }
0x191d   : > { %v3201_v25 = vsel %vm6585_vm14, %v3200_v27, -1e+30 }
0x191e   : > { %v3202_v28 = vsel %vm2068_vm6, %v3201_v25, -inf }
0x191f   : > { %3203 = vmax.xlane.f32.xlu2 %v3202_v28  ;;  %v3143_v28 = vld [vmem:[%s7005_s6 + $0x10] sm:$0xff] }
0x192a   : > { %3282 = vrot.lane.b32.xlu1 %v6569_v58, %s7004_s4 }
0x1937   : > { %3350 = vrot.lane.b32.xlu2 %v6569_v58, %s6982_s28 }
0x1984   : > { %v3273_v26 = vpop.xlane.xlu1 %3272 }
0x1985   : > { %v3274_v29 = vsub.f32 %v3270_v22, %v3273_v26  ;;  %v3416_v26 = vpack.c.bf16 %v3143_v28, %v3143_v28 }
0x1987   : > { %v3275_v30 = vmul.f32 1.442695, %v3274_v29  ;;  %v3421_v29 = vsel %vm2206_vm8, %v3416_v26, 0 }
0x1988   : > { %3430 = vmatpush.bf16.msrb.mxu3 %v3421_v29 }
0x1989   : > { %4991 = vpow2.f32 %v3275_v30 }
0x198f   : > { %v4992_v8 = vpop.eup %4991 }
0x1990   : > { %v3277_v31 = vsel %vm2068_vm6, %v4992_v8, 0.0 }
0x1991   : > { %3278 = vadd.xlane.f32.xlu0 %v3277_v31 }
0x1992   : > { %v3204_v32 = vpop.xlane.xlu2 %3203 }
0x1993   : > { %v3205_v33 = vsub.f32 %v3201_v25, %v3204_v32 }
0x1995   : > { %v3206_v34 = vmul.f32 1.442695, %v3205_v33 }
0x1997   : > { %4993 = vpow2.f32 %v3206_v34 }
0x199a   : > { %v3351_v37 = vpop.permute.xlu2 %3350 }
0x199c   : > { %v3283_v35 = vpop.permute.xlu1 %3282 }
0x199d   : > { %v4994_v36 = vpop.eup %4993  ;;  %3303 = vmatpush.msra.mxu2 %v3283_v35  ;;  %v3144_v35 = vld [vmem:[%s7005_s6 + $0x18] sm:$0xff]  ;;  %s7007_s6 = sld [smem:[#allocation75_spill]] }
0x199e   : > { %v3208_v38 = vsel %vm2068_vm6, %v4994_v36, 0.0 }
0x199f   : > { %4603 = vmatpush.xpose.msk.msrb.mxu2 %vm2068_vm6, %v3351_v37  ;;  %3209 = vadd.xlane.f32.xlu1 %v3208_v38 }
0x19a3   : > { %v3605_v26 = vld [vmem:[%s7007_s6 + $0x30] sm:$0xff]  ;;  %v3606_v29 = vld [vmem:[%s7007_s6 + $0x38] sm:$0xff] }
0x19a5   : > { %3213 = vrot.lane.b32.xlu0 %v6569_v58, %s6978_s11 }
0x19ad   : > { %3348 = vrot.lane.b32.xlu0 %v6569_v58, %s6984_s1 }
0x19b5   : > { %3439 = vrot.lane.b32.xlu0 %v6569_v58, %s6983_s10 }
0x19b8   : > { %3437 = vrot.lane.b32.xlu1 %v6569_v58, %s6979_s9 }
0x1a04   : > { %v3279_v39 = vpop.xlane.xlu0 %3278 }
0x1a05   : > { %4995 = vrcp.f32 %v3279_v39 }
0x1a0b   : > { %v4996_v40 = vpop.eup %4995 }
0x1a0c   : > { %v3281_v41 = vmul.f32 %v4996_v40, %v4992_v8 }
0x1a0e   : > { %4600 = vmatmul.msk.f32.vlgmr.msra.gmra.mxu2 %vm2068_vm6, %v3281_v41 }
0x1a12   : > { %v3210_v43 = vpop.xlane.xlu1 %3209 }
0x1a13   : > { %4997 = vrcp.f32 %v3210_v43 }
0x1a17   : > { %v3214_v48 = vpop.permute.xlu0 %3213 }
0x1a18   : > { %3234 = vmatpush.msrb.mxu0 %v3214_v48 }
0x1a19   : > { %v4998_v49 = vpop.eup %4997 }
0x1a1a   : > { %3323 = vmatpush.bf16.msra.mxu0 %v3314_v47  ;;  %v3212_v50 = vmul.f32 %v4998_v49, %v4994_v36  ;;  %v3505_v36 = vpack.c.bf16 %v3144_v35, %v3144_v35 }
0x1a1c   : > { %4597 = vmatmul.msk.f32.vlgmr.msrb.gmra.mxu0 %vm2068_vm6, %v3212_v50 }
0x1a1f   : > { %v3349_v52 = vpop.permute.xlu0 %3348 }
0x1a20   : > { %4604 = vmatmul.msk.f32.vlgmr.msrb.gmra.mxu2 %vm2068_vm6, %v3349_v52 }
0x1a27   : > { %v3440_v53 = vpop.permute.xlu0 %3439 }
0x1a28   : > { %4607 = vmatpush.xpose.msk.msrb.mxu0 %vm2068_vm6, %v3440_v53 }
0x1a2a   : > { %v3438_v20 = vpop.permute.xlu1 %3437 }
0x1a91   : > { %v3305_v59 = vpop.f32.mrf.mxu2 }
0x1a92   : > { %v3308_v60 = vpack.c.bf16 %v3305_v59, %v3305_v59  ;;  %v3566_v59 = vld [vmem:[%s7006_s8 + $0x18] sm:$0xff] }
0x1a94   : > { %4601 = vmatmul.msk.bf16.vlgmr.msra.gmra.mxu0 %vm2068_vm6, %v3308_v60 }
0x1a99   : > { %v3236_v51 = vpop.f32.mrf.mxu0 }
0x1a9a   : > { %v3239_v61 = vpack.c.bf16 %v3236_v51, %v3236_v51  ;;  %v3563_v51 = vld [vmem:[%s7006_s8] sm:$0xff] }
0x1a9c   : > { %4602 = vmatmul.msk.bf16.vlgmr.msrb.gmra.mxu1 %vm2068_vm6, %v3239_v61  ;;  %v3564_v61 = vld [vmem:[%s7006_s8 + $0x8] sm:$0xff] }
0x1aa3   : > { %v3373_v62 = vpop.f32.mrf.mxu2 }
0x1aa4   : > { %v3376_v63 = vmul.f32 0.35355338, %v3373_v62  ;;  %4608 = vmatmul.msk.f32.vlgmr.msrb.gmra.mxu0 %vm2068_vm6, %v3438_v20  ;;  %v3569_v20 = vpack.c.bf16 %v3564_v61, %v3563_v51  ;;  %v3613_v62 = vld [vmem:[%s7007_s6 + $0x70] sm:$0xff] }
0x1aa6   : > { %v3377_v0 = vsel %vm6585_vm14, %v3376_v63, -1e+30  ;;  %v3614_v63 = vld [vmem:[%s7007_s6 + $0x78] sm:$0xff] }
0x1aa7   : > { %v3378_v45 = vsel %vm2068_vm6, %v3377_v0, -inf }
0x1aa8   : > { %3379 = vmax.xlane.f32.xlu2 %v3378_v45 }
0x1b11   : > { %v3325_v1 = vpop.f32.mrf.mxu0 }
0x1b19   : > { %v3327_v2 = vpop.f32.mrf.mxu0  ;;  %v3344_v4 = vpop.f32.mrf.mxu1 }
0x1b1a   : > { %v3345_v5 = vadd.f32 %v3344_v4, %v3325_v1  ;;  %v3624_v1 = vpack.c.bf16 %v3614_v63, %v3613_v62  ;;  %v3612_v2 = vld [vmem:[%s7007_s6 + $0x68] sm:$0xff] }
0x1b1b   : > { %v3380_v6 = vpop.xlane.xlu2 %3379 }
0x1b1c   : > { %v3381_v7 = vsub.f32 %v3377_v0, %v3380_v6  ;;  %v3611_v0 = vld [vmem:[%s7007_s6 + $0x60] sm:$0xff]  ;;  %3628 = vmatpush.bf16.msra.mxu3 %v3624_v1 }
0x1b1e   : > { %v3382_v9 = vmul.f32 1.442695, %v3381_v7 }
0x1b20   : > { %4999 = vpow2.f32 %v3382_v9 }
0x1b21   : > { %v3346_v10 = vpop.f32.mrf.mxu1  ;;  %v3462_v11 = vpop.f32.mrf.mxu0 }
0x1b22   : > { %v3465_v12 = vmul.f32 0.35355338, %v3462_v11 }
0x1b24   : > { %v3466_v13 = vsel %vm6585_vm14, %v3465_v12, -1e+30 }
0x1b25   : > { %v3467_v14 = vsel %vm2068_vm6, %v3466_v13, -inf }
0x1b26   : > { %v5000_v3 = vpop.eup %4999  ;;  %3468 = vmax.xlane.f32.xlu0 %v3467_v14  ;;  %v4927_v14 = vld [vmem:[#allocation7] ss:$0 sm:$0xff] }
0x1b27   : > { %v3384_v15 = vsel %vm2068_vm6, %v5000_v3, 0.0 }
0x1b28   : > { %3385 = vadd.xlane.f32.xlu1 %v3384_v15 }
0x1b3a   : > { %3389 = vrot.lane.b32.xlu0 %v6569_v58, %s6985_s7 }
0x1b99   : > { %v3469_v16 = vpop.xlane.xlu0 %3468 }
0x1b9a   : > { %v3470_v17 = vsub.f32 %v3466_v13, %v3469_v16  ;;  %v4928_v16 = vld [vmem:[#allocation8] ss:$0 sm:$0xff] }
0x1b9b   : > { %v3386_v21 = vpop.xlane.xlu1 %3385 }
0x1b9c   : > { %v3471_v18 = vmul.f32 1.442695, %v3470_v17 }
0x1b9e   : > { %5001 = vpow2.f32 %v3471_v18 }
0x1b9f   : > { %5003 = vrcp.f32 %v3386_v21 }
0x1ba4   : > { %v5002_v22 = vpop.eup %5001 }
0x1ba5   : > { %v3473_v23 = vsel %vm2068_vm6, %v5002_v22, 0.0  ;;  %v5004_v24 = vpop.eup %5003 }
0x1ba6   : > { %3474 = vadd.xlane.f32.xlu2 %v3473_v23  ;;  %v3388_v27 = vmul.f32 %v5004_v24, %v5000_v3  ;;  %v3610_v23 = vld [vmem:[%s7007_s6 + $0x58] sm:$0xff] }
0x1bac   : > { %v3390_v25 = vpop.permute.xlu0 %3389 }
0x1bad   : > { %3410 = vmatpush.msra.mxu2 %v3390_v25  ;;  %v3608_v25 = vld [vmem:[%s7007_s6 + $0x48] sm:$0xff] }
0x1bae   : > { %4605 = vmatmul.msk.f32.vlgmr.msra.gmra.mxu2 %vm2068_vm6, %v3388_v27  ;;  %v3607_v27 = vld [vmem:[%s7007_s6 + $0x40] sm:$0xff] }
0x1baf   : > { %v3621_v28 = vpack.c.bf16 %v3608_v25, %v3607_v27  ;;  %v4933_v27 = vld [vmem:[#allocation16] ss:$0 sm:$0xff] }
0x1bbe   : > { %3478 = vrot.lane.b32.xlu2 %v6569_v58, %s6986_s2  ;;  %v3510_v58 = vsel %vm2206_vm8, %v3505_v36, 0  ;;  %v3599_v36 = vld [vmem:[%s7007_s6] sm:$0xff] }
0x1bbf   : > { %3519 = vmatpush.bf16.msrb.mxu2 %v3510_v58  ;;  %v3600_v58 = vld [vmem:[%s7007_s6 + $0x8] sm:$0xff] }
0x1c19   : > { %v3475_v30 = vpop.xlane.xlu2 %3474 }
0x1c1a   : > { %5005 = vrcp.f32 %v3475_v30  ;;  %v3620_v30 = vpack.c.bf16 %v3606_v29, %v3605_v26 }
0x1c20   : > { %v5006_v8 = vpop.eup %5005 }
0x1c21   : > { %v3477_v31 = vmul.f32 %v5006_v8, %v5002_v22  ;;  %v3479_v32 = vpop.permute.xlu2 %3478  ;;  %v3609_v22 = vld [vmem:[%s7007_s6 + $0x50] sm:$0xff]  ;;  %v3603_v8 = vld [vmem:[%s7007_s6 + $0x20] sm:$0xff] }
0x1c22   : > { %3499 = vmatpush.msra.mxu1 %v3479_v32  ;;  %v3622_v24 = vpack.c.bf16 %v3610_v23, %v3609_v22 }
0x1c23   : > { %4609 = vmatmul.msk.f32.vlgmr.msra.gmra.mxu1 %vm2068_vm6, %v3477_v31  ;;  %v3604_v31 = vld [vmem:[%s7007_s6 + $0x28] sm:$0xff] }
0x1c24   : > { %v3619_v32 = vpack.c.bf16 %v3604_v31, %v3603_v8 }
0x1c31   : > { %v3412_v33 = vpop.f32.mrf.mxu2 }
0x1c32   : > { %v3415_v34 = vpack.c.bf16 %v3412_v33, %v3412_v33  ;;  %v3601_v33 = vld [vmem:[%s7007_s6 + $0x10] sm:$0xff] }
0x1c34   : > { %4606 = vmatmul.msk.bf16.vlgmr.msrb.gmra.mxu3 %vm2068_vm6, %v3415_v34  ;;  %v3602_v34 = vld [vmem:[%s7007_s6 + $0x18] sm:$0xff] }
0x1c35   : > { %v3618_v35 = vpack.c.bf16 %v3602_v34, %v3601_v33 }
0x1ca0   : > { %v3501_v37 = vpop.f32.mrf.mxu1 }
0x1ca1   : > { %v3504_v38 = vpack.c.bf16 %v3501_v37, %v3501_v37  ;;  %v3617_v37 = vpack.c.bf16 %v3600_v58, %v3599_v36 }
0x1ca3   : > { %4610 = vmatmul.msk.bf16.vlgmr.msrb.gmra.mxu2 %vm2068_vm6, %v3504_v38  ;;  %v4929_v38 = vld [vmem:[#allocation10] ss:$0 sm:$0xff] }
0x1cb7   : > { %v3432_v39 = vpop.f32.mrf.mxu3 }
0x1cb8   : > { %v3436_v40 = vadd.f32 %v3432_v39, %v3345_v5  ;;  %v3623_v5 = vpack.c.bf16 %v3612_v2, %v3611_v0 }
0x1cba   : > { %3629 = vmatpush.bf16.msra.mxu3 %v3623_v5 }
0x1cbe   : > { %3630 = vmatpush.bf16.msra.mxu3 %v3622_v24 }
0x1cbf   : > { %v3434_v41 = vpop.f32.mrf.mxu3 }
0x1cc2   : > { %3631 = vmatpush.bf16.msra.mxu3 %v3621_v28 }
0x1cc6   : > { %3632 = vmatpush.bf16.msra.mxu3 %v3620_v30 }
0x1cca   : > { %3633 = vmatpush.bf16.msra.mxu3 %v3619_v32 }
0x1cce   : > { %3634 = vmatpush.bf16.msra.mxu3 %v3618_v35 }
0x1cd2   : > { %3635 = vmatpush.bf16.msra.mxu3 %v3617_v37 }
0x1d26   : > { %v3521_v43 = vpop.f32.mrf.mxu2 }
0x1d27   : > { %v3525_v46 = vadd.f32 %v3521_v43, %v3436_v40 }
0x1d29   : > { %v3529_v47 = vadd.f32 %v4926_v42, %v3525_v46 }
0x1d2b   : > { %v6642_v48 = vadd.f32 %v3529_v47, %v6554_v44  ;;  %v3565_v44 = vld [vmem:[%s7006_s8 + $0x10] sm:$0xff]  ;;  %s7008_s8 = sld [smem:[#allocation78_spill]] }
0x1d2c   : > { %v3570_v60 = vpack.c.bf16 %v3566_v59, %v3565_v44 }
0x1d2d   : > { %v3533_v49 = vsel %vm1992_vm1, %v6642_v48, 0.0 }
0x1d2e   : > { %v3523_v50 = vpop.f32.mrf.mxu2  ;;  %3534 = vadd.xlane.f32.xlu1 %v3533_v49  ;;  %3583 = vmatpush.bf16.msra.mxu0 %v3570_v60 }
0x1d31   : > { %v3676_v1 = vld [vmem:[%s7008_s8 + $0x10] sm:$0xff]  ;;  %v3677_v2 = vld [vmem:[%s7008_s8 + $0x18] sm:$0xff]  ;;  %v3675_v5 = vld [vmem:[%s7008_s8 + $0x8] sm:$0xff] }
0x1d32   : > { %3584 = vmatpush.bf16.msra.mxu0 %v3569_v20 }
0x1da1   : > { %v3535_v52 = vpop.xlane.xlu1 %3534 }
0x1da2   : > { %v3536_v53 = vmul.f32 %v3535_v52, %v6308_v54 }
0x1da4   : > { %v3537_v55 = vsub.f32 %v6642_v48, %v3536_v53 }
0x1da6   : > { %v3538_v56 = vmul.f32 %v3537_v55, %v3537_v55 }
0x1da8   : > { %v3539_v57 = vsel %vm1992_vm1, %v3538_v56, 0.0 }
0x1da9   : > { %3540 = vadd.xlane.f32.xlu0 %v3539_v57  ;;  %v4930_v57 = vld [vmem:[#allocation11] ss:$0 sm:$0xff] }
0x1e1c   : > { %v3541_v45 = vpop.xlane.xlu0 %3540 }
0x1e1d   : > { %v3542_v4 = vmul.f32 %v3541_v45, %v6308_v54 }
0x1e1f   : > { %v3543_v6 = vadd.f32 1e-05, %v3542_v4  ;;  %v3686_v4 = vpack.c.bf16 %v3677_v2, %v3676_v1 }
0x1e21   : > { %5007 = vrsqrt.f32 %v3543_v6  ;;  %vm3550_vm2 = vweird.f32 %v3543_v6  ;;  %3699 = vmatpush.bf16.msrb.mxu1 %v3686_v4 }
0x1e27   : > { %v5008_v7 = vpop.eup %5007 }
0x1e28   : > { %v3545_v9 = vmul.f32 %v5008_v7, %v3543_v6  ;;  %vm3551_vm15 = vweird.f32 %v5008_v7 }
0x1e29   : > { %vm3552_vm3 = vmor %vm3550_vm2, %vm3551_vm15 }
0x1e2a   : > { %v3546_v10 = vmul.f32 %v5008_v7, %v3545_v9 }
0x1e2c   : > { %v3547_v11 = vmul.f32 0.5, %v3546_v10 }
0x1e2e   : > { %v3548_v12 = vsub.f32 1.5, %v3547_v11 }
0x1e30   : > { %v3549_v13 = vmul.f32 %v5008_v7, %v3548_v12 }
0x1e32   : > { %v3553_v3 = vsel %vm3552_vm3, %v5008_v7, %v3549_v13 }
0x1e33   : > { %v3554_v15 = vmul.f32 %v3553_v3, %v3537_v55 }
0x1e35   : > { %v3558_v17 = vmul.f32 %v4927_v14, %v3554_v15 }
0x1e37   : > { %v3562_v18 = vadd.f32 %v4928_v16, %v3558_v17  ;;  %v4931_v16 = vld [vmem:[#allocation13] ss:$0 sm:$0xff] }
0x1e39   : > { %v3568_v21 = vpack.c.bf16 %v3562_v18, %v3562_v18 }
0x1e3b   : > { %4611 = vmatmul.msk.bf16.vlgmr.msra.gmra.mxu0 %vm1992_vm1, %v3568_v21  ;;  %v4932_v21 = vld [vmem:[#allocation14] ss:$0 sm:$0xff] }
0x1eb8   : > { %v3586_v39 = vpop.f32.mrf.mxu0 }
0x1eb9   : > { %v3587_v40 = vadd.f32 %v4929_v38, %v3586_v39 }
0x1ebb   : > { %v3591_v41 = vmul.f32 0.044715, %v3587_v40  ;;  %v3590_v52 = vmul.f32 0.5, %v3587_v40 }
0x1ebd   : > { %v3592_v42 = vmul.f32 %v3591_v41, %v3587_v40 }
0x1ebf   : > { %v3593_v43 = vmul.f32 %v3592_v42, %v3587_v40 }
0x1ec0   : > { %v3588_v46 = vpop.f32.mrf.mxu0 }
0x1ec1   : > { %v3594_v47 = vadd.f32 %v3593_v43, %v3587_v40 }
0x1ec3   : > { %v3595_v49 = vmul.f32 0.7978845, %v3594_v47 }
0x1ec5   : > { %5009 = vtanh.f32 %v3595_v49 }
0x1ecb   : > { %v5010_v50 = vpop.eup %5009 }
0x1ecc   : > { %v3597_v53 = vadd.f32 1.0, %v5010_v50 }
0x1ece   : > { %v3598_v55 = vmul.f32 %v3597_v53, %v3590_v52 }
0x1ed0   : > { %v3616_v56 = vpack.c.bf16 %v3598_v55, %v3598_v55 }
0x1ed2   : > { %3636 = vmatmul.bf16.vlgmr.msra.gmra.mxu3 %v3616_v56 }
0x1f55   : > { %v3637_v44 = vpop.f32.mrf.mxu3 }
0x1f56   : > { %v3638_v59 = vadd.f32 %v4930_v57, %v3637_v44 }
0x1f58   : > { %v6672_v60 = vadd.f32 %v3638_v59, %v6642_v48  ;;  %v3674_v48 = vld [vmem:[%s7008_s8] sm:$0xff] }
0x1f59   : > { %v3685_v6 = vpack.c.bf16 %v3675_v5, %v3674_v48 }
0x1f5a   : > { %v3644_v51 = vsel %vm1992_vm1, %v6672_v60, 0.0 }
0x1f5b   : > { %3645 = vadd.xlane.f32.xlu1 %v3644_v51  ;;  %3700 = vmatpush.bf16.msrb.mxu1 %v3685_v6 }
0x1f5d   : > { %v3639_v61 = vpop.f32.mrf.mxu3 }
0x1fce   : > { %v3646_v20 = vpop.xlane.xlu1 %3645 }
0x1fcf   : > { %v3647_v62 = vmul.f32 %v3646_v20, %v6308_v54 }
0x1fd1   : > { %v3648_v63 = vsub.f32 %v6672_v60, %v3647_v62 }
0x1fd3   : > { %v3649_v0 = vmul.f32 %v3648_v63, %v3648_v63 }
0x1fd5   : > { %v3650_v45 = vsel %vm1992_vm1, %v3649_v0, 0.0 }
0x1fd6   : > { %3651 = vadd.xlane.f32.xlu2 %v3650_v45 }
0x2049   : > { %v3652_v7 = vpop.xlane.xlu2 %3651 }
0x204a   : > { %v3653_v9 = vmul.f32 %v3652_v7, %v6308_v54 }
0x204c   : > { %v3654_v10 = vadd.f32 1e-05, %v3653_v9 }
0x204e   : > { %5011 = vrsqrt.f32 %v3654_v10  ;;  %vm3661_vm5 = vweird.f32 %v3654_v10 }
0x2054   : > { %v5012_v11 = vpop.eup %5011 }
0x2055   : > { %v3656_v12 = vmul.f32 %v5012_v11, %v3654_v10  ;;  %vm3662_vm4 = vweird.f32 %v5012_v11 }
0x2056   : > { %vm3663_vm7 = vmor %vm3661_vm5, %vm3662_vm4 }
0x2057   : > { %v3657_v13 = vmul.f32 %v5012_v11, %v3656_v12 }
0x2059   : > { %v3658_v14 = vmul.f32 0.5, %v3657_v13 }
0x205b   : > { %v3659_v3 = vsub.f32 1.5, %v3658_v14 }
0x205d   : > { %v3660_v15 = vmul.f32 %v5012_v11, %v3659_v3 }
0x205f   : > { %v3664_v17 = vsel %vm3663_vm7, %v5012_v11, %v3660_v15 }
0x2060   : > { %v3665_v18 = vmul.f32 %v3664_v17, %v3648_v63 }
0x2062   : > { %v3669_v22 = vmul.f32 %v4931_v16, %v3665_v18 }
0x2064   : > { %v3673_v23 = vadd.f32 %v4932_v21, %v3669_v22 }
0x2066   : > { %v3684_v24 = vpack.c.bf16 %v3673_v23, %v3673_v23 }
0x2068   : > { %4612 = vmatmul.msk.bf16.vlgmr.msrb.gmra.mxu1 %vm1992_vm1, %v3684_v24 }
0x20e5   : > { %v3702_v25 = vpop.f32.mrf.mxu1 }
0x20e6   : > { %v6685_v28 = vadd.f32 %v4933_v27, %v3702_v25 }
0x20e8   : > { %3707 = vrot.lane.b32.xlu0 %v6685_v28, %s6977_s15  ;;  %3776 = vrot.lane.b32.xlu1 %v6685_v28, %s7001_s5  ;;  %s7009_s5 = sld [smem:[#allocation80_spill]] }
0x20ed   : > { %v3704_v26 = vpop.f32.mrf.mxu1 }
0x20ee   : > { %v3680_v51 = vld [vmem:[%s7009_s5 + $0x8] sm:$0xff]  ;;  %v3679_v9 = vld [vmem:[%s7009_s5] sm:$0xff] }
0x20ef   : > { %v3842_v61 = vpack.c.bf16 %v3680_v51, %v3680_v51  ;;  %v3773_v10 = vpack.c.bf16 %v3679_v9, %v3679_v9 }
0x20f0   : > { %3774 = vrot.lane.b32.xlu1 %v6685_v28, %s7000_s3 }
0x20f1   : > { %v3847_v20 = vsel %vm2206_vm8, %v3842_v61, 0  ;;  %v3866_v11 = vsel %vm2206_vm8, %v3773_v10, 0 }
0x215a   : > { %v3708_v29 = vpop.permute.xlu0 %3707  ;;  %v3777_v30 = vpop.permute.xlu1 %3776 }
0x215b   : > { %4613 = vmatpush.xpose.msk.msra.mxu2 %vm2068_vm6, %v3708_v29  ;;  %4616 = vmatpush.xpose.msk.msra.mxu1 %vm2068_vm6, %v3777_v30 }
0x215e   : > { %4614 = vmatmul.msk.f32.vlgmr.msra.gmra.mxu2 %vm2068_vm6, %v6685_v28 }
0x215f   : > { %3875 = vmatpush.bf16.msrb.mxu1 %v3866_v11 }
0x2162   : > { %v3775_v8 = vpop.permute.xlu1 %3774 }
0x2163   : > { %4617 = vmatmul.msk.f32.vlgmr.msra.gmra.mxu1 %vm2068_vm6, %v3775_v8 }
0x21e0   : > { %v3799_v31 = vpop.f32.mrf.mxu1 }
0x21e1   : > { %v3802_v32 = vmul.f32 0.35355338, %v3799_v31  ;;  %v3730_v33 = vpop.f32.mrf.mxu2 }
0x21e2   : > { %v3733_v34 = vmul.f32 0.35355338, %v3730_v33 }
0x21e3   : > { %v3803_v35 = vsel %vm6585_vm14, %v3802_v32, -1e+30 }
0x21e4   : > { %v3804_v36 = vsel %vm2068_vm6, %v3803_v35, -inf  ;;  %v3734_v58 = vsel %vm6585_vm14, %v3733_v34, -1e+30 }
0x21e5   : > { %3805 = vmax.xlane.f32.xlu1 %v3804_v36  ;;  %v3735_v37 = vsel %vm2068_vm6, %v3734_v58, -inf }
0x21e6   : > { %3736 = vmax.xlane.f32.xlu0 %v3735_v37 }
0x21fa   : > { %3883 = vrot.lane.b32.xlu0 %v6685_v28, %s6982_s28  ;;  %s7011_s28 = sld [smem:[#allocation82_spill]] }
0x21fe   : > { %3746 = vrot.lane.b32.xlu1 %v6685_v28, %s6978_s11 }
0x2200   : > { %v4146_v9 = vld [vmem:[%s7011_s28 + $0x70] sm:$0xff]  ;;  %v4147_v10 = vld [vmem:[%s7011_s28 + $0x78] sm:$0xff]  ;;  %v4144_v11 = vld [vmem:[%s7011_s28 + $0x60] sm:$0xff] }
0x2206   : > { %3881 = vrot.lane.b32.xlu1 %v6685_v28, %s6984_s1  ;;  %s7012_s1 = sld [smem:[#allocation88_spill]] }
0x220c   : > { %s1910_s15 = sand.u32 1, %s7012_s1  }
0x220d   : > { %s4554_s3 = sshll.u32 %s1910_s15, 3  ;;  %s4232_s8 = scalar_lea.sflag [#allocation4], %s1910_s15 }
0x220e   : > { %3972 = vrot.lane.b32.xlu1 %v6685_v28, %s6983_s10  ;;  %s7013_s10 = sld [smem:[#allocation86_spill]] }
0x2258   : > { %v3806_v38 = vpop.xlane.xlu1 %3805 }
0x2259   : > { %v3807_v39 = vsub.f32 %v3803_v35, %v3806_v38  ;;  %v3737_v46 = vpop.xlane.xlu0 %3736 }
0x225a   : > { %v3738_v47 = vsub.f32 %v3734_v58, %v3737_v46  ;;  %v3681_v58 = vld [vmem:[%s7009_s5 + $0x10] sm:$0xff] }
0x225b   : > { %v3808_v40 = vmul.f32 1.442695, %v3807_v39  ;;  %v3949_v37 = vpack.c.bf16 %v3681_v58, %v3681_v58  ;;  %v4138_v58 = vld [vmem:[%s7011_s28 + $0x30] sm:$0xff] }
0x225c   : > { %v3739_v49 = vmul.f32 1.442695, %v3738_v47  ;;  %v3682_v47 = vld [vmem:[%s7009_s5 + $0x18] sm:$0xff] }
0x225d   : > { %5013 = vpow2.f32 %v3808_v40  ;;  %v3954_v38 = vsel %vm2206_vm8, %v3949_v37, 0  ;;  %v4139_v37 = vld [vmem:[%s7011_s28 + $0x38] sm:$0xff] }
0x225e   : > { %5015 = vpow2.f32 %v3739_v49  ;;  %3963 = vmatpush.bf16.msrb.mxu3 %v3954_v38  ;;  %v4038_v49 = vpack.c.bf16 %v3682_v47, %v3682_v47  ;;  %v4153_v38 = vpack.c.bf16 %v4139_v37, %v4138_v58  ;;  %v4132_v47 = vld [vmem:[%s7011_s28] sm:$0xff] }
0x2263   : > { %v5014_v41 = vpop.eup %5013 }
0x2264   : > { %v3810_v42 = vsel %vm2068_vm6, %v5014_v41, 0.0  ;;  %v5016_v50 = vpop.eup %5015 }
0x2265   : > { %3811 = vadd.xlane.f32.xlu2 %v3810_v42  ;;  %v3741_v52 = vsel %vm2068_vm6, %v5016_v50, 0.0 }
0x226c   : > { %v3884_v44 = vpop.permute.xlu0 %3883 }
0x2270   : > { %v3747_v43 = vpop.permute.xlu1 %3746 }
0x2271   : > { %3767 = vmatpush.msrb.mxu0 %v3747_v43 }
0x2273   : > { %3856 = vmatpush.bf16.msra.mxu0 %v3847_v20 }
0x2278   : > { %v3882_v59 = vpop.permute.xlu1 %3881 }
0x227d   : > { %3815 = vrot.lane.b32.xlu2 %v6685_v28, %s7004_s4 }
0x2280   : > { %v3973_v45 = vpop.permute.xlu1 %3972 }
0x22a6   : > { %3742 = vadd.xlane.f32.xlu2 %v3741_v52 }
0x22be   : > { %3970 = vrot.lane.b32.xlu2 %v6685_v28, %s6979_s9  ;;  %s7014_s9 = smov %s7013_s10 }
0x22d8   : > { %v3812_v53 = vpop.xlane.xlu2 %3811 }
0x22d9   : > { %5017 = vrcp.f32 %v3812_v53 }
0x22df   : > { %v5018_v55 = vpop.eup %5017 }
0x22e0   : > { %v3814_v56 = vmul.f32 %v5018_v55, %v5014_v41  ;;  %v3816_v57 = vpop.permute.xlu2 %3815 }
0x22e1   : > { %3836 = vmatpush.msrb.mxu2 %v3816_v57  ;;  %v4934_v57 = vld [vmem:[#allocation17] ss:$0 sm:$0xff] }
0x22e2   : > { %4618 = vmatmul.msk.f32.vlgmr.msrb.gmra.mxu2 %vm2068_vm6, %v3814_v56 }
0x22e3   : > { %4621 = vmatpush.xpose.msk.msra.mxu2 %vm2068_vm6, %v3884_v44 }
0x22ea   : > { %4622 = vmatmul.msk.f32.vlgmr.msra.gmra.mxu2 %vm2068_vm6, %v3882_v59 }
0x2319   : > { %v3743_v62 = vpop.xlane.xlu2 %3742 }
0x231a   : > { %5019 = vrcp.f32 %v3743_v62 }
0x2320   : > { %v5020_v63 = vpop.eup %5019 }
0x2321   : > { %v3745_v0 = vmul.f32 %v5020_v63, %v5016_v50  ;;  %v3971_v7 = vpop.permute.xlu2 %3970 }
0x2323   : > { %4615 = vmatmul.msk.f32.vlgmr.msrb.gmra.mxu0 %vm2068_vm6, %v3745_v0 }
0x2324   : > { %4625 = vmatpush.xpose.msk.msrb.mxu0 %vm2068_vm6, %v3973_v45 }
0x2365   : > { %v3838_v1 = vpop.f32.mrf.mxu2 }
0x2366   : > { %v3841_v2 = vpack.c.bf16 %v3838_v1, %v3838_v1 }
0x2368   : > { %4619 = vmatmul.msk.bf16.vlgmr.msra.gmra.mxu0 %vm2068_vm6, %v3841_v2 }
0x236d   : > { %v3906_v4 = vpop.f32.mrf.mxu2 }
0x236e   : > { %v3909_v48 = vmul.f32 0.35355338, %v3906_v4 }
0x2370   : > { %v3910_v5 = vsel %vm6585_vm14, %v3909_v48, -1e+30 }
0x2371   : > { %v3911_v6 = vsel %vm2068_vm6, %v3910_v5, -inf }
0x2372   : > { %3912 = vmax.xlane.f32.xlu0 %v3911_v6 }
0x2378   : > { %4626 = vmatmul.msk.f32.vlgmr.msrb.gmra.mxu0 %vm2068_vm6, %v3971_v7 }
0x23a0   : > { %v3769_v12 = vpop.f32.mrf.mxu0 }
0x23a1   : > { %v3772_v13 = vpack.c.bf16 %v3769_v12, %v3769_v12 }
0x23a3   : > { %4620 = vmatmul.msk.bf16.vlgmr.msrb.gmra.mxu1 %vm2068_vm6, %v3772_v13  ;;  %v4157_v13 = vpack.c.bf16 %v4147_v10, %v4146_v9 }
0x23a5   : > { %4161 = vmatpush.bf16.msra.mxu3 %v4157_v13  ;;  %v4210_v13 = vld [vmem:[%s5988_s25 + $0x18] sm:$0xff] }
0x23e5   : > { %v3858_v14 = vpop.f32.mrf.mxu0  ;;  %v3913_v3 = vpop.xlane.xlu0 %3912 }
0x23e6   : > { %v3914_v15 = vsub.f32 %v3910_v5, %v3913_v3 }
0x23e8   : > { %v3915_v16 = vmul.f32 1.442695, %v3914_v15 }
0x23ea   : > { %5021 = vpow2.f32 %v3915_v16 }
0x23ed   : > { %v3860_v17 = vpop.f32.mrf.mxu0 }
0x23f0   : > { %v5022_v18 = vpop.eup %5021 }
0x23f1   : > { %v3917_v21 = vsel %vm2068_vm6, %v5022_v18, 0.0 }
0x23f2   : > { %3918 = vadd.xlane.f32.xlu2 %v3917_v21 }
0x23f5   : > { %v3995_v22 = vpop.f32.mrf.mxu0 }
0x23f6   : > { %v3998_v23 = vmul.f32 0.35355338, %v3995_v22 }
0x23f8   : > { %v3999_v24 = vsel %vm6585_vm14, %v3998_v23, -1e+30 }
0x23f9   : > { %v4000_v27 = vsel %vm2068_vm6, %v3999_v24, -inf }
0x23fa   : > { %4001 = vmax.xlane.f32.xlu1 %v4000_v27  ;;  %v4935_v27 = vld [vmem:[#allocation19] ss:$0 sm:$0xff] }
0x2413   : > { %3922 = vrot.lane.b32.xlu1 %v6685_v28, %s6985_s7  ;;  %s4632_s7 = sshll.u32 %s6016_s0, 3  ;;  %s5535_s0 = scalar_lea.hbm %s7014_s9, 16 }
0x2414   : > { %s4242_s4 = scalar_lea.hbm %s7013_s10, %s4632_s7 }
0x2415   : > { %s4246_s6 = sshll.u32 %s4242_s4, 4  ;;  %s4247_s6 = int_to_ptr.hbm [resolvable:$true] %s4246_s6 }
0x2416   : > { %s5529_s12 = sshra.s32 %s4247_s6, 4  ;;  %s5530_s12 = int_to_ptr.hbm [resolvable:$true] %s5529_s12 }
0x2417   : > { %s5531_s13 = scalar_lea.hbm %s5530_s12, 8  ;;  %p5536_p13 = scmp.lt.s32.totalorder %s5530_s12, %s7014_s9 }
0x2418   : > { %p5532_p9 = scmp.ne.s32.totalorder %s5530_s12, %s5531_s13  ;;  %p5537_p1 = scmp.lt.s32.totalorder %s5535_s0, %s5531_s13 }
0x241a   : > { %p5533_p12 = pnand %p5532_p9, %p6033_p5  ;;  %p5538_p2 = por %p5537_p1, %p5536_p13 }
0x241c   : > { %p5534_p0 = pneg %p5533_p12 }
0x241e   : > { %p5539_p3 = pnand %p5538_p2, %p5534_p0 }
0x2420   : > { %v3877_v25 = vpop.f32.mrf.mxu1 }
0x2421   : > { %v3878_v26 = vadd.f32 %v3877_v25, %v3858_v14  ;;  %v4145_v14 = vld [vmem:[%s7011_s28 + $0x68] sm:$0xff] }
0x2422   : > { %v4156_v15 = vpack.c.bf16 %v4145_v14, %v4144_v11 }
0x2424   : > { %4162 = vmatpush.bf16.msra.mxu3 %v4156_v15  ;;  %v4208_v15 = vld [vmem:[%s5988_s25 + $0x8] sm:$0xff] }
0x2428   : > { %v3879_v29 = vpop.f32.mrf.mxu1 }
0x2429   : > { %v4936_v29 = vld [vmem:[#allocation20] ss:$0 sm:$0xff] }
0x2465   : > { %v3919_v33 = vpop.xlane.xlu2 %3918 }
0x246d   : > { %v4002_v30 = vpop.xlane.xlu1 %4001 }
0x246e   : > { %v4003_v8 = vsub.f32 %v3999_v24, %v4002_v30 }
0x2470   : > { %v4004_v31 = vmul.f32 1.442695, %v4003_v8 }
0x2472   : > { %5023 = vpow2.f32 %v4004_v31 }
0x2473   : > { %5025 = vrcp.f32 %v3919_v33  ;;  %v4143_v33 = vld [vmem:[%s7011_s28 + $0x58] sm:$0xff] }
0x2478   : > { %v5024_v32 = vpop.eup %5023 }
0x2479   : > { %v4006_v34 = vsel %vm2068_vm6, %v5024_v32, 0.0  ;;  %v5026_v19 = vpop.eup %5025 }
0x247a   : > { %4007 = vadd.xlane.f32.xlu0 %v4006_v34  ;;  %v3921_v35 = vmul.f32 %v5026_v19, %v5022_v18  ;;  %v4140_v19 = vld [vmem:[%s7011_s28 + $0x40] sm:$0xff] }
0x2485   : > { %v3923_v36 = vpop.permute.xlu1 %3922 }
0x2486   : > { %3943 = vmatpush.msrb.mxu2 %v3923_v36 }
0x2487   : > { %4623 = vmatmul.msk.f32.vlgmr.msrb.gmra.mxu2 %vm2068_vm6, %v3921_v35  ;;  %v4141_v35 = vld [vmem:[%s7011_s28 + $0x48] sm:$0xff] }
0x2488   : > { %v4154_v36 = vpack.c.bf16 %v4141_v35, %v4140_v19 }
0x248e   : > { %4011 = vrot.lane.b32.xlu0 %v6685_v28, %s6986_s2  ;;  %v4043_v28 = vsel %vm2206_vm8, %v4038_v49, 0  ;;  %s7010_s2 = sld [smem:[#allocation81_spill]]  ;;  %v4133_v49 = vld [vmem:[%s7011_s28 + $0x8] sm:$0xff] }
0x248f   : > { %4052 = vmatpush.bf16.msra.mxu2 %v4043_v28  ;;  %v4150_v28 = vpack.c.bf16 %v4133_v49, %v4132_v47 }
0x2494   : > { %v4099_v4 = vld [vmem:[%s7010_s2 + $0x18] sm:$0xff]  ;;  %v4096_v5 = vld [vmem:[%s7010_s2] sm:$0xff]  ;;  %v4097_v6 = vld [vmem:[%s7010_s2 + $0x8] sm:$0xff] }
0x2495   : > { %v4102_v7 = vpack.c.bf16 %v4097_v6, %v4096_v5 }
0x24ed   : > { %v4008_v39 = vpop.xlane.xlu0 %4007 }
0x24ee   : > { %5027 = vrcp.f32 %v4008_v39  ;;  %v4136_v39 = vld [vmem:[%s7011_s28 + $0x20] sm:$0xff] }
0x24f4   : > { %v5028_v40 = vpop.eup %5027 }
0x24f5   : > { %v4010_v41 = vmul.f32 %v5028_v40, %v5024_v32  ;;  %v4142_v32 = vld [vmem:[%s7011_s28 + $0x50] sm:$0xff]  ;;  %v4137_v40 = vld [vmem:[%s7011_s28 + $0x28] sm:$0xff] }
0x24f6   : > { %v4155_v34 = vpack.c.bf16 %v4143_v33, %v4142_v32 }
0x24f8   : > { %4163 = vmatpush.bf16.msra.mxu3 %v4155_v34 }
0x24fc   : > { %4164 = vmatpush.bf16.msra.mxu3 %v4154_v36 }
0x2500   : > { %v4012_v42 = vpop.permute.xlu0 %4011  ;;  %4165 = vmatpush.bf16.msra.mxu3 %v4153_v38 }
0x2501   : > { %4032 = vmatpush.msra.mxu1 %v4012_v42  ;;  %v4134_v42 = vld [vmem:[%s7011_s28 + $0x10] sm:$0xff] }
0x2502   : > { %4627 = vmatmul.msk.f32.vlgmr.msra.gmra.mxu1 %vm2068_vm6, %v4010_v41  ;;  %v4152_v41 = vpack.c.bf16 %v4137_v40, %v4136_v39 }
0x2504   : > { %4166 = vmatpush.bf16.msra.mxu3 %v4152_v41 }
0x250a   : > { %v3945_v43 = vpop.f32.mrf.mxu2 }
0x250b   : > { %v3948_v46 = vpack.c.bf16 %v3945_v43, %v3945_v43  ;;  %v4135_v43 = vld [vmem:[%s7011_s28 + $0x18] sm:$0xff] }
0x250d   : > { %4624 = vmatmul.msk.bf16.vlgmr.msrb.gmra.mxu3 %vm2068_vm6, %v3948_v46  ;;  %v4151_v46 = vpack.c.bf16 %v4135_v43, %v4134_v42 }
0x250f   : > { %4167 = vmatpush.bf16.msra.mxu3 %v4151_v46 }
0x2513   : > { %4168 = vmatpush.bf16.msra.mxu3 %v4150_v28 }
0x257f   : > { %v4034_v50 = vpop.f32.mrf.mxu1 }
0x2580   : > { %v4037_v52 = vpack.c.bf16 %v4034_v50, %v4034_v50  ;;  %v4937_v50 = vld [vmem:[#allocation22] ss:$0 sm:$0xff] }
0x2582   : > { %4628 = vmatmul.msk.bf16.vlgmr.msra.gmra.mxu2 %vm2068_vm6, %v4037_v52 }
0x2590   : > { %v3965_v53 = vpop.f32.mrf.mxu3 }
0x2591   : > { %v3969_v55 = vadd.f32 %v3965_v53, %v3878_v26 }
0x2598   : > { %v3967_v56 = vpop.f32.mrf.mxu3 }
0x2605   : > { %v4054_v44 = vpop.f32.mrf.mxu2 }
0x2606   : > { %v4058_v59 = vadd.f32 %v4054_v44, %v3969_v55 }
0x2608   : > { %v4062_v51 = vadd.f32 %v4934_v57, %v4058_v59 }
0x260a   : > { %v6751_v61 = vadd.f32 %v4062_v51, %v6672_v60  ;;  %v4098_v60 = vld [vmem:[%s7010_s2 + $0x10] sm:$0xff]  ;;  %s1912_s2 = scalar_lea.vmem [#allocation28], %s4554_s3 }
0x260b   : > { %v4103_v48 = vpack.c.bf16 %v4099_v4, %v4098_v60  ;;  %s4244_s5 = sshll.u32 %s1912_s2, 4  ;;  %s4245_s5 = int_to_ptr.vmem [resolvable:$true] %s4244_s5 }
0x260c   : > { %v4066_v20 = vsel %vm1992_vm1, %v6751_v61, 0.0 }
0x260d   : > { %v4056_v62 = vpop.f32.mrf.mxu2  ;;  %4067 = vadd.xlane.f32.xlu2 %v4066_v20  ;;  %4116 = vmatpush.bf16.msra.mxu0 %v4103_v48 }
0x2611   : > { %4117 = vmatpush.bf16.msra.mxu0 %v4102_v7 }
0x2680   : > { %v4068_v63 = vpop.xlane.xlu2 %4067 }
0x2681   : > { %v4069_v0 = vmul.f32 %v4068_v63, %v6308_v54 }
0x2683   : > { %v4070_v45 = vsub.f32 %v6751_v61, %v4069_v0 }
0x2685   : > { %v4071_v1 = vmul.f32 %v4070_v45, %v4070_v45 }
0x2687   : > { %v4072_v2 = vsel %vm1992_vm1, %v4071_v1, 0.0  ;;  %v4938_v1 = vld [vmem:[#allocation23] ss:$0 sm:$0xff] }
0x2688   : > { %4073 = vadd.xlane.f32.xlu0 %v4072_v2 }
0x26fb   : > { %v4074_v12 = vpop.xlane.xlu0 %4073 }
0x26fc   : > { %v4075_v3 = vmul.f32 %v4074_v12, %v6308_v54  ;;  %v4209_v12 = vld [vmem:[%s5988_s25 + $0x10] sm:$0xff] }
0x26fd   : > { %v4213_v14 = vpack.c.bf16 %v4210_v13, %v4209_v12 }
0x26fe   : > { %v4076_v16 = vadd.f32 1e-05, %v4075_v3  ;;  %v4207_v3 = vld [vmem:[%s5988_s25] sm:$0xff] }
0x26ff   : > { %4223 = vmatpush.bf16.msrb.mxu1 %v4213_v14 }
0x2700   : > { %5029 = vrsqrt.f32 %v4076_v16  ;;  %vm4083_vm8 = vweird.f32 %v4076_v16 }
0x2706   : > { %v5030_v17 = vpop.eup %5029 }
0x2707   : > { %v4078_v18 = vmul.f32 %v5030_v17, %v4076_v16  ;;  %vm4084_vm6 = vweird.f32 %v5030_v17  ;;  %v4212_v16 = vpack.c.bf16 %v4208_v15, %v4207_v3 }
0x2708   : > { %vm4085_vm9 = vmor %vm4083_vm8, %vm4084_vm6 }
0x2709   : > { %v4079_v21 = vmul.f32 %v5030_v17, %v4078_v18  ;;  %4224 = vmatpush.bf16.msrb.mxu1 %v4212_v16 }
0x270b   : > { %v4080_v22 = vmul.f32 0.5, %v4079_v21 }
0x270d   : > { %v4081_v23 = vsub.f32 1.5, %v4080_v22 }
0x270f   : > { %v4082_v24 = vmul.f32 %v5030_v17, %v4081_v23 }
0x2711   : > { %v4086_v25 = vsel %vm4085_vm9, %v5030_v17, %v4082_v24 }
0x2712   : > { %v4087_v26 = vmul.f32 %v4086_v25, %v4070_v45 }
0x2714   : > { %v4091_v30 = vmul.f32 %v4935_v27, %v4087_v26  ;;  %v4939_v26 = vld [vmem:[#allocation25] ss:$0 sm:$0xff] }
0x2716   : > { %v4095_v8 = vadd.f32 %v4936_v29, %v4091_v30  ;;  %v4940_v30 = vld [vmem:[#allocation26] ss:$0 sm:$0xff] }
0x2718   : > { %v4101_v31 = vpack.c.bf16 %v4095_v8, %v4095_v8 }
0x271a   : > { %4629 = vmatmul.msk.bf16.vlgmr.msra.gmra.mxu0 %vm1992_vm1, %v4101_v31 }
0x2797   : > { %v4119_v52 = vpop.f32.mrf.mxu0 }
0x2798   : > { %v4120_v53 = vadd.f32 %v4937_v50, %v4119_v52 }
0x279a   : > { %v4124_v55 = vmul.f32 0.044715, %v4120_v53  ;;  %v4123_v62 = vmul.f32 0.5, %v4120_v53 }
0x279c   : > { %v4125_v56 = vmul.f32 %v4124_v55, %v4120_v53 }
0x279e   : > { %v4126_v57 = vmul.f32 %v4125_v56, %v4120_v53 }
0x279f   : > { %v4121_v44 = vpop.f32.mrf.mxu0 }
0x27a0   : > { %v4127_v59 = vadd.f32 %v4126_v57, %v4120_v53 }
0x27a2   : > { %v4128_v51 = vmul.f32 0.7978845, %v4127_v59 }
0x27a4   : > { %5031 = vtanh.f32 %v4128_v51 }
0x27aa   : > { %v5032_v20 = vpop.eup %5031 }
0x27ab   : > { %v4130_v63 = vadd.f32 1.0, %v5032_v20 }
0x27ad   : > { %v4131_v0 = vmul.f32 %v4130_v63, %v4123_v62 }
0x27af   : > { %v4149_v45 = vpack.c.bf16 %v4131_v0, %v4131_v0 }
0x27b1   : > { %4169 = vmatmul.bf16.vlgmr.msra.gmra.mxu3 %v4149_v45 }
0x2834   : > { %v4170_v2 = vpop.f32.mrf.mxu3 }
0x2835   : > { %v4171_v60 = vadd.f32 %v4938_v1, %v4170_v2 }
0x2837   : > { %v4174_v4 = vadd.f32 %v4171_v60, %v6751_v61 }
0x2839   : > { %v4177_v48 = vsel %vm1992_vm1, %v4174_v4, 0.0 }
0x283a   : > { %4178 = vadd.xlane.f32.xlu2 %v4177_v48 }
0x283c   : > { %v4172_v5 = vpop.f32.mrf.mxu3 }
0x28ad   : > { %v4179_v6 = vpop.xlane.xlu2 %4178 }
0x28ae   : > { %v4180_v7 = vmul.f32 %v4179_v6, %v6308_v54 }
0x28b0   : > { %v4181_v9 = vsub.f32 %v4174_v4, %v4180_v7 }
0x28b2   : > { %v4182_v10 = vmul.f32 %v4181_v9, %v4181_v9 }
0x28b4   : > { %v4183_v11 = vsel %vm1992_vm1, %v4182_v10, 0.0 }
0x28b5   : > { %4184 = vadd.xlane.f32.xlu1 %v4183_v11 }
0x2928   : > { %v4185_v61 = vpop.xlane.xlu1 %4184 }
0x2929   : > { %v4186_v17 = vmul.f32 %v4185_v61, %v6308_v54 }
0x292b   : > { %v4187_v18 = vadd.f32 1e-05, %v4186_v17 }
0x292d   : > { %5033 = vrsqrt.f32 %v4187_v18  ;;  %vm4194_vm11 = vweird.f32 %v4187_v18 }
0x2933   : > { %v5034_v21 = vpop.eup %5033 }
0x2934   : > { %v4189_v22 = vmul.f32 %v5034_v21, %v4187_v18  ;;  %vm4195_vm10 = vweird.f32 %v5034_v21 }
0x2935   : > { %vm4196_vm12 = vmor %vm4194_vm11, %vm4195_vm10 }
0x2936   : > { %v4190_v23 = vmul.f32 %v5034_v21, %v4189_v22 }
0x2938   : > { %v4191_v24 = vmul.f32 0.5, %v4190_v23 }
0x293a   : > { %v4192_v27 = vsub.f32 1.5, %v4191_v24 }
0x293c   : > { %v4193_v25 = vmul.f32 %v5034_v21, %v4192_v27 }
0x293e   : > { %v4197_v29 = vsel %vm4196_vm12, %v5034_v21, %v4193_v25 }
0x293f   : > { %v4198_v8 = vmul.f32 %v4197_v29, %v4181_v9 }
0x2941   : > { %v4202_v31 = vmul.f32 %v4939_v26, %v4198_v8 }
0x2943   : > { %v4206_v54 = vadd.f32 %v4940_v30, %v4202_v31 }
0x2945   : > { %v4211_v32 = vpack.c.bf16 %v4206_v54, %v4206_v54 }
0x2947   : > { %4630 = vmatmul.msk.bf16.vlgmr.msrb.gmra.mxu1 %vm1992_vm1, %v4211_v32 }
0x29c4   : > { %v4226_v33 = vpop.f32.mrf.mxu1 }
0x29c5   : > { %4230 = vst.msk [vmem:[%s1912_s2] sm:$0xff] %vm1960_vm0, %v4226_v33 }
0x29c6   : > { %5542 = shalt.err (!%p5539_p3)
}
0x29c7   : > { %4700 = dma.vmem_to_hbm [thread:$0]  (%p6033_p5), %s4245_s5, 128, %s4247_s6, %s4232_s8  }
0x29cc   : > { %v4228_v34 = vpop.f32.mrf.mxu1 }
0x29cd PF: > { %s7016_s2 = sld [smem:[#allocation90_spill]] }
0x29ce   : > { %s7017_s1 = sld [smem:[#allocation87_spill]] }
0x29d3   : > { %p4787_p4 = scmp.ge.s32.totalorder %s7016_s2, 2 }
0x29d4   : > { %s4258_s15 = sand.u32 1, %s7017_s1  }
0x29d5   : > { %p4752_p7 = pnand %p4787_p4, %p6037_p6  ;;  %s4259_s7 = scalar_lea.sflag [#allocation4], %s4258_s15 }
0x29d7   : > { %p4753_p8 = pneg %p4752_p7 }
0x29d9   : > { %5596 = dma.done.wait (%p4753_p8), %s4259_s7, 128  }
0x29da   : > { %5598 = vsyncadd (%p4753_p8), %s4259_s7, 4294967168  ;;  %s7019_s15 = sld [smem:[#allocation91_spill]] }
0x29db   : > { %s7020_s7 = sld [smem:[#allocation88_spill]] }
0x29dc   : > { %s7021_s10 = sld [smem:[#allocation89_spill]] }
0x29dd   : > { %s7022_s11 = sld [smem:[#allocation92_spill]] }
0x29e0   : > { %p134_p11 = scmp.ge.s32.totalorder %s7019_s15, 4  }
0x29e2   :  { %136 = sbr.rel (!%p134_p11) target bundleno = 128 (0x80), region = 405 }
0x29e7   :  { %4265 = vsyncpa [#allocation3], 1 }
0x29e8   :  { %4267 = vsyncpa [#allocation3 + $0x1], 1 }
0x29e9   :  { %4268 = vsyncpa [#allocation6], 1 }
0x29ea   :  { %4269 = vsyncpa [#allocation9], 1 }
0x29eb   :  { %4270 = vsyncpa [#allocation12], 1 }
0x29ec   :  { %4271 = vsyncpa [#allocation15], 1 }
0x29ed   :  { %4272 = vsyncpa [#allocation18], 1 }
0x29ee   :  { %4273 = vsyncpa [#allocation21], 1 }
0x29ef   :  { %4274 = vsyncpa [#allocation24], 1 }
0x29f0   :  { %4275 = vsyncpa [#allocation27], 1 }
0x29f1   :  { %4276 = vsyncpa [#allocation4], 1 }
0x29f2   :  { %4278 = vsyncpa [#allocation4 + $0x1], 1 }

</bundles_post_ra>
